<compile_context>
chip_gen: v5e
topology: v5e:2x2
jax: 0.10.0
libtpu: 0.0.40
codegen_flags: <defaults>
</compile_context>

<pallas_src>
import jax
import jax.numpy as jnp
from jax.experimental import pallas as pl
from jax.experimental.pallas import tpu as pltpu
import numpy as np


DIMS = 1024  # hidden width from the PyTorch module


def mlp_kernel(x_ref, w1_ref, b1_ref, w2_ref, b2_ref, w3_ref, b3_ref, o_ref):
    # x: (TM, D_in) f32; w1: (D_in, 1024), w2: (1024, 1024), w3: (1, 1024) bf16;
    # b1/b2: (1, 1024) f32 in VMEM; b3: (1, 1) f32 in SMEM; out: (TM, 1) f32.
    wdt = w1_ref.dtype

    # Layer 1: MXU matmul (bf16 inputs, f32 accumulation); bias + ReLU on the VPU with
    # the bf16 downcast fused into the epilogue so layer 2 consumes bf16 directly.
    h1 = jnp.dot(x_ref[...].astype(wdt), w1_ref[...],
                 preferred_element_type=jnp.float32)
    h1 = jnp.maximum(h1 + b1_ref[...], 0.0).astype(wdt)

    # Layer 2: MXU matmul, f32 accumulation, bias + ReLU.
    h2 = jnp.dot(h1, w2_ref[...], preferred_element_type=jnp.float32)
    h2 = jnp.maximum(h2 + b2_ref[...], 0.0)

    # Layer 3 (output width 1): keep OFF the MXU -- VPU multiply + XLU lane reduction
    # run as free filler under the layer-2 vmatmul stream. Scalar bias from SMEM.
    w3_row = w3_ref[...].astype(jnp.float32)                       # (1, 1024)
    out = jnp.sum(h2 * w3_row, axis=-1, keepdims=True) + b3_ref[0, 0]
    o_ref[...] = out.astype(o_ref.dtype)


def _round_up(x, m):
    return ((x + m - 1) // m) * m


def _device_tiling():
    """Return (base batch-tile height, minimum #batch tiles) for this TPU generation."""
    try:
        kind = jax.devices()[0].device_kind.lower()
    except Exception:
        return 1024, 1
    if "v5 lite" in kind or "v5e" in kind or "v5litepod" in kind:
        # v5e: 4x128x128 MXUs, 1 TensorCore. 512 keeps 4 independent M stripes in flight
        # and amortizes per-step overhead (don't cap at 128).
        return 512, 1
    if "v6" in kind:
        # v6e: 2x256x256 MXU, 1 TensorCore.
        return 1024, 1
    # v7x (2 TensorCores/chip) and megacore v4/v5p: require >= 2 batch tiles when the
    # batch allows, so the "parallel" grid axis can be split across cores.
    return 1024, 2


def _pick_tm(batch, base_tm, min_tiles):
    """Batch-tile height: even split of B into enough tiles, rounded to the 8-row
    sublane tile, so the last tile carries < 8 rows of padding."""
    n_tiles = max(pl.cdiv(batch, base_tm), min(min_tiles, max(1, batch // 8)))
    tm = _round_up(pl.cdiv(batch, n_tiles), 8)
    return min(tm, _round_up(batch, 8))


def mlp_forward(x, params, *, tm=None):
    """Run the 3-layer MLP forward pass with a single pallas_call.

    x: (B, D_in) float32
    params: w1 (D_in,1024) bf16, b1 (1,1024) f32, w2 (1024,1024) bf16, b2 (1,1024) f32,
            w3 (1,1024) bf16 (PyTorch (out,in) layout), b3 (1,1) f32
    returns: (B, 1) float32
    """
    B, d_in = x.shape
    base_tm, min_tiles = _device_tiling()
    if tm is None:
        tm = _pick_tm(B, base_tm, min_tiles)
    tm = max(1, min(tm, _round_up(B, 8)))

    # Pad the batch to a TM multiple in the wrapper: no ragged last tile, and the padded
    # rows are real zeros (not stale VMEM) if cross-row ops are ever added.
    b_pad = _round_up(B, tm)
    x_in = x if b_pad == B else jnp.pad(x, ((0, b_pad - B), (0, 0)))
    grid = (b_pad // tm,)

    resident = dict(pipeline_mode=pl.Buffered(1))  # constant index map => never re-DMAs
    in_specs = [
        # Activations: one batch tile per grid step (double-buffered by default).
        pl.BlockSpec((tm, d_in), lambda i: (i, 0)),
        # Weights/biases: constant block index => VMEM-resident; single-buffered to
        # avoid a dead 2nd copy (saves ~2.3 MiB, mostly w2).
        pl.BlockSpec((d_in, DIMS), lambda i: (0, 0), **resident),
        pl.BlockSpec((1, DIMS), lambda i: (0, 0), **resident),
        pl.BlockSpec((DIMS, DIMS), lambda i: (0, 0), **resident),
        pl.BlockSpec((1, DIMS), lambda i: (0, 0), **resident),
        pl.BlockSpec((1, DIMS), lambda i: (0, 0), **resident),
        # (1,1) bias as an SMEM scalar (avoids a padded (8,128) VMEM tile + DMA).
        pl.BlockSpec((1, 1), lambda i: (0, 0), memory_space=pltpu.MemorySpace.SMEM),
    ]
    out_specs = pl.BlockSpec((tm, 1), lambda i: (i, 0))

    # VMEM budget scales with TM: ~24 B/elem of (TM, 1024) f32/bf16 intermediates plus
    # ~8 MiB for weights + slack. ~32 MiB at TM=1024, capped under v7x's 64 MiB.
    vmem_limit = int(min(48 << 20, (8 << 20) + 24 * tm * DIMS))

    out = pl.pallas_call(
        mlp_kernel,
        out_shape=jax.ShapeDtypeStruct((b_pad, 1), jnp.float32),
        grid=grid,
        in_specs=in_specs,
        out_specs=out_specs,
        compiler_params=pltpu.CompilerParams(
            dimension_semantics=("parallel",),   # split batch tiles across TCs (v7x)
            vmem_limit_bytes=vmem_limit,
        ),
    )(x_in, params["w1"], params["b1"], params["w2"], params["b2"],
      params["w3"], params["b3"])

    return out if b_pad == B else out[:B]


def init_params(key, input_dims, weight_dtype=jnp.bfloat16):
    """Deterministic init mirroring nn.Linear's U(-1/sqrt(fan_in), 1/sqrt(fan_in)).

    Weights are stored in `weight_dtype` (bf16 by default: halves HBM traffic and is the
    native MXU input rate on v6e/v7x). Pass jnp.float32 for full f32 PyTorch semantics.
    """
    ks = jax.random.split(key, 6)

    def linear(kw, kb, fan_in, fan_out, transpose_w=False):
        bound = 1.0 / np.sqrt(fan_in)
        w = jax.random.uniform(kw, (fan_in, fan_out), jnp.float32, -bound, bound)
        b = jax.random.uniform(kb, (1, fan_out), jnp.float32, -bound, bound)
        if transpose_w:
            w = w.T                                # store as (out, in) = (1, 1024)
        return w.astype(weight_dtype), b

    w1, b1 = linear(ks[0], ks[1], input_dims, DIMS)
    w2, b2 = linear(ks[2], ks[3], DIMS, DIMS)
    w3, b3 = linear(ks[4], ks[5], DIMS, 1, transpose_w=True)   # (1, 1024), (1, 1)
    return {"w1": w1, "b1": b1, "w2": w2, "b2": b2, "w3": w3, "b3": b3}


def mlp_reference(x, p):
    """Pure-JAX reference using the exact same dtypes/casts as the kernel."""
    wdt = p["w1"].dtype
    h1 = jnp.dot(x.astype(wdt), p["w1"], preferred_element_type=jnp.float32)
    h1 = jnp.maximum(h1 + p["b1"], 0.0).astype(wdt)
    h2 = jnp.dot(h1, p["w2"], preferred_element_type=jnp.float32)
    h2 = jnp.maximum(h2 + p["b2"], 0.0)
    return (jnp.sum(h2 * p["w3"].astype(jnp.float32), axis=-1, keepdims=True)
            + p["b3"][0, 0])


if __name__ == "__main__":
    key = jax.random.PRNGKey(0)
    k_params, k_x = jax.random.split(key)

    batch = 8
    input_dims = 32

    params = init_params(k_params, input_dims)
    x = jax.random.normal(k_x, (batch, input_dims), jnp.float32)

    out = jax.block_until_ready(mlp_forward(x, params))
    ref = jax.block_until_ready(mlp_reference(x, params))

    # Kernel and reference share identical bf16 weights, identical cast points and f32
    # accumulation; the only difference is reduction order, so tight tolerances hold.
    np.testing.assert_allclose(np.asarray(out), np.asarray(ref), rtol=1e-3, atol=1e-3)

    assert out.shape == (batch, 1)
    print("KERNEL_OK")
</pallas_src>

<mosaic_0001>
module attributes {stable_mosaic.version = 11 : i64} {
  func.func @mlp_kernel(%arg0: i32, %arg1: memref<8x32xf32, #tpu.memory_space<vmem>>, %arg2: memref<32x1024xbf16, #tpu.memory_space<vmem>>, %arg3: memref<1x1024xf32, #tpu.memory_space<vmem>>, %arg4: memref<1024x1024xbf16, #tpu.memory_space<vmem>>, %arg5: memref<1x1024xf32, #tpu.memory_space<vmem>>, %arg6: memref<1x1024xbf16, #tpu.memory_space<vmem>>, %arg7: memref<1x1xf32, #tpu.memory_space<smem>>, %arg8: memref<8x1xf32, #tpu.memory_space<vmem>>) attributes {dimension_semantics = [#tpu.dimension_semantics<parallel>], iteration_bounds = array<i64: 1>, scalar_prefetch = 0 : i64, scratch_operands = 0 : i64, tpu.core_type = #tpu.core_type<tc>, window_params = [{transform_indices = @transform_0, window_bounds = array<i64: 8, 32>}, {pipeline_mode = #tpu.pipeline_mode<synchronous>, transform_indices = @transform_1, window_bounds = array<i64: 32, 1024>}, {pipeline_mode = #tpu.pipeline_mode<synchronous>, transform_indices = @transform_2, window_bounds = array<i64: 1, 1024>}, {pipeline_mode = #tpu.pipeline_mode<synchronous>, transform_indices = @transform_3, window_bounds = array<i64: 1024, 1024>}, {pipeline_mode = #tpu.pipeline_mode<synchronous>, transform_indices = @transform_4, window_bounds = array<i64: 1, 1024>}, {pipeline_mode = #tpu.pipeline_mode<synchronous>, transform_indices = @transform_5, window_bounds = array<i64: 1, 1024>}, {transform_indices = @transform_6, window_bounds = array<i64: 1, 1>}, {transform_indices = @transform_7, window_bounds = array<i64: 8, 1>}]} {
    %c0 = arith.constant 0 : index
    %c0_0 = arith.constant 0 : index
    %0 = vector.load %arg1[%c0, %c0_0] : memref<8x32xf32, #tpu.memory_space<vmem>>, vector<8x32xf32>
    %1 = arith.truncf %0 : vector<8x32xf32> to vector<8x32xbf16>
    %c0_1 = arith.constant 0 : index
    %c0_2 = arith.constant 0 : index
    %2 = vector.load %arg2[%c0_1, %c0_2] : memref<32x1024xbf16, #tpu.memory_space<vmem>>, vector<32x1024xbf16>
    %cst = arith.constant dense<0.000000e+00> : vector<8x1024xf32>
    %3 = tpu.matmul %1, %2, %cst {dimension_numbers = #tpu.dot_dimension_numbers<[1], [0], [0], [1], [0, 0, 1, 1], [], []>} : vector<8x32xbf16>, vector<32x1024xbf16>, vector<8x1024xf32> -> vector<8x1024xf32>
    %c0_3 = arith.constant 0 : index
    %c0_4 = arith.constant 0 : index
    %4 = vector.load %arg3[%c0_3, %c0_4] : memref<1x1024xf32, #tpu.memory_space<vmem>>, vector<1x1024xf32>
    %5 = vector.broadcast %4 : vector<1x1024xf32> to vector<8x1024xf32>
    %6 = arith.addf %3, %5 : vector<8x1024xf32>
    %cst_5 = arith.constant 0.000000e+00 : f32
    %7 = vector.broadcast %cst_5 : f32 to vector<8x1024xf32>
    %8 = arith.maximumf %6, %7 : vector<8x1024xf32>
    %9 = arith.truncf %8 : vector<8x1024xf32> to vector<8x1024xbf16>
    %c0_6 = arith.constant 0 : index
    %c0_7 = arith.constant 0 : index
    %10 = vector.load %arg4[%c0_6, %c0_7] : memref<1024x1024xbf16, #tpu.memory_space<vmem>>, vector<1024x1024xbf16>
    %cst_8 = arith.constant dense<0.000000e+00> : vector<8x1024xf32>
    %11 = tpu.matmul %9, %10, %cst_8 {dimension_numbers = #tpu.dot_dimension_numbers<[1], [0], [0], [1], [0, 0, 1, 1], [], []>} : vector<8x1024xbf16>, vector<1024x1024xbf16>, vector<8x1024xf32> -> vector<8x1024xf32>
    %c0_9 = arith.constant 0 : index
    %c0_10 = arith.constant 0 : index
    %12 = vector.load %arg5[%c0_9, %c0_10] : memref<1x1024xf32, #tpu.memory_space<vmem>>, vector<1x1024xf32>
    %13 = vector.broadcast %12 : vector<1x1024xf32> to vector<8x1024xf32>
    %14 = arith.addf %11, %13 : vector<8x1024xf32>
    %cst_11 = arith.constant 0.000000e+00 : f32
    %15 = vector.broadcast %cst_11 : f32 to vector<8x1024xf32>
    %16 = arith.maximumf %14, %15 : vector<8x1024xf32>
    %c0_12 = arith.constant 0 : index
    %c0_13 = arith.constant 0 : index
    %17 = vector.load %arg6[%c0_12, %c0_13] : memref<1x1024xbf16, #tpu.memory_space<vmem>>, vector<1x1024xbf16>
    %18 = arith.extf %17 : vector<1x1024xbf16> to vector<1x1024xf32>
    %19 = vector.broadcast %18 : vector<1x1024xf32> to vector<8x1024xf32>
    %20 = arith.mulf %16, %19 : vector<8x1024xf32>
    %cst_14 = arith.constant dense<0.000000e+00> : vector<8xf32>
    %21 = vector.multi_reduction <add>, %20, %cst_14 [1] : vector<8x1024xf32> to vector<8xf32>
    %22 = vector.shape_cast %21 : vector<8xf32> to vector<8x1xf32>
    %c0_15 = arith.constant 0 : index
    %c0_16 = arith.constant 0 : index
    %23 = memref.load %arg7[%c0_15, %c0_16] : memref<1x1xf32, #tpu.memory_space<smem>>
    %24 = vector.broadcast %23 : f32 to vector<8x1xf32>
    %25 = arith.addf %22, %24 : vector<8x1xf32>
    %c0_17 = arith.constant 0 : index
    %c0_18 = arith.constant 0 : index
    %26 = vector.load %arg8[%c0_17, %c0_18] : memref<8x1xf32, #tpu.memory_space<vmem>>, vector<8x1xf32>
    tpu.vector_store %arg8[%c0_17, %c0_18], %25 {strides = array<i32>} : memref<8x1xf32, #tpu.memory_space<vmem>>, vector<8x1xf32>,
    return
  }
  func.func @transform_0(%arg0: i32) -> (i32, i32) {
    %c0_i32 = arith.constant 0 : i32
    %c0_i32_0 = arith.constant 0 : i32
    return %arg0, %c0_i32 : i32, i32
  }
  func.func @transform_1(%arg0: i32) -> (i32, i32) {
    %c0_i32 = arith.constant 0 : i32
    %c0_i32_0 = arith.constant 0 : i32
    %c0_i32_1 = arith.constant 0 : i32
    return %c0_i32, %c0_i32_0 : i32, i32
  }
  func.func @transform_2(%arg0: i32) -> (i32, i32) {
    %c0_i32 = arith.constant 0 : i32
    %c0_i32_0 = arith.constant 0 : i32
    %c0_i32_1 = arith.constant 0 : i32
    return %c0_i32, %c0_i32_0 : i32, i32
  }
  func.func @transform_3(%arg0: i32) -> (i32, i32) {
    %c0_i32 = arith.constant 0 : i32
    %c0_i32_0 = arith.constant 0 : i32
    %c0_i32_1 = arith.constant 0 : i32
    return %c0_i32, %c0_i32_0 : i32, i32
  }
  func.func @transform_4(%arg0: i32) -> (i32, i32) {
    %c0_i32 = arith.constant 0 : i32
    %c0_i32_0 = arith.constant 0 : i32
    %c0_i32_1 = arith.constant 0 : i32
    return %c0_i32, %c0_i32_0 : i32, i32
  }
  func.func @transform_5(%arg0: i32) -> (i32, i32) {
    %c0_i32 = arith.constant 0 : i32
    %c0_i32_0 = arith.constant 0 : i32
    %c0_i32_1 = arith.constant 0 : i32
    return %c0_i32, %c0_i32_0 : i32, i32
  }
  func.func @transform_6(%arg0: i32) -> (i32, i32) {
    %c0_i32 = arith.constant 0 : i32
    %c0_i32_0 = arith.constant 0 : i32
    %c0_i32_1 = arith.constant 0 : i32
    return %c0_i32, %c0_i32_0 : i32, i32
  }
  func.func @transform_7(%arg0: i32) -> (i32, i32) {
    %c0_i32 = arith.constant 0 : i32
    %c0_i32_0 = arith.constant 0 : i32
    return %arg0, %c0_i32 : i32, i32
  }
}

</mosaic_0001>

<bundles_post_ra>
// kernel: tpu_custom_call.1
= control target key start
LH: loop header
LB: loop body
LE: loop exit
PB: predicated region body
PF: predicated region fallthrough
CT: control target
= control target key end

     0   :  { %13 = vsyncpa [#allocation4], 0  ;;  %s7387_s0 = inlined_call_operand.hbm [shape: f32[8,32], index: 0, kind: input, shape index: {}]   ;;  %s7388_s1 = inlined_call_operand.hbm [shape: bf16[32,1024], index: 1, kind: input, shape index: {}]   ;;  %s7389_s2 = inlined_call_operand.hbm [shape: f32[1,1024], index: 2, kind: input, shape index: {}]   ;;  %s7390_s3 = inlined_call_operand.hbm [shape: bf16[1024,1024], index: 3, kind: input, shape index: {}]   ;;  %s7391_s4 = inlined_call_operand.hbm [shape: f32[1,1024], index: 4, kind: input, shape index: {}]   ;;  %s7392_s5 = inlined_call_operand.hbm [shape: bf16[1,1024], index: 5, kind: input, shape index: {}]   ;;  %s7393_s6 = inlined_call_operand.<no memory space> [shape: f32[1,1], index: 6, kind: input, shape index: {}]   ;;  %s7394_s7 = inlined_call_operand.vmem [shape: f32[8,1], index: 7, kind: output, shape index: {}]  }
   0x1   :  { %14 = vsyncpa [#allocation6], 0 }
   0x2   :  { %15 = vsyncpa [#allocation9], 0  ;;  %s32_s26 = sshll.u32 %s7388_s1, 4  ;;  %s33_s26 = int_to_ptr.hbm [resolvable:$true] %s32_s26 }
   0x3   :  { %16 = vsyncpa [#allocation12], 0  ;;  %s7154_s27 = smov [#allocation5]   ;;  %s56_s8 = sshll.u32 %s7390_s3, 4  ;;  %s57_s8 = int_to_ptr.hbm [resolvable:$true] %s56_s8 }
   0x4   :  { %s34_s28 = sshll.u32 %s7154_s27, 4  ;;  %s7155_s9 = smov 512   ;;  %s35_s28 = int_to_ptr.vmem [resolvable:$true] %s34_s28 }
   0x5   :  { %s7156_s10 = smov 32   ;;  %s7157_s11 = smov [#allocation8]  }
   0x6   :  { %40 = dma.hbm_to_vmem [thread:$0]  %s33_s26, 2048, %s35_s28, [#allocation6], %s7155_s9, %s7155_s9, %s7156_s10  }
   0x7   :  { %s58_s12 = sshll.u32 %s7157_s11, 4  ;;  %s22_s15 = sshll.u32 %s7387_s0, 4  ;;  %s59_s12 = int_to_ptr.vmem [resolvable:$true] %s58_s12  ;;  %s23_s15 = int_to_ptr.hbm [resolvable:$true] %s22_s15 }
   0x8   :  { %64 = dma.hbm_to_vmem [thread:$0]  %s57_s8, 65536, %s59_s12, [#allocation9], %s7155_s9, %s7155_s9, %s7156_s10  }
   0x9   :  { %s46_s17 = sshll.u32 %s7389_s2, 4  ;;  %s7158_s18 = smov [#allocation3]   ;;  %s47_s17 = int_to_ptr.hbm [resolvable:$true] %s46_s17 }
   0xa   :  { %s24_s19 = sshll.u32 %s7158_s18, 4  ;;  %s7159_s3 = smov [#allocation7]   ;;  %s25_s19 = int_to_ptr.vmem [resolvable:$true] %s24_s19 }
   0xb   :  { %27 = dma.hbm_to_vmem [thread:$0]  %s23_s15, 128, %s25_s19, [#allocation4]  }
   0xc   :  { %s48_s20 = sshll.u32 %s7159_s3, 4  ;;  %s70_s23 = sshll.u32 %s7391_s4, 4  ;;  %s49_s20 = int_to_ptr.vmem [resolvable:$true] %s48_s20  ;;  %s71_s23 = int_to_ptr.hbm [resolvable:$true] %s70_s23 }
   0xd   :  { %51 = dma.hbm_to_vmem [thread:$0]  %s47_s17, 128, %s49_s20, [#allocation6]  }
   0xe   :  { %s81_s25 = sshll.u32 %s7392_s5, 4  ;;  %s7160_s26 = smov [#allocation10]   ;;  %s82_s25 = int_to_ptr.hbm [resolvable:$true] %s81_s25 }
   0xf   :  { %s72_s2 = sshll.u32 %s7160_s26, 4  ;;  %s7161_s27 = smov [#allocation11]   ;;  %s73_s2 = int_to_ptr.vmem [resolvable:$true] %s72_s2 }
  0x10   :  { %75 = dma.hbm_to_vmem [thread:$0]  %s71_s23, 128, %s73_s2, [#allocation9]  }
  0x11   :  { %s83_s28 = sshll.u32 %s7161_s27, 4  ;;  %s84_s28 = int_to_ptr.vmem [resolvable:$true] %s83_s28 }
  0x12   :  { %86 = dma.hbm_to_vmem [thread:$0]  %s82_s25, 128, %s84_s28, [#allocation12]  }
  0x13   :  { %7146 = dma.done.wait [#allocation4], 128  }
  0x14   :  { %7147 = vsyncadd [#allocation4], 4294967168 }
  0x15   :  { %7148 = dma.done.wait [#allocation6], 2176  }
  0x16   :  { %7149 = vsyncadd [#allocation6], 4294965120 }
  0x17   :  { %7150 = dma.done.wait [#allocation9], 65664  }
  0x18   :  { %7151 = vsyncadd [#allocation9], 4294901632 }
  0x19   :  { %7152 = dma.done.wait [#allocation12], 128  }
  0x1a   :  { %7153 = vsyncadd [#allocation12], 4294967168  ;;  %v4377_v0 = vld [vmem:[#allocation5 + $0x40] sm:$0xf]  ;;  %v6471_v2 = vld [vmem:[#allocation5 + $0x44] sm:$0xf] }
  0x1b   :  { %v6475_v1 = vld [vmem:[#allocation5 + $0x5c] sm:$0xf0]  ;;  %v4379_v4 = vld [vmem:[#allocation5 + $0x60] sm:$0xf0]  ;;  %v4385_v5 = vld [vmem:[#allocation5 + $0x48] sm:$0xf] }
  0x1c   :  { %v4378_v3 = vor.u32 %v6475_v1, %v4377_v0  ;;  %v6476_v6 = vld [vmem:[#allocation5 + $0x64] sm:$0xf0]  ;;  %v4382_v7 = vor.u32 %v6471_v2, %v4379_v4  ;;  %v6472_v9 = vld [vmem:[#allocation5 + $0x4c] sm:$0xf]  ;;  %v4345_v11 = vld [vmem:[#allocation5] sm:$0xf] }
  0x1d   :  { %v4386_v8 = vor.u32 %v6476_v6, %v4385_v5  ;;  %v4387_v10 = vld [vmem:[#allocation5 + $0x68] sm:$0xf0]  ;;  %v6467_v13 = vld [vmem:[#allocation5 + $0x1c] sm:$0xf0]  ;;  %v6463_v14 = vld [vmem:[#allocation5 + $0x4] sm:$0xf] }
  0x1e   :  { %240 = vmatpush.bf16.msra.mxu0 %v4378_v3  ;;  %v4390_v12 = vor.u32 %v6472_v9, %v4387_v10  ;;  %v4347_v15 = vld [vmem:[#allocation5 + $0x20] sm:$0xf0]  ;;  %253 = vmatpush.bf16.msra.mxu1 %v4382_v7  ;;  %v4346_v16 = vor.u32 %v6467_v13, %v4345_v11  ;;  %v4353_v18 = vld [vmem:[#allocation5 + $0x8] sm:$0xf]  ;;  %v6464_v20 = vld [vmem:[#allocation5 + $0xc] sm:$0xf] }
  0x1f   :  { %266 = vmatpush.bf16.msra.mxu2 %v4386_v8  ;;  %v4350_v17 = vor.u32 %v6463_v14, %v4347_v15  ;;  %v6468_v19 = vld [vmem:[#allocation5 + $0x24] sm:$0xf0]  ;;  %v4355_v22 = vld [vmem:[#allocation5 + $0x28] sm:$0xf0]  ;;  %v114_v23 = vld [vmem:[#allocation3] sm:$0xff]  ;;  %vm230_vm0 = vcmask 261120  }
  0x20   :  { %279 = vmatpush.bf16.msra.mxu3 %v4390_v12  ;;  %v4354_v21 = vor.u32 %v6468_v19, %v4353_v18  ;;  %v4393_v24 = vld [vmem:[#allocation5 + $0x50] sm:$0xf]  ;;  %v4358_v25 = vor.u32 %v6464_v20, %v4355_v22  ;;  %v7220_v26 = vpack.c.bf16 %v114_v23, %v114_v23  ;;  %v6473_v28 = vld [vmem:[#allocation5 + $0x54] sm:$0xf]  ;;  %v4401_v32 = vld [vmem:[#allocation5 + $0x58] sm:$0xf] }
  0x21   :  { %v6477_v27 = vld [vmem:[#allocation5 + $0x6c] sm:$0xf0]  ;;  %v4395_v29 = vld [vmem:[#allocation5 + $0x70] sm:$0xf0]  ;;  %v6478_v33 = vld [vmem:[#allocation5 + $0x74] sm:$0xf0] }
  0x22   :  { %241 = vmatpush.bf16.msra.mxu0 %v4346_v16  ;;  %v4394_v30 = vor.u32 %v6477_v27, %v4393_v24  ;;  %v4398_v31 = vor.u32 %v6473_v28, %v4395_v29  ;;  %v6474_v34 = vld [vmem:[#allocation5 + $0x5c] sm:$0xf]  ;;  %254 = vmatpush.bf16.msra.mxu1 %v4350_v17  ;;  %v4402_v35 = vor.u32 %v6478_v33, %v4401_v32  ;;  %v4361_v37 = vld [vmem:[#allocation5 + $0x10] sm:$0xf]  ;;  %v6465_v41 = vld [vmem:[#allocation5 + $0x14] sm:$0xf] }
  0x23   :  { %267 = vmatpush.bf16.msra.mxu2 %v4354_v21  ;;  %v4403_v36 = vld [vmem:[#allocation5 + $0x78] sm:$0xf0]  ;;  %v6469_v38 = vld [vmem:[#allocation5 + $0x2c] sm:$0xf0]  ;;  %v4363_v42 = vld [vmem:[#allocation5 + $0x30] sm:$0xf0] }
  0x24   :  { %280 = vmatpush.bf16.msra.mxu3 %v4358_v25  ;;  %v4406_v39 = vor.u32 %v6474_v34, %v4403_v36  ;;  %v4362_v40 = vor.u32 %v6469_v38, %v4361_v37  ;;  %v4369_v43 = vld [vmem:[#allocation5 + $0x18] sm:$0xf]  ;;  %v4366_v44 = vor.u32 %v6465_v41, %v4363_v42  ;;  %v6466_v46 = vld [vmem:[#allocation5 + $0x1c] sm:$0xf]  ;;  %v4641_v48 = vld [vmem:[#allocation8 + $0x1c0] sm:$0xf] }
  0x25   :  { %4407 = vmatmul.msk.bf16.vlgmr.msra.gmra.mxu0 %vm230_vm0, %v7220_v26  ;;  %v6470_v45 = vld [vmem:[#allocation5 + $0x34] sm:$0xf0]  ;;  %v4371_v47 = vld [vmem:[#allocation5 + $0x38] sm:$0xf0]  ;;  %4408 = vmatmul.msk.bf16.vlgmr.msra.gmra.mxu1 %vm230_vm0, %v7220_v26  ;;  %v6539_v49 = vld [vmem:[#allocation8 + $0x1dc] sm:$0xf0] }
  0x26   :  { %292 = vmatpush.bf16.msrb.mxu0 %v4394_v30  ;;  %305 = vmatpush.bf16.msrb.mxu1 %v4398_v31  ;;  %v4897_v50 = vld [vmem:[#allocation8 + $0x3c0] sm:$0xf]  ;;  %v4370_v51 = vor.u32 %v6470_v45, %v4369_v43  ;;  %v4642_v52 = vor.u32 %v6539_v49, %v4641_v48  ;;  %v4374_v56 = vor.u32 %v6466_v46, %v4371_v47  ;;  %vm4333_vm1 = vcmask 7168  }
  0x27   :  { %4409 = vmatmul.msk.bf16.vlgmr.msra.gmra.mxu2 %vm230_vm0, %v7220_v26  ;;  %4410 = vmatmul.msk.bf16.vlgmr.msra.gmra.mxu3 %vm230_vm0, %v7220_v26  ;;  %v6603_v53 = vld [vmem:[#allocation8 + $0x3dc] sm:$0xf0] }
  0x28   :  { %318 = vmatpush.bf16.msrb.mxu2 %v4402_v35  ;;  %v4609_v54 = vld [vmem:[#allocation8 + $0x180] sm:$0xf]  ;;  %331 = vmatpush.bf16.msrb.mxu3 %v4406_v39  ;;  %v4898_v57 = vor.u32 %v6603_v53, %v4897_v50 }
  0x29   :  { %v6531_v55 = vld [vmem:[#allocation8 + $0x19c] sm:$0xf0] }
  0x2a   :  { %293 = vmatpush.bf16.msrb.mxu0 %v4362_v40  ;;  %v4865_v58 = vld [vmem:[#allocation8 + $0x380] sm:$0xf]  ;;  %306 = vmatpush.bf16.msrb.mxu1 %v4366_v44  ;;  %v4610_v61 = vor.u32 %v6531_v55, %v4609_v54 }
  0x2b   :  { %v6595_v59 = vld [vmem:[#allocation8 + $0x39c] sm:$0xf0] }
  0x2c   :  { %v5153_v60 = vld [vmem:[#allocation8 + $0x5c0] sm:$0xf]  ;;  %v4866_v1 = vor.u32 %v6595_v59, %v4865_v58  ;;  %319 = vmatpush.bf16.msrb.mxu2 %v4370_v51  ;;  %332 = vmatpush.bf16.msrb.mxu3 %v4374_v56 }
  0x2d   :  { %v6667_v62 = vld [vmem:[#allocation8 + $0x5dc] sm:$0xf0] }
  0x2e   :  { %3444 = vmatpush.bf16.msra.mxu0 %v4642_v52  ;;  %v5409_v63 = vld [vmem:[#allocation8 + $0x7c0] sm:$0xf]  ;;  %3457 = vmatpush.bf16.msra.mxu1 %v4898_v57  ;;  %v5154_v2 = vor.u32 %v6667_v62, %v5153_v60 }
  0x2f   :  { %v6731_v0 = vld [vmem:[#allocation8 + $0x7dc] sm:$0xf0] }
  0x30   :  { %v5410_v3 = vor.u32 %v6731_v0, %v5409_v63  ;;  %v4577_v4 = vld [vmem:[#allocation8 + $0x140] sm:$0xf]  ;;  %3470 = vmatpush.bf16.msra.mxu2 %v5154_v2 }
  0x31   :  { %v6523_v5 = vld [vmem:[#allocation8 + $0x15c] sm:$0xf0] }
  0x32   :  { %v4833_v6 = vld [vmem:[#allocation8 + $0x340] sm:$0xf]  ;;  %3445 = vmatpush.bf16.msra.mxu0 %v4610_v61  ;;  %3483 = vmatpush.bf16.msra.mxu3 %v5410_v3  ;;  %v4578_v13 = vor.u32 %v6523_v5, %v4577_v4 }
  0x33   :  { %v6587_v7 = vld [vmem:[#allocation8 + $0x35c] sm:$0xf0]  ;;  %3458 = vmatpush.bf16.msra.mxu1 %v4866_v1 }
  0x34   :  { %v5121_v8 = vld [vmem:[#allocation8 + $0x580] sm:$0xf]  ;;  %v4834_v15 = vor.u32 %v6587_v7, %v4833_v6 }
  0x35   :  { %v6659_v9 = vld [vmem:[#allocation8 + $0x59c] sm:$0xf0]  ;;  %4411 = vmatmul.msk.bf16.vlgmr.msrb.gmra.mxu0 %vm230_vm0, %v7220_v26  ;;  %4412 = vmatmul.msk.bf16.vlgmr.msrb.gmra.mxu1 %vm230_vm0, %v7220_v26 }
  0x36   :  { %v5122_v10 = vor.u32 %v6659_v9, %v5121_v8  ;;  %v5377_v11 = vld [vmem:[#allocation8 + $0x780] sm:$0xf]  ;;  %3446 = vmatpush.bf16.msra.mxu0 %v4578_v13 }
  0x37   :  { %v6723_v12 = vld [vmem:[#allocation8 + $0x79c] sm:$0xf0]  ;;  %3459 = vmatpush.bf16.msra.mxu1 %v4834_v15  ;;  %4413 = vmatmul.msk.bf16.vlgmr.msrb.gmra.mxu2 %vm230_vm0, %v7220_v26 }
  0x38   :  { %v5378_v14 = vor.u32 %v6723_v12, %v5377_v11  ;;  %v5089_v16 = vld [vmem:[#allocation8 + $0x540] sm:$0xf]  ;;  %3471 = vmatpush.bf16.msra.mxu2 %v5122_v10  ;;  %4414 = vmatmul.msk.bf16.vlgmr.msrb.gmra.mxu3 %vm230_vm0, %v7220_v26 }
  0x39   :  { %v6651_v17 = vld [vmem:[#allocation8 + $0x55c] sm:$0xf0] }
  0x3a   :  { %v5345_v18 = vld [vmem:[#allocation8 + $0x740] sm:$0xf]  ;;  %v5090_v23 = vor.u32 %v6651_v17, %v5089_v16  ;;  %3484 = vmatpush.bf16.msra.mxu3 %v5378_v14 }
  0x3b   :  { %v6715_v19 = vld [vmem:[#allocation8 + $0x75c] sm:$0xf0] }
  0x3c   :  { %v4545_v20 = vld [vmem:[#allocation8 + $0x100] sm:$0xf]  ;;  %v5346_v25 = vor.u32 %v6715_v19, %v5345_v18  ;;  %3472 = vmatpush.bf16.msra.mxu2 %v5090_v23 }
  0x3d   :  { %v6515_v21 = vld [vmem:[#allocation8 + $0x11c] sm:$0xf0] }
  0x3e   :  { %v4801_v22 = vld [vmem:[#allocation8 + $0x300] sm:$0xf]  ;;  %v4546_v31 = vor.u32 %v6515_v21, %v4545_v20  ;;  %3485 = vmatpush.bf16.msra.mxu3 %v5346_v25 }
  0x3f   :  { %v6579_v24 = vld [vmem:[#allocation8 + $0x31c] sm:$0xf0] }
  0x40   :  { %v5057_v27 = vld [vmem:[#allocation8 + $0x500] sm:$0xf]  ;;  %v4802_v32 = vor.u32 %v6579_v24, %v4801_v22  ;;  %3447 = vmatpush.bf16.msra.mxu0 %v4546_v31 }
  0x41   :  { %v6643_v28 = vld [vmem:[#allocation8 + $0x51c] sm:$0xf0] }
  0x42   :  { %v5313_v29 = vld [vmem:[#allocation8 + $0x700] sm:$0xf]  ;;  %v5058_v36 = vor.u32 %v6643_v28, %v5057_v27  ;;  %3460 = vmatpush.bf16.msra.mxu1 %v4802_v32 }
  0x43   :  { %v6707_v30 = vld [vmem:[#allocation8 + $0x71c] sm:$0xf0] }
  0x44   :  { %v4513_v33 = vld [vmem:[#allocation8 + $0xc0] sm:$0xf]  ;;  %v5314_v38 = vor.u32 %v6707_v30, %v5313_v29  ;;  %3473 = vmatpush.bf16.msra.mxu2 %v5058_v36 }
  0x45   :  { %v6507_v34 = vld [vmem:[#allocation8 + $0xdc] sm:$0xf0] }
  0x46   :  { %v4769_v35 = vld [vmem:[#allocation8 + $0x2c0] sm:$0xf]  ;;  %v4514_v43 = vor.u32 %v6507_v34, %v4513_v33  ;;  %3486 = vmatpush.bf16.msra.mxu3 %v5314_v38 }
  0x47   :  { %v6571_v37 = vld [vmem:[#allocation8 + $0x2dc] sm:$0xf0] }
  0x48   :  { %v5025_v39 = vld [vmem:[#allocation8 + $0x4c0] sm:$0xf]  ;;  %v4770_v44 = vor.u32 %v6571_v37, %v4769_v35  ;;  %3448 = vmatpush.bf16.msra.mxu0 %v4514_v43 }
  0x49   :  { %v6635_v40 = vld [vmem:[#allocation8 + $0x4dc] sm:$0xf0] }
  0x4a   :  { %v5281_v41 = vld [vmem:[#allocation8 + $0x6c0] sm:$0xf]  ;;  %v5026_v48 = vor.u32 %v6635_v40, %v5025_v39  ;;  %3461 = vmatpush.bf16.msra.mxu1 %v4770_v44 }
  0x4b   :  { %v6699_v42 = vld [vmem:[#allocation8 + $0x6dc] sm:$0xf0] }
  0x4c   :  { %v4481_v45 = vld [vmem:[#allocation8 + $0x80] sm:$0xf]  ;;  %v5282_v50 = vor.u32 %v6699_v42, %v5281_v41  ;;  %3474 = vmatpush.bf16.msra.mxu2 %v5026_v48 }
  0x4d   :  { %v6499_v46 = vld [vmem:[#allocation8 + $0x9c] sm:$0xf0] }
  0x4e   :  { %v4737_v47 = vld [vmem:[#allocation8 + $0x280] sm:$0xf]  ;;  %v4482_v55 = vor.u32 %v6499_v46, %v4481_v45  ;;  %3487 = vmatpush.bf16.msra.mxu3 %v5282_v50 }
  0x4f   :  { %v6563_v49 = vld [vmem:[#allocation8 + $0x29c] sm:$0xf0] }
  0x50   :  { %v4993_v51 = vld [vmem:[#allocation8 + $0x480] sm:$0xf]  ;;  %v4738_v26 = vor.u32 %v6563_v49, %v4737_v47  ;;  %3449 = vmatpush.bf16.msra.mxu0 %v4482_v55 }
  0x51   :  { %v6627_v52 = vld [vmem:[#allocation8 + $0x49c] sm:$0xf0] }
  0x52   :  { %v5249_v53 = vld [vmem:[#allocation8 + $0x680] sm:$0xf]  ;;  %v4994_v59 = vor.u32 %v6627_v52, %v4993_v51  ;;  %3462 = vmatpush.bf16.msra.mxu1 %v4738_v26 }
  0x53   :  { %v6691_v54 = vld [vmem:[#allocation8 + $0x69c] sm:$0xf0] }
  0x54   :  { %v4449_v56 = vld [vmem:[#allocation8 + $0x40] sm:$0xf]  ;;  %v5250_v61 = vor.u32 %v6691_v54, %v5249_v53  ;;  %3475 = vmatpush.bf16.msra.mxu2 %v4994_v59 }
  0x55   :  { %v6491_v57 = vld [vmem:[#allocation8 + $0x5c] sm:$0xf0] }
  0x56   :  { %v4705_v58 = vld [vmem:[#allocation8 + $0x240] sm:$0xf]  ;;  %v4450_v2 = vor.u32 %v6491_v57, %v4449_v56  ;;  %3488 = vmatpush.bf16.msra.mxu3 %v5250_v61 }
  0x57   :  { %v6555_v60 = vld [vmem:[#allocation8 + $0x25c] sm:$0xf0] }
  0x58   :  { %v4961_v62 = vld [vmem:[#allocation8 + $0x440] sm:$0xf]  ;;  %v4706_v5 = vor.u32 %v6555_v60, %v4705_v58  ;;  %3450 = vmatpush.bf16.msra.mxu0 %v4450_v2 }
  0x59   :  { %v6619_v63 = vld [vmem:[#allocation8 + $0x45c] sm:$0xf0] }
  0x5a   :  { %v5217_v0 = vld [vmem:[#allocation8 + $0x640] sm:$0xf]  ;;  %v4962_v9 = vor.u32 %v6619_v63, %v4961_v62  ;;  %3463 = vmatpush.bf16.msra.mxu1 %v4706_v5 }
  0x5b   :  { %v6683_v1 = vld [vmem:[#allocation8 + $0x65c] sm:$0xf0] }
  0x5c   :  { %v4417_v3 = vld [vmem:[#allocation8] sm:$0xf]  ;;  %v5218_v13 = vor.u32 %v6683_v1, %v5217_v0  ;;  %3476 = vmatpush.bf16.msra.mxu2 %v4962_v9 }
  0x5d   :  { %v6483_v4 = vld [vmem:[#allocation8 + $0x1c] sm:$0xf0] }
  0x5e   :  { %v4673_v6 = vld [vmem:[#allocation8 + $0x200] sm:$0xf]  ;;  %v4418_v17 = vor.u32 %v6483_v4, %v4417_v3  ;;  %3489 = vmatpush.bf16.msra.mxu3 %v5218_v13 }
  0x5f   :  { %v6547_v7 = vld [vmem:[#allocation8 + $0x21c] sm:$0xf0] }
  0x60   :  { %v5665_v8 = vld [vmem:[#allocation8 + $0x9c0] sm:$0xf]  ;;  %v4674_v21 = vor.u32 %v6547_v7, %v4673_v6  ;;  %3451 = vmatpush.bf16.msra.mxu0 %v4418_v17 }
  0x61   :  { %v6795_v10 = vld [vmem:[#allocation8 + $0x9dc] sm:$0xf0] }
  0x62   :  { %v5921_v11 = vld [vmem:[#allocation8 + $0xbc0] sm:$0xf]  ;;  %v5666_v22 = vor.u32 %v6795_v10, %v5665_v8  ;;  %3464 = vmatpush.bf16.msra.mxu1 %v4674_v21 }
  0x63   :  { %v6859_v12 = vld [vmem:[#allocation8 + $0xbdc] sm:$0xf0] }
  0x64   :  { %v4929_v14 = vld [vmem:[#allocation8 + $0x400] sm:$0xf]  ;;  %v5922_v25 = vor.u32 %v6859_v12, %v5921_v11  ;;  %3496 = vmatpush.bf16.msrb.mxu0 %v5666_v22 }
  0x65   :  { %v6611_v15 = vld [vmem:[#allocation8 + $0x41c] sm:$0xf0] }
  0x66   :  { %v5185_v16 = vld [vmem:[#allocation8 + $0x600] sm:$0xf]  ;;  %v4930_v29 = vor.u32 %v6611_v15, %v4929_v14  ;;  %3509 = vmatpush.bf16.msrb.mxu1 %v5922_v25 }
  0x67   :  { %v6675_v18 = vld [vmem:[#allocation8 + $0x61c] sm:$0xf0] }
  0x68   :  { %v6177_v19 = vld [vmem:[#allocation8 + $0xdc0] sm:$0xf]  ;;  %v5186_v32 = vor.u32 %v6675_v18, %v5185_v16  ;;  %3477 = vmatpush.bf16.msra.mxu2 %v4930_v29 }
  0x69   :  { %v6923_v20 = vld [vmem:[#allocation8 + $0xddc] sm:$0xf0] }
  0x6a   :  { %v6433_v23 = vld [vmem:[#allocation8 + $0xfc0] sm:$0xf]  ;;  %v6178_v33 = vor.u32 %v6923_v20, %v6177_v19  ;;  %3490 = vmatpush.bf16.msra.mxu3 %v5186_v32 }
  0x6b   :  { %v6987_v24 = vld [vmem:[#allocation8 + $0xfdc] sm:$0xf0] }
  0x6c   :  { %v5633_v27 = vld [vmem:[#allocation8 + $0x980] sm:$0xf]  ;;  %v6434_v34 = vor.u32 %v6987_v24, %v6433_v23  ;;  %3522 = vmatpush.bf16.msrb.mxu2 %v6178_v33 }
  0x6d   :  { %v6787_v28 = vld [vmem:[#allocation8 + $0x99c] sm:$0xf0] }
  0x6e   :  { %v5889_v30 = vld [vmem:[#allocation8 + $0xb80] sm:$0xf]  ;;  %v5634_v37 = vor.u32 %v6787_v28, %v5633_v27  ;;  %3535 = vmatpush.bf16.msrb.mxu3 %v6434_v34 }
  0x6f   :  { %v6851_v31 = vld [vmem:[#allocation8 + $0xb9c] sm:$0xf0] }
  0x70   :  { %v6145_v35 = vld [vmem:[#allocation8 + $0xd80] sm:$0xf]  ;;  %v5890_v40 = vor.u32 %v6851_v31, %v5889_v30  ;;  %3497 = vmatpush.bf16.msrb.mxu0 %v5634_v37 }
  0x71   :  { %v6915_v36 = vld [vmem:[#allocation8 + $0xd9c] sm:$0xf0] }
  0x72   :  { %v6401_v38 = vld [vmem:[#allocation8 + $0xf80] sm:$0xf]  ;;  %v6146_v45 = vor.u32 %v6915_v36, %v6145_v35  ;;  %3510 = vmatpush.bf16.msrb.mxu1 %v5890_v40 }
  0x73   :  { %v6979_v39 = vld [vmem:[#allocation8 + $0xf9c] sm:$0xf0] }
  0x74   :  { %v5601_v41 = vld [vmem:[#allocation8 + $0x940] sm:$0xf]  ;;  %v6402_v46 = vor.u32 %v6979_v39, %v6401_v38  ;;  %3523 = vmatpush.bf16.msrb.mxu2 %v6146_v45 }
  0x75   :  { %v6779_v42 = vld [vmem:[#allocation8 + $0x95c] sm:$0xf0] }
  0x76   :  { %v5857_v43 = vld [vmem:[#allocation8 + $0xb40] sm:$0xf]  ;;  %v5602_v49 = vor.u32 %v6779_v42, %v5601_v41  ;;  %3536 = vmatpush.bf16.msrb.mxu3 %v6402_v46 }
  0x77   :  { %v6843_v44 = vld [vmem:[#allocation8 + $0xb5c] sm:$0xf0] }
  0x78   :  { %v6113_v47 = vld [vmem:[#allocation8 + $0xd40] sm:$0xf]  ;;  %v5858_v52 = vor.u32 %v6843_v44, %v5857_v43  ;;  %3498 = vmatpush.bf16.msrb.mxu0 %v5602_v49 }
  0x79   :  { %v6907_v48 = vld [vmem:[#allocation8 + $0xd5c] sm:$0xf0] }
  0x7a   :  { %v6369_v50 = vld [vmem:[#allocation8 + $0xf40] sm:$0xf]  ;;  %v6114_v56 = vor.u32 %v6907_v48, %v6113_v47  ;;  %3511 = vmatpush.bf16.msrb.mxu1 %v5858_v52 }
  0x7b   :  { %v6971_v51 = vld [vmem:[#allocation8 + $0xf5c] sm:$0xf0] }
  0x7c   :  { %v5569_v53 = vld [vmem:[#allocation8 + $0x900] sm:$0xf]  ;;  %v6370_v57 = vor.u32 %v6971_v51, %v6369_v50  ;;  %3524 = vmatpush.bf16.msrb.mxu2 %v6114_v56  ;;  %v7238_v51 = vld [vmem:[#allocation7] sm:$0xff]  ;;  %v6535_v56 = vld [vmem:[#allocation8 + $0x1c4] sm:$0xf] }
  0x7d   :  { %v6771_v54 = vld [vmem:[#allocation8 + $0x91c] sm:$0xf0]  ;;  %v134_v52 = vperm.slane %v7238_v51, 0 }
  0x7e   :  { %v5825_v55 = vld [vmem:[#allocation8 + $0xb00] sm:$0xf]  ;;  %v5570_v60 = vor.u32 %v6771_v54, %v5569_v53  ;;  %3537 = vmatpush.bf16.msrb.mxu3 %v6370_v57  ;;  %v135_v53 = vperm.slane %v7238_v51, 1  ;;  %v4643_v57 = vld [vmem:[#allocation8 + $0x1e0] sm:$0xf0] }
  0x7f   :  { %v6835_v26 = vld [vmem:[#allocation8 + $0xb1c] sm:$0xf0] }
  0x80   :  { %v6081_v58 = vld [vmem:[#allocation8 + $0xd00] sm:$0xf]  ;;  %v5826_v63 = vor.u32 %v6835_v26, %v5825_v55  ;;  %3499 = vmatpush.bf16.msrb.mxu0 %v5570_v60  ;;  %v4899_v60 = vld [vmem:[#allocation8 + $0x3e0] sm:$0xf0] }
  0x81   :  { %v6899_v59 = vld [vmem:[#allocation8 + $0xd1c] sm:$0xf0] }
  0x82   :  { %v6337_v61 = vld [vmem:[#allocation8 + $0xf00] sm:$0xf]  ;;  %v6082_v4 = vor.u32 %v6899_v59, %v6081_v58  ;;  %3512 = vmatpush.bf16.msrb.mxu1 %v5826_v63  ;;  %v6599_v59 = vld [vmem:[#allocation8 + $0x3c4] sm:$0xf]  ;;  %v136_v63 = vperm.slane %v7238_v51, 2 }
  0x83   :  { %v6963_v62 = vld [vmem:[#allocation8 + $0xf1c] sm:$0xf0] }
  0x84   :  { %v5537_v0 = vld [vmem:[#allocation8 + $0x8c0] sm:$0xf]  ;;  %v6338_v5 = vor.u32 %v6963_v62, %v6337_v61  ;;  %3525 = vmatpush.bf16.msrb.mxu2 %v6082_v4  ;;  %v6527_v4 = vld [vmem:[#allocation8 + $0x184] sm:$0xf] }
  0x85   :  { %v6763_v1 = vld [vmem:[#allocation8 + $0x8dc] sm:$0xf0] }
  0x86   :  { %v5793_v2 = vld [vmem:[#allocation8 + $0xac0] sm:$0xf]  ;;  %v5538_v6 = vor.u32 %v6763_v1, %v5537_v0  ;;  %3538 = vmatpush.bf16.msrb.mxu3 %v6338_v5  ;;  %v4646_v0 = vor.u32 %v6535_v56, %v4643_v57  ;;  %v4611_v5 = vld [vmem:[#allocation8 + $0x1a0] sm:$0xf0] }
  0x87   :  { %v6827_v3 = vld [vmem:[#allocation8 + $0xadc] sm:$0xf0]  ;;  %v5347_v56 = vld [vmem:[#allocation8 + $0x760] sm:$0xf0] }
  0x88   :  { %v5794_v7 = vor.u32 %v6827_v3, %v5793_v2  ;;  %v5505_v8 = vld [vmem:[#allocation8 + $0x880] sm:$0xf]  ;;  %3500 = vmatpush.bf16.msrb.mxu0 %v5538_v6  ;;  %v137_v2 = vperm.slane %v7238_v51, 3  ;;  %v4902_v3 = vor.u32 %v6599_v59, %v4899_v60  ;;  %v6503_v57 = vld [vmem:[#allocation8 + $0xc4] sm:$0xf] }
  0x89   :  { %v6755_v9 = vld [vmem:[#allocation8 + $0x89c] sm:$0xf0]  ;;  %v4515_v59 = vld [vmem:[#allocation8 + $0xe0] sm:$0xf0] }
  0x8a   :  { %v5761_v10 = vld [vmem:[#allocation8 + $0xa80] sm:$0xf]  ;;  %v5506_v12 = vor.u32 %v6755_v9, %v5505_v8  ;;  %3513 = vmatpush.bf16.msrb.mxu1 %v5794_v7  ;;  %v6591_v7 = vld [vmem:[#allocation8 + $0x384] sm:$0xf] }
  0x8b   :  { %v6819_v11 = vld [vmem:[#allocation8 + $0xa9c] sm:$0xf0]  ;;  %v4867_v8 = vld [vmem:[#allocation8 + $0x3a0] sm:$0xf0] }
  0x8c   :  { %v5762_v13 = vor.u32 %v6819_v11, %v5761_v10  ;;  %3501 = vmatpush.bf16.msrb.mxu0 %v5506_v12  ;;  %v6049_v14 = vld [vmem:[#allocation8 + $0xcc0] sm:$0xf]  ;;  %v6567_v60 = vld [vmem:[#allocation8 + $0x2c4] sm:$0xf] }
  0x8d   :  { %v6891_v15 = vld [vmem:[#allocation8 + $0xcdc] sm:$0xf0] }
  0x8e   :  { %3514 = vmatpush.bf16.msrb.mxu1 %v5762_v13  ;;  %v6305_v16 = vld [vmem:[#allocation8 + $0xec0] sm:$0xf]  ;;  %v6050_v17 = vor.u32 %v6891_v15, %v6049_v14  ;;  %v4614_v13 = vor.u32 %v6527_v4, %v4611_v5  ;;  %v6663_v14 = vld [vmem:[#allocation8 + $0x5c4] sm:$0xf]  ;;  %v141_v4 = vperm.slane %v7238_v51, 7 }
  0x8f   :  { %v6955_v18 = vld [vmem:[#allocation8 + $0xedc] sm:$0xf0]  ;;  %v5155_v15 = vld [vmem:[#allocation8 + $0x5e0] sm:$0xf0] }
  0x90   :  { %v6306_v19 = vor.u32 %v6955_v18, %v6305_v16  ;;  %v5473_v20 = vld [vmem:[#allocation8 + $0x840] sm:$0xf]  ;;  %3526 = vmatpush.bf16.msrb.mxu2 %v6050_v17  ;;  %v6727_v16 = vld [vmem:[#allocation8 + $0x7c4] sm:$0xf] }
  0x91   :  { %v6747_v21 = vld [vmem:[#allocation8 + $0x85c] sm:$0xf0]  ;;  %v6639_v5 = vld [vmem:[#allocation8 + $0x504] sm:$0xf] }
  0x92   :  { %v5474_v22 = vor.u32 %v6747_v21, %v5473_v20  ;;  %v5729_v23 = vld [vmem:[#allocation8 + $0xa40] sm:$0xf]  ;;  %3539 = vmatpush.bf16.msrb.mxu3 %v6306_v19  ;;  %v4870_v19 = vor.u32 %v6591_v7, %v4867_v8  ;;  %v5411_v20 = vld [vmem:[#allocation8 + $0x7e0] sm:$0xf0] }
  0x93   :  { %v6811_v24 = vld [vmem:[#allocation8 + $0xa5c] sm:$0xf0]  ;;  %v6519_v21 = vld [vmem:[#allocation8 + $0x144] sm:$0xf] }
  0x94   :  { %v5730_v25 = vor.u32 %v6811_v24, %v5729_v23  ;;  %v6017_v27 = vld [vmem:[#allocation8 + $0xc80] sm:$0xf]  ;;  %3502 = vmatpush.bf16.msrb.mxu0 %v5474_v22  ;;  %v4579_v22 = vld [vmem:[#allocation8 + $0x160] sm:$0xf0] }
  0x95   :  { %v6883_v28 = vld [vmem:[#allocation8 + $0xc9c] sm:$0xf0]  ;;  %v6583_v24 = vld [vmem:[#allocation8 + $0x344] sm:$0xf] }
  0x96   :  { %v6273_v29 = vld [vmem:[#allocation8 + $0xe80] sm:$0xf]  ;;  %v6018_v30 = vor.u32 %v6883_v28, %v6017_v27  ;;  %3515 = vmatpush.bf16.msrb.mxu1 %v5730_v25  ;;  %v4835_v25 = vld [vmem:[#allocation8 + $0x360] sm:$0xf0]  ;;  %v5158_v28 = vor.u32 %v6663_v14, %v5155_v15 }
  0x97   :  { %v6947_v31 = vld [vmem:[#allocation8 + $0xe9c] sm:$0xf0]  ;;  %v5059_v7 = vld [vmem:[#allocation8 + $0x520] sm:$0xf0] }
  0x98   :  { %v6274_v32 = vor.u32 %v6947_v31, %v6273_v29  ;;  %v5441_v33 = vld [vmem:[#allocation8 + $0x800] sm:$0xf]  ;;  %3527 = vmatpush.bf16.msrb.mxu2 %v6018_v30  ;;  %v138_v29 = vperm.slane %v7238_v51, 4  ;;  %v5414_v31 = vor.u32 %v6727_v16, %v5411_v20  ;;  %v4483_v15 = vld [vmem:[#allocation8 + $0xa0] sm:$0xf0] }
  0x99   :  { %v6739_v34 = vld [vmem:[#allocation8 + $0x81c] sm:$0xf0]  ;;  %v6559_v16 = vld [vmem:[#allocation8 + $0x284] sm:$0xf] }
  0x9a   :  { %v5697_v35 = vld [vmem:[#allocation8 + $0xa00] sm:$0xf]  ;;  %v5442_v36 = vor.u32 %v6739_v34, %v5441_v33  ;;  %3540 = vmatpush.bf16.msrb.mxu3 %v6274_v32  ;;  %v4582_v32 = vor.u32 %v6519_v21, %v4579_v22  ;;  %v6655_v33 = vld [vmem:[#allocation8 + $0x584] sm:$0xf] }
  0x9b   :  { %v6803_v37 = vld [vmem:[#allocation8 + $0xa1c] sm:$0xf0]  ;;  %v5123_v34 = vld [vmem:[#allocation8 + $0x5a0] sm:$0xf0] }
  0x9c   :  { %v5698_v38 = vor.u32 %v6803_v37, %v5697_v35  ;;  %3503 = vmatpush.bf16.msrb.mxu0 %v5442_v36  ;;  %v5985_v39 = vld [vmem:[#allocation8 + $0xc40] sm:$0xf]  ;;  %v6719_v35 = vld [vmem:[#allocation8 + $0x784] sm:$0xf]  ;;  %v4838_v37 = vor.u32 %v6583_v24, %v4835_v25 }
  0x9d   :  { %v6875_v40 = vld [vmem:[#allocation8 + $0xc5c] sm:$0xf0]  ;;  %v6631_v22 = vld [vmem:[#allocation8 + $0x4c4] sm:$0xf] }
  0x9e   :  { %3516 = vmatpush.bf16.msrb.mxu1 %v5698_v38  ;;  %v5986_v41 = vor.u32 %v6875_v40, %v5985_v39  ;;  %v6241_v42 = vld [vmem:[#allocation8 + $0xe40] sm:$0xf]  ;;  %v5379_v38 = vld [vmem:[#allocation8 + $0x7a0] sm:$0xf0] }
  0x9f   :  { %v6939_v43 = vld [vmem:[#allocation8 + $0xe5c] sm:$0xf0]  ;;  %v6511_v39 = vld [vmem:[#allocation8 + $0x104] sm:$0xf] }
  0xa0   :  { %v6242_v44 = vor.u32 %v6939_v43, %v6241_v42  ;;  %3528 = vmatpush.bf16.msrb.mxu2 %v5986_v41  ;;  %v5953_v45 = vld [vmem:[#allocation8 + $0xc00] sm:$0xf]  ;;  %v4547_v40 = vld [vmem:[#allocation8 + $0x120] sm:$0xf0]  ;;  %v139_v41 = vperm.slane %v7238_v51, 5 }
  0xa1   :  { %v6867_v46 = vld [vmem:[#allocation8 + $0xc1c] sm:$0xf0]  ;;  %v6575_v42 = vld [vmem:[#allocation8 + $0x304] sm:$0xf] }
  0xa2   :  { %3541 = vmatpush.bf16.msrb.mxu3 %v6242_v44  ;;  %v5954_v47 = vor.u32 %v6867_v46, %v5953_v45  ;;  %v6209_v48 = vld [vmem:[#allocation8 + $0xe00] sm:$0xf]  ;;  %v243_v54 = vpop.f32.mrf.mxu0  ;;  %v256_v26 = vpop.f32.mrf.mxu1  ;;  %v4803_v43 = vld [vmem:[#allocation8 + $0x320] sm:$0xf0]  ;;  %v5126_v45 = vor.u32 %v6655_v33, %v5123_v34 }
  0xa3   :  { %v6931_v49 = vld [vmem:[#allocation8 + $0xe1c] sm:$0xf0]  ;;  %v244_v55 = vadd.f32 %v243_v54, %v134_v52  ;;  %v257_v58 = vadd.f32 %v256_v26, %v135_v53  ;;  %v5091_v52 = vld [vmem:[#allocation8 + $0x560] sm:$0xf0] }
  0xa4   :  { %v6210_v50 = vor.u32 %v6931_v49, %v6209_v48  ;;  %3529 = vmatpush.bf16.msrb.mxu2 %v5954_v47  ;;  %v5382_v48 = vor.u32 %v6719_v35, %v5379_v38  ;;  %v4550_v49 = vor.u32 %v6511_v39, %v4547_v40  ;;  %v6711_v26 = vld [vmem:[#allocation8 + $0x744] sm:$0xf] }
  0xa5   :  { %v338_v61 = vmax.f32 %v244_v55, 0.0  ;;  %v339_v62 = vmax.f32 %v257_v58, 0.0  ;;  %v4806_v55 = vor.u32 %v6575_v42, %v4803_v43  ;;  %v6695_v24 = vld [vmem:[#allocation8 + $0x6c4] sm:$0xf] }
  0xa6   :  { %3542 = vmatpush.bf16.msrb.mxu3 %v6210_v50  ;;  %v6647_v50 = vld [vmem:[#allocation8 + $0x544] sm:$0xf] }
  0xa7   :  { %v7243_v1 = vpack.c.bf16 %v338_v61, %v338_v61  ;;  %v7246_v6 = vpack.c.bf16 %v339_v62, %v339_v62  ;;  %v4771_v61 = vld [vmem:[#allocation8 + $0x2e0] sm:$0xf0] }
  0xa8   :  { %v4451_v33 = vld [vmem:[#allocation8 + $0x60] sm:$0xf0] }
  0xa9   :  { %3452 = vmatmul.bf16.vlgmr.msra.gmra.mxu0 %v7243_v1  ;;  %3465 = vmatmul.bf16.vlgmr.msra.gmra.mxu1 %v7246_v6  ;;  %v4707_v38 = vld [vmem:[#allocation8 + $0x260] sm:$0xf0] }
  0xaa   :  { %v269_v9 = vpop.f32.mrf.mxu2  ;;  %v282_v11 = vpop.f32.mrf.mxu3  ;;  %3548 = vmatpush.bf16.msra.mxu0 %v4646_v0  ;;  %3561 = vmatpush.bf16.msra.mxu1 %v4902_v3  ;;  %v140_v0 = vperm.slane %v7238_v51, 6  ;;  %v5350_v3 = vor.u32 %v6711_v26, %v5347_v56  ;;  %v5062_v51 = vor.u32 %v6639_v5, %v5059_v7  ;;  %v6623_v43 = vld [vmem:[#allocation8 + $0x484] sm:$0xf] }
  0xab   :  { %v270_v10 = vadd.f32 %v269_v9, %v136_v63  ;;  %v245_v12 = vpop.f32.mrf.mxu0  ;;  %v283_v17 = vadd.f32 %v282_v11, %v137_v2  ;;  %v258_v18 = vpop.f32.mrf.mxu1  ;;  %v5094_v63 = vor.u32 %v6647_v50, %v5091_v52  ;;  %v4518_v9 = vor.u32 %v6503_v57, %v4515_v59  ;;  %v6703_v11 = vld [vmem:[#allocation8 + $0x704] sm:$0xf] }
  0xac   :  { %v5315_v12 = vld [vmem:[#allocation8 + $0x720] sm:$0xf0] }
  0xad   :  { %v340_v23 = vmax.f32 %v270_v10, 0.0  ;;  %v341_v27 = vmax.f32 %v283_v17, 0.0  ;;  %v4774_v10 = vor.u32 %v6567_v60, %v4771_v61  ;;  %v4739_v17 = vld [vmem:[#allocation8 + $0x2a0] sm:$0xf0]  ;;  %v5318_v21 = vor.u32 %v6703_v11, %v5315_v12 }
  0xae   :  { %3549 = vmatpush.bf16.msra.mxu0 %v4614_v13  ;;  %3562 = vmatpush.bf16.msra.mxu1 %v4870_v19  ;;  %v6495_v13 = vld [vmem:[#allocation8 + $0x84] sm:$0xf] }
  0xaf   :  { %v7251_v30 = vpack.c.bf16 %v340_v23, %v340_v23  ;;  %v7253_v36 = vpack.c.bf16 %v341_v27, %v341_v27  ;;  %v5027_v23 = vld [vmem:[#allocation8 + $0x4e0] sm:$0xf0] }
  0xb0   :  { %v5030_v40 = vor.u32 %v6631_v22, %v5027_v23  ;;  %v6479_v50 = vld [vmem:[#allocation8 + $0x4] sm:$0xf] }
  0xb1   :  { %3478 = vmatmul.bf16.vlgmr.msra.gmra.mxu2 %v7251_v30  ;;  %3491 = vmatmul.bf16.vlgmr.msra.gmra.mxu3 %v7253_v36  ;;  %v4419_v52 = vld [vmem:[#allocation8 + $0x20] sm:$0xf0] }
  0xb2   :  { %3574 = vmatpush.bf16.msra.mxu2 %v5158_v28  ;;  %v271_v44 = vpop.f32.mrf.mxu2  ;;  %3587 = vmatpush.bf16.msra.mxu3 %v5414_v31  ;;  %v284_v46 = vpop.f32.mrf.mxu3  ;;  %v4486_v28 = vor.u32 %v6495_v13, %v4483_v15  ;;  %v5283_v31 = vld [vmem:[#allocation8 + $0x6e0] sm:$0xf0] }
  0xb3   :  { %3550 = vmatpush.bf16.msra.mxu0 %v4582_v32  ;;  %v295_v47 = vpop.f32.mrf.mxu0  ;;  %3563 = vmatpush.bf16.msra.mxu1 %v4838_v37  ;;  %v308_v54 = vpop.f32.mrf.mxu1  ;;  %v6487_v32 = vld [vmem:[#allocation8 + $0x44] sm:$0xf]  ;;  %v5286_v42 = vor.u32 %v6695_v24, %v5283_v31 }
  0xb4   :  { %v296_v53 = vadd.f32 %v295_v47, %v138_v29  ;;  %v309_v58 = vadd.f32 %v308_v54, %v139_v41  ;;  %v4742_v29 = vor.u32 %v6559_v16, %v4739_v17  ;;  %v6551_v37 = vld [vmem:[#allocation8 + $0x244] sm:$0xf]  ;;  %v4454_v47 = vor.u32 %v6487_v32, %v4451_v33 }
  0xb5   :  { %v4995_v44 = vld [vmem:[#allocation8 + $0x4a0] sm:$0xf0] }
  0xb6   :  { %v342_v62 = vmax.f32 %v296_v53, 0.0  ;;  %3575 = vmatpush.bf16.msra.mxu2 %v5126_v45  ;;  %v343_v2 = vmax.f32 %v309_v58, 0.0  ;;  %3588 = vmatpush.bf16.msra.mxu3 %v5382_v48  ;;  %v6687_v45 = vld [vmem:[#allocation8 + $0x684] sm:$0xf]  ;;  %v4710_v48 = vor.u32 %v6551_v37, %v4707_v38  ;;  %v4998_v26 = vor.u32 %v6623_v43, %v4995_v44 }
  0xb7   :  { %3551 = vmatpush.bf16.msra.mxu0 %v4550_v49  ;;  %3564 = vmatpush.bf16.msra.mxu1 %v4806_v55  ;;  %v5251_v49 = vld [vmem:[#allocation8 + $0x6a0] sm:$0xf0] }
  0xb8   :  { %v7260_v8 = vpack.c.bf16 %v342_v62, %v342_v62  ;;  %v7262_v14 = vpack.c.bf16 %v343_v2, %v343_v2  ;;  %v6543_v53 = vld [vmem:[#allocation8 + $0x204] sm:$0xf]  ;;  %v5254_v60 = vor.u32 %v6687_v45, %v5251_v49 }
  0xb9   :  { %v4675_v54 = vld [vmem:[#allocation8 + $0x220] sm:$0xf0] }
  0xba   :  { %3576 = vmatpush.bf16.msra.mxu2 %v5094_v63  ;;  %v321_v18 = vpop.f32.mrf.mxu2  ;;  %3504 = vmatmul.bf16.vlgmr.msrb.gmra.mxu0 %v7260_v8  ;;  %v6791_v55 = vld [vmem:[#allocation8 + $0x9c4] sm:$0xf]  ;;  %v4678_v2 = vor.u32 %v6543_v53, %v4675_v54 }
  0xbb   :  { %3589 = vmatpush.bf16.msra.mxu3 %v5350_v3  ;;  %v322_v19 = vadd.f32 %v321_v18, %v140_v0  ;;  %v334_v20 = vpop.f32.mrf.mxu3  ;;  %3517 = vmatmul.bf16.vlgmr.msrb.gmra.mxu1 %v7262_v14  ;;  %v297_v25 = vpop.f32.mrf.mxu0  ;;  %v5667_v57 = vld [vmem:[#allocation8 + $0x9e0] sm:$0xf0]  ;;  %v4422_v0 = vor.u32 %v6479_v50, %v4419_v52 }
  0xbc   :  { %v335_v27 = vadd.f32 %v334_v20, %v141_v4  ;;  %3552 = vmatpush.bf16.msra.mxu0 %v4518_v9  ;;  %3565 = vmatpush.bf16.msra.mxu1 %v4774_v10  ;;  %v310_v34 = vpop.f32.mrf.mxu1  ;;  %v6855_v58 = vld [vmem:[#allocation8 + $0xbc4] sm:$0xf]  ;;  %v5670_v5 = vor.u32 %v6791_v55, %v5667_v57 }
  0xbd   :  { %v344_v35 = vmax.f32 %v322_v19, 0.0  ;;  %v5923_v59 = vld [vmem:[#allocation8 + $0xbe0] sm:$0xf0] }
  0xbe   :  { %v345_v39 = vmax.f32 %v335_v27, 0.0  ;;  %3577 = vmatpush.bf16.msra.mxu2 %v5062_v51  ;;  %v6615_v62 = vld [vmem:[#allocation8 + $0x444] sm:$0xf]  ;;  %v5926_v7 = vor.u32 %v6855_v58, %v5923_v59 }
  0xbf   :  { %v7266_v41 = vpack.c.bf16 %v344_v35, %v344_v35  ;;  %3590 = vmatpush.bf16.msra.mxu3 %v5318_v21  ;;  %v4963_v63 = vld [vmem:[#allocation8 + $0x460] sm:$0xf0] }
  0xc0   :  { %v7268_v46 = vpack.c.bf16 %v345_v39, %v345_v39  ;;  %3553 = vmatpush.bf16.msra.mxu0 %v4486_v28  ;;  %3566 = vmatpush.bf16.msra.mxu1 %v4742_v29  ;;  %v6679_v3 = vld [vmem:[#allocation8 + $0x644] sm:$0xf]  ;;  %v4966_v10 = vor.u32 %v6615_v62, %v4963_v63 }
  0xc1   :  { %3530 = vmatmul.bf16.vlgmr.msrb.gmra.mxu2 %v7266_v41  ;;  %v5219_v4 = vld [vmem:[#allocation8 + $0x660] sm:$0xf0] }
  0xc2   :  { %3543 = vmatmul.bf16.vlgmr.msrb.gmra.mxu3 %v7268_v46  ;;  %3578 = vmatpush.bf16.msra.mxu2 %v5030_v40  ;;  %v323_v56 = vpop.f32.mrf.mxu2  ;;  %v6783_v9 = vld [vmem:[#allocation8 + $0x984] sm:$0xf]  ;;  %v5222_v15 = vor.u32 %v6679_v3, %v5219_v4 }
  0xc3   :  { %3591 = vmatpush.bf16.msra.mxu3 %v5286_v42  ;;  %v336_v61 = vpop.f32.mrf.mxu3  ;;  %v5635_v11 = vld [vmem:[#allocation8 + $0x9a0] sm:$0xf0] }
  0xc4   :  { %3554 = vmatpush.bf16.msra.mxu0 %v4454_v47  ;;  %3567 = vmatpush.bf16.msra.mxu1 %v4710_v48  ;;  %v6847_v12 = vld [vmem:[#allocation8 + $0xb84] sm:$0xf]  ;;  %v5638_v21 = vor.u32 %v6783_v9, %v5635_v11 }
  0xc5   :  { %v5891_v13 = vld [vmem:[#allocation8 + $0xba0] sm:$0xf0] }
  0xc6   :  { %3579 = vmatpush.bf16.msra.mxu2 %v4998_v26  ;;  %v6607_v16 = vld [vmem:[#allocation8 + $0x404] sm:$0xf]  ;;  %v5894_v22 = vor.u32 %v6847_v12, %v5891_v13 }
  0xc7   :  { %3592 = vmatpush.bf16.msra.mxu3 %v5254_v60  ;;  %v4931_v17 = vld [vmem:[#allocation8 + $0x420] sm:$0xf0] }
  0xc8   :  { %v6671_v18 = vld [vmem:[#allocation8 + $0x604] sm:$0xf]  ;;  %3555 = vmatpush.bf16.msra.mxu0 %v4422_v0  ;;  %3568 = vmatpush.bf16.msra.mxu1 %v4678_v2  ;;  %v4934_v27 = vor.u32 %v6607_v16, %v4931_v17 }
  0xc9   :  { %v5187_v51 = vld [vmem:[#allocation8 + $0x620] sm:$0xf0] }
  0xca   :  { %v6919_v19 = vld [vmem:[#allocation8 + $0xdc4] sm:$0xf]  ;;  %3580 = vmatpush.bf16.msra.mxu2 %v4966_v10  ;;  %v5190_v32 = vor.u32 %v6671_v18, %v5187_v51 }
  0xcb   :  { %v6179_v20 = vld [vmem:[#allocation8 + $0xde0] sm:$0xf0]  ;;  %3593 = vmatpush.bf16.msra.mxu3 %v5222_v15  ;;  %3556 = vmatmul.bf16.vlgmr.msra.gmra.mxu0 %v7243_v1 }
  0xcc   :  { %3600 = vmatpush.bf16.msrb.mxu0 %v5670_v5  ;;  %3613 = vmatpush.bf16.msrb.mxu1 %v5926_v7  ;;  %v6983_v23 = vld [vmem:[#allocation8 + $0xfc4] sm:$0xf]  ;;  %v6182_v33 = vor.u32 %v6919_v19, %v6179_v20 }
  0xcd   :  { %v6435_v24 = vld [vmem:[#allocation8 + $0xfe0] sm:$0xf0]  ;;  %3569 = vmatmul.bf16.vlgmr.msra.gmra.mxu1 %v7246_v6 }
  0xce   :  { %v6775_v25 = vld [vmem:[#allocation8 + $0x944] sm:$0xf]  ;;  %v6438_v34 = vor.u32 %v6983_v23, %v6435_v24  ;;  %3581 = vmatpush.bf16.msra.mxu2 %v4934_v27 }
  0xcf   :  { %v5603_v28 = vld [vmem:[#allocation8 + $0x960] sm:$0xf0]  ;;  %3594 = vmatpush.bf16.msra.mxu3 %v5190_v32 }
  0xd0   :  { %v6839_v29 = vld [vmem:[#allocation8 + $0xb44] sm:$0xf]  ;;  %3601 = vmatpush.bf16.msrb.mxu0 %v5638_v21  ;;  %3614 = vmatpush.bf16.msrb.mxu1 %v5894_v22  ;;  %v5606_v38 = vor.u32 %v6775_v25, %v5603_v28 }
  0xd1   :  { %v5859_v31 = vld [vmem:[#allocation8 + $0xb60] sm:$0xf0]  ;;  %3582 = vmatmul.bf16.vlgmr.msra.gmra.mxu2 %v7251_v30 }
  0xd2   :  { %v6911_v35 = vld [vmem:[#allocation8 + $0xd84] sm:$0xf]  ;;  %v5862_v39 = vor.u32 %v6839_v29, %v5859_v31  ;;  %3626 = vmatpush.bf16.msrb.mxu2 %v6182_v33  ;;  %3595 = vmatmul.bf16.vlgmr.msra.gmra.mxu3 %v7253_v36 }
  0xd3   :  { %v6147_v37 = vld [vmem:[#allocation8 + $0xda0] sm:$0xf0]  ;;  %3639 = vmatpush.bf16.msrb.mxu3 %v6438_v34 }
  0xd4   :  { %v6975_v40 = vld [vmem:[#allocation8 + $0xf84] sm:$0xf]  ;;  %v6150_v48 = vor.u32 %v6911_v35, %v6147_v37  ;;  %3602 = vmatpush.bf16.msrb.mxu0 %v5606_v38  ;;  %3615 = vmatpush.bf16.msrb.mxu1 %v5862_v39  ;;  %v4649_v38 = vld [vmem:[#allocation8 + $0x1c8] sm:$0xf] }
  0xd5   :  { %v6403_v42 = vld [vmem:[#allocation8 + $0xfa0] sm:$0xf0] }
  0xd6   :  { %v6767_v43 = vld [vmem:[#allocation8 + $0x904] sm:$0xf]  ;;  %v6406_v49 = vor.u32 %v6975_v40, %v6403_v42  ;;  %3627 = vmatpush.bf16.msrb.mxu2 %v6150_v48  ;;  %v6540_v40 = vld [vmem:[#allocation8 + $0x1e4] sm:$0xf0] }
  0xd7   :  { %v5571_v44 = vld [vmem:[#allocation8 + $0x920] sm:$0xf0]  ;;  %v4905_v42 = vld [vmem:[#allocation8 + $0x3c8] sm:$0xf] }
  0xd8   :  { %v6831_v45 = vld [vmem:[#allocation8 + $0xb04] sm:$0xf]  ;;  %v5574_v53 = vor.u32 %v6767_v43, %v5571_v44  ;;  %3640 = vmatpush.bf16.msrb.mxu3 %v6406_v49  ;;  %v6604_v43 = vld [vmem:[#allocation8 + $0x3e4] sm:$0xf0] }
  0xd9   :  { %v5827_v47 = vld [vmem:[#allocation8 + $0xb20] sm:$0xf0] }
  0xda   :  { %v6903_v50 = vld [vmem:[#allocation8 + $0xd44] sm:$0xf]  ;;  %v5830_v54 = vor.u32 %v6831_v45, %v5827_v47  ;;  %3603 = vmatpush.bf16.msrb.mxu0 %v5574_v53  ;;  %v4650_v53 = vor.u32 %v6540_v40, %v4649_v38  ;;  %v4521_v38 = vld [vmem:[#allocation8 + $0xc8] sm:$0xf] }
  0xdb   :  { %v6115_v52 = vld [vmem:[#allocation8 + $0xd60] sm:$0xf0] }
  0xdc   :  { %v6967_v55 = vld [vmem:[#allocation8 + $0xf44] sm:$0xf]  ;;  %v6118_v60 = vor.u32 %v6903_v50, %v6115_v52  ;;  %3616 = vmatpush.bf16.msrb.mxu1 %v5830_v54  ;;  %v4906_v54 = vor.u32 %v6604_v43, %v4905_v42  ;;  %v4777_v42 = vld [vmem:[#allocation8 + $0x2c8] sm:$0xf] }
  0xdd   :  { %v6371_v26 = vld [vmem:[#allocation8 + $0xf60] sm:$0xf0]  ;;  %v6572_v43 = vld [vmem:[#allocation8 + $0x2e4] sm:$0xf0] }
  0xde   :  { %v6759_v56 = vld [vmem:[#allocation8 + $0x8c4] sm:$0xf]  ;;  %v6374_v61 = vor.u32 %v6967_v55, %v6371_v26  ;;  %3628 = vmatpush.bf16.msrb.mxu2 %v6118_v60  ;;  %v4617_v55 = vld [vmem:[#allocation8 + $0x188] sm:$0xf] }
  0xdf   :  { %v5539_v57 = vld [vmem:[#allocation8 + $0x8e0] sm:$0xf0] }
  0xe0   :  { %v6823_v58 = vld [vmem:[#allocation8 + $0xac4] sm:$0xf]  ;;  %v5542_v0 = vor.u32 %v6759_v56, %v5539_v57  ;;  %3641 = vmatpush.bf16.msrb.mxu3 %v6374_v61  ;;  %v6532_v56 = vld [vmem:[#allocation8 + $0x1a4] sm:$0xf0] }
  0xe1   :  { %v5795_v59 = vld [vmem:[#allocation8 + $0xae0] sm:$0xf0]  ;;  %v4873_v57 = vld [vmem:[#allocation8 + $0x388] sm:$0xf] }
  0xe2   :  { %v6895_v62 = vld [vmem:[#allocation8 + $0xd04] sm:$0xf]  ;;  %v5798_v2 = vor.u32 %v6823_v58, %v5795_v59  ;;  %3604 = vmatpush.bf16.msrb.mxu0 %v5542_v0  ;;  %v6596_v58 = vld [vmem:[#allocation8 + $0x3a4] sm:$0xf0] }
  0xe3   :  { %v6083_v63 = vld [vmem:[#allocation8 + $0xd20] sm:$0xf0]  ;;  %v5161_v0 = vld [vmem:[#allocation8 + $0x5c8] sm:$0xf] }
  0xe4   :  { %v6959_v3 = vld [vmem:[#allocation8 + $0xf04] sm:$0xf]  ;;  %v6086_v11 = vor.u32 %v6895_v62, %v6083_v63  ;;  %3617 = vmatpush.bf16.msrb.mxu1 %v5798_v2  ;;  %v6668_v2 = vld [vmem:[#allocation8 + $0x5e4] sm:$0xf0] }
  0xe5   :  { %v6339_v4 = vld [vmem:[#allocation8 + $0xf20] sm:$0xf0] }
  0xe6   :  { %v6751_v5 = vld [vmem:[#allocation8 + $0x884] sm:$0xf]  ;;  %v6342_v12 = vor.u32 %v6959_v3, %v6339_v4  ;;  %3629 = vmatpush.bf16.msrb.mxu2 %v6086_v11  ;;  %v4618_v3 = vor.u32 %v6532_v56, %v4617_v55  ;;  %v4874_v4 = vor.u32 %v6596_v58, %v4873_v57  ;;  %v6524_v11 = vld [vmem:[#allocation8 + $0x164] sm:$0xf0] }
  0xe7   :  { %v5507_v7 = vld [vmem:[#allocation8 + $0x8a0] sm:$0xf0]  ;;  %v6564_v56 = vld [vmem:[#allocation8 + $0x2a4] sm:$0xf0] }
  0xe8   :  { %v6815_v9 = vld [vmem:[#allocation8 + $0xa84] sm:$0xf]  ;;  %v5510_v16 = vor.u32 %v6751_v5, %v5507_v7  ;;  %3642 = vmatpush.bf16.msrb.mxu3 %v6342_v12  ;;  %v5417_v5 = vld [vmem:[#allocation8 + $0x7c8] sm:$0xf] }
  0xe9   :  { %v5763_v10 = vld [vmem:[#allocation8 + $0xaa0] sm:$0xf0]  ;;  %v6732_v7 = vld [vmem:[#allocation8 + $0x7e4] sm:$0xf0] }
  0xea   :  { %v6887_v13 = vld [vmem:[#allocation8 + $0xcc4] sm:$0xf]  ;;  %v5766_v17 = vor.u32 %v6815_v9, %v5763_v10  ;;  %3605 = vmatpush.bf16.msrb.mxu0 %v5510_v16  ;;  %v4585_v10 = vld [vmem:[#allocation8 + $0x148] sm:$0xf] }
  0xeb   :  { %v6051_v15 = vld [vmem:[#allocation8 + $0xce0] sm:$0xf0]  ;;  %v6588_v16 = vld [vmem:[#allocation8 + $0x364] sm:$0xf0] }
  0xec   :  { %v6951_v18 = vld [vmem:[#allocation8 + $0xec4] sm:$0xf]  ;;  %v6054_v23 = vor.u32 %v6887_v13, %v6051_v15  ;;  %3618 = vmatpush.bf16.msrb.mxu1 %v5766_v17  ;;  %v5162_v13 = vor.u32 %v6668_v2, %v5161_v0  ;;  %v4841_v15 = vld [vmem:[#allocation8 + $0x348] sm:$0xf]  ;;  %v5418_v17 = vor.u32 %v6732_v7, %v5417_v5 }
  0xed   :  { %v6307_v51 = vld [vmem:[#allocation8 + $0xee0] sm:$0xf0]  ;;  %v5033_v58 = vld [vmem:[#allocation8 + $0x4c8] sm:$0xf] }
  0xee   :  { %v6743_v19 = vld [vmem:[#allocation8 + $0x844] sm:$0xf]  ;;  %v6310_v24 = vor.u32 %v6951_v18, %v6307_v51  ;;  %3630 = vmatpush.bf16.msrb.mxu2 %v6054_v23  ;;  %v5129_v18 = vld [vmem:[#allocation8 + $0x588] sm:$0xf] }
  0xef   :  { %v5475_v20 = vld [vmem:[#allocation8 + $0x860] sm:$0xf0]  ;;  %v6660_v51 = vld [vmem:[#allocation8 + $0x5a4] sm:$0xf0] }
  0xf0   :  { %v6807_v21 = vld [vmem:[#allocation8 + $0xa44] sm:$0xf]  ;;  %v5478_v29 = vor.u32 %v6743_v19, %v5475_v20  ;;  %3643 = vmatpush.bf16.msrb.mxu3 %v6310_v24  ;;  %v4586_v19 = vor.u32 %v6524_v11, %v4585_v10  ;;  %v5385_v20 = vld [vmem:[#allocation8 + $0x788] sm:$0xf] }
  0xf1   :  { %v5731_v22 = vld [vmem:[#allocation8 + $0xa60] sm:$0xf0]  ;;  %v4553_v23 = vld [vmem:[#allocation8 + $0x108] sm:$0xf] }
  0xf2   :  { %v6879_v25 = vld [vmem:[#allocation8 + $0xc84] sm:$0xf]  ;;  %v5734_v31 = vor.u32 %v6807_v21, %v5731_v22  ;;  %3606 = vmatpush.bf16.msrb.mxu0 %v5478_v29  ;;  %v6724_v21 = vld [vmem:[#allocation8 + $0x7a4] sm:$0xf0]  ;;  %v4842_v22 = vor.u32 %v6588_v16, %v4841_v15 }
  0xf3   :  { %v6019_v27 = vld [vmem:[#allocation8 + $0xca0] sm:$0xf0]  ;;  %v6516_v24 = vld [vmem:[#allocation8 + $0x124] sm:$0xf0]  ;;  %v5386_v29 = vor.u32 %v6724_v21, %v5385_v20 }
  0xf4   :  { %v6943_v28 = vld [vmem:[#allocation8 + $0xe84] sm:$0xf]  ;;  %v6022_v39 = vor.u32 %v6879_v25, %v6019_v27  ;;  %3619 = vmatpush.bf16.msrb.mxu1 %v5734_v31  ;;  %v5130_v25 = vor.u32 %v6660_v51, %v5129_v18  ;;  %v4809_v27 = vld [vmem:[#allocation8 + $0x308] sm:$0xf] }
  0xf5   :  { %v6275_v32 = vld [vmem:[#allocation8 + $0xea0] sm:$0xf0]  ;;  %v5097_v31 = vld [vmem:[#allocation8 + $0x548] sm:$0xf] }
  0xf6   :  { %v6735_v33 = vld [vmem:[#allocation8 + $0x804] sm:$0xf]  ;;  %v6278_v44 = vor.u32 %v6943_v28, %v6275_v32  ;;  %3631 = vmatpush.bf16.msrb.mxu2 %v6022_v39  ;;  %v6580_v28 = vld [vmem:[#allocation8 + $0x324] sm:$0xf0] }
  0xf7   :  { %v5443_v34 = vld [vmem:[#allocation8 + $0x820] sm:$0xf0]  ;;  %v6652_v32 = vld [vmem:[#allocation8 + $0x564] sm:$0xf0] }
  0xf8   :  { %v6799_v35 = vld [vmem:[#allocation8 + $0xa04] sm:$0xf]  ;;  %v5446_v48 = vor.u32 %v6735_v33, %v5443_v34  ;;  %3644 = vmatpush.bf16.msrb.mxu3 %v6278_v44  ;;  %v4554_v33 = vor.u32 %v6516_v24, %v4553_v23  ;;  %v5353_v34 = vld [vmem:[#allocation8 + $0x748] sm:$0xf]  ;;  %v5098_v40 = vor.u32 %v6652_v32, %v5097_v31 }
  0xf9   :  { %v5699_v37 = vld [vmem:[#allocation8 + $0xa20] sm:$0xf0]  ;;  %v6508_v39 = vld [vmem:[#allocation8 + $0xe4] sm:$0xf0] }
  0xfa   :  { %v6871_v45 = vld [vmem:[#allocation8 + $0xc44] sm:$0xf]  ;;  %v5702_v49 = vor.u32 %v6799_v35, %v5699_v37  ;;  %3607 = vmatpush.bf16.msrb.mxu0 %v5446_v48  ;;  %v6716_v35 = vld [vmem:[#allocation8 + $0x764] sm:$0xf0]  ;;  %v4810_v37 = vor.u32 %v6580_v28, %v4809_v27  ;;  %v4522_v48 = vor.u32 %v6508_v39, %v4521_v38 }
  0xfb   :  { %v5987_v47 = vld [vmem:[#allocation8 + $0xc60] sm:$0xf0]  ;;  %v5354_v44 = vor.u32 %v6716_v35, %v5353_v34  ;;  %v4457_v0 = vld [vmem:[#allocation8 + $0x48] sm:$0xf] }
  0xfc   :  { %v6935_v50 = vld [vmem:[#allocation8 + $0xe44] sm:$0xf]  ;;  %v5990_v26 = vor.u32 %v6871_v45, %v5987_v47  ;;  %3620 = vmatpush.bf16.msrb.mxu1 %v5702_v49  ;;  %v5065_v45 = vld [vmem:[#allocation8 + $0x508] sm:$0xf] }
  0xfd   :  { %v6243_v52 = vld [vmem:[#allocation8 + $0xe60] sm:$0xf0]  ;;  %3608 = vmatmul.bf16.vlgmr.msrb.gmra.mxu0 %v7260_v8  ;;  %v6644_v47 = vld [vmem:[#allocation8 + $0x524] sm:$0xf0] }
  0xfe   :  { %v6246_v59 = vor.u32 %v6935_v50, %v6243_v52  ;;  %v6863_v60 = vld [vmem:[#allocation8 + $0xc04] sm:$0xf]  ;;  %3652 = vmatpush.bf16.msra.mxu0 %v4650_v53  ;;  %3632 = vmatpush.bf16.msrb.mxu2 %v5990_v26  ;;  %v5321_v49 = vld [vmem:[#allocation8 + $0x708] sm:$0xf]  ;;  %v4778_v52 = vor.u32 %v6572_v43, %v4777_v42  ;;  %v5066_v55 = vor.u32 %v6644_v47, %v5065_v45 }
  0xff   :  { %v5955_v61 = vld [vmem:[#allocation8 + $0xc20] sm:$0xf0]  ;;  %3621 = vmatmul.bf16.vlgmr.msrb.gmra.mxu1 %v7262_v14  ;;  %v6708_v50 = vld [vmem:[#allocation8 + $0x724] sm:$0xf0] }
 0x100   :  { %v6927_v62 = vld [vmem:[#allocation8 + $0xe04] sm:$0xf]  ;;  %3665 = vmatpush.bf16.msra.mxu1 %v4906_v54  ;;  %v5958_v9 = vor.u32 %v6863_v60, %v5955_v61  ;;  %3645 = vmatpush.bf16.msrb.mxu3 %v6246_v59  ;;  %v4489_v53 = vld [vmem:[#allocation8 + $0x88] sm:$0xf]  ;;  %v5322_v57 = vor.u32 %v6708_v50, %v5321_v49 }
 0x101   :  { %v6211_v63 = vld [vmem:[#allocation8 + $0xe20] sm:$0xf0]  ;;  %v6500_v54 = vld [vmem:[#allocation8 + $0xa4] sm:$0xf0] }
 0x102   :  { %v6214_v12 = vor.u32 %v6927_v62, %v6211_v63  ;;  %3653 = vmatpush.bf16.msra.mxu0 %v4618_v3  ;;  %3633 = vmatpush.bf16.msrb.mxu2 %v5958_v9  ;;  %v4745_v26 = vld [vmem:[#allocation8 + $0x288] sm:$0xf]  ;;  %v4490_v60 = vor.u32 %v6500_v54, %v4489_v53 }
 0x103   :  { %v6636_v59 = vld [vmem:[#allocation8 + $0x4e4] sm:$0xf0]  ;;  %v4746_v63 = vor.u32 %v6564_v56, %v4745_v26 }
 0x104   :  { %3666 = vmatpush.bf16.msra.mxu1 %v4874_v4  ;;  %3646 = vmatpush.bf16.msrb.mxu3 %v6214_v12  ;;  %v5289_v61 = vld [vmem:[#allocation8 + $0x6c8] sm:$0xf]  ;;  %v5034_v3 = vor.u32 %v6636_v59, %v5033_v58 }
 0x105   :  { %3634 = vmatmul.bf16.vlgmr.msrb.gmra.mxu2 %v7266_v41  ;;  %v6700_v62 = vld [vmem:[#allocation8 + $0x6e4] sm:$0xf0] }
 0x106   :  { %3678 = vmatpush.bf16.msra.mxu2 %v5162_v13  ;;  %3654 = vmatpush.bf16.msra.mxu0 %v4586_v19  ;;  %v6492_v2 = vld [vmem:[#allocation8 + $0x64] sm:$0xf0]  ;;  %v5290_v7 = vor.u32 %v6700_v62, %v5289_v61 }
 0x107   :  { %3647 = vmatmul.bf16.vlgmr.msrb.gmra.mxu3 %v7268_v46  ;;  %v4713_v4 = vld [vmem:[#allocation8 + $0x248] sm:$0xf]  ;;  %v4458_v11 = vor.u32 %v6492_v2, %v4457_v0 }
 0x108   :  { %3691 = vmatpush.bf16.msra.mxu3 %v5418_v17  ;;  %3667 = vmatpush.bf16.msra.mxu1 %v4842_v22  ;;  %v6556_v5 = vld [vmem:[#allocation8 + $0x264] sm:$0xf0] }
 0x109   :  { %v5001_v9 = vld [vmem:[#allocation8 + $0x488] sm:$0xf]  ;;  %v4714_v16 = vor.u32 %v6556_v5, %v4713_v4 }
 0x10a   :  { %3679 = vmatpush.bf16.msra.mxu2 %v5130_v25  ;;  %3655 = vmatpush.bf16.msra.mxu0 %v4554_v33  ;;  %v6628_v10 = vld [vmem:[#allocation8 + $0x4a4] sm:$0xf0] }
 0x10b   :  { %v5257_v12 = vld [vmem:[#allocation8 + $0x688] sm:$0xf]  ;;  %v5002_v19 = vor.u32 %v6628_v10, %v5001_v9 }
 0x10c   :  { %3692 = vmatpush.bf16.msra.mxu3 %v5386_v29  ;;  %3668 = vmatpush.bf16.msra.mxu1 %v4810_v37  ;;  %v6692_v13 = vld [vmem:[#allocation8 + $0x6a4] sm:$0xf0] }
 0x10d   :  { %v4425_v15 = vld [vmem:[#allocation8 + $0x8] sm:$0xf]  ;;  %v5258_v23 = vor.u32 %v6692_v13, %v5257_v12 }
 0x10e   :  { %3680 = vmatpush.bf16.msra.mxu2 %v5098_v40  ;;  %3656 = vmatpush.bf16.msra.mxu0 %v4522_v48  ;;  %v6484_v17 = vld [vmem:[#allocation8 + $0x24] sm:$0xf0] }
 0x10f   :  { %v4681_v18 = vld [vmem:[#allocation8 + $0x208] sm:$0xf]  ;;  %v4426_v28 = vor.u32 %v6484_v17, %v4425_v15 }
 0x110   :  { %3693 = vmatpush.bf16.msra.mxu3 %v5354_v44  ;;  %3669 = vmatpush.bf16.msra.mxu1 %v4778_v52  ;;  %v6548_v51 = vld [vmem:[#allocation8 + $0x224] sm:$0xf0] }
 0x111   :  { %v5673_v20 = vld [vmem:[#allocation8 + $0x9c8] sm:$0xf]  ;;  %v4682_v32 = vor.u32 %v6548_v51, %v4681_v18 }
 0x112   :  { %3681 = vmatpush.bf16.msra.mxu2 %v5066_v55  ;;  %3657 = vmatpush.bf16.msra.mxu0 %v4490_v60  ;;  %v6796_v21 = vld [vmem:[#allocation8 + $0x9e4] sm:$0xf0] }
 0x113   :  { %v5929_v22 = vld [vmem:[#allocation8 + $0xbc8] sm:$0xf]  ;;  %v5674_v33 = vor.u32 %v6796_v21, %v5673_v20 }
 0x114   :  { %3694 = vmatpush.bf16.msra.mxu3 %v5322_v57  ;;  %3670 = vmatpush.bf16.msra.mxu1 %v4746_v63  ;;  %v6860_v24 = vld [vmem:[#allocation8 + $0xbe4] sm:$0xf0] }
 0x115   :  { %v4969_v25 = vld [vmem:[#allocation8 + $0x448] sm:$0xf]  ;;  %v5930_v35 = vor.u32 %v6860_v24, %v5929_v22 }
 0x116   :  { %3682 = vmatpush.bf16.msra.mxu2 %v5034_v3  ;;  %v6620_v27 = vld [vmem:[#allocation8 + $0x464] sm:$0xf0]  ;;  %3658 = vmatpush.bf16.msra.mxu0 %v4458_v11 }
 0x117   :  { %v5225_v29 = vld [vmem:[#allocation8 + $0x648] sm:$0xf]  ;;  %v4970_v37 = vor.u32 %v6620_v27, %v4969_v25 }
 0x118   :  { %3695 = vmatpush.bf16.msra.mxu3 %v5290_v7  ;;  %v6684_v31 = vld [vmem:[#allocation8 + $0x664] sm:$0xf0]  ;;  %3671 = vmatpush.bf16.msra.mxu1 %v4714_v16 }
 0x119   :  { %v5641_v34 = vld [vmem:[#allocation8 + $0x988] sm:$0xf]  ;;  %v5226_v42 = vor.u32 %v6684_v31, %v5225_v29 }
 0x11a   :  { %3683 = vmatpush.bf16.msra.mxu2 %v5002_v19  ;;  %v6788_v38 = vld [vmem:[#allocation8 + $0x9a4] sm:$0xf0]  ;;  %3659 = vmatpush.bf16.msra.mxu0 %v4426_v28 }
 0x11b   :  { %v5897_v39 = vld [vmem:[#allocation8 + $0xb88] sm:$0xf]  ;;  %v5642_v50 = vor.u32 %v6788_v38, %v5641_v34 }
 0x11c   :  { %v6852_v40 = vld [vmem:[#allocation8 + $0xba4] sm:$0xf0]  ;;  %3696 = vmatpush.bf16.msra.mxu3 %v5258_v23  ;;  %3672 = vmatpush.bf16.msra.mxu1 %v4682_v32 }
 0x11d   :  { %v4937_v43 = vld [vmem:[#allocation8 + $0x408] sm:$0xf]  ;;  %v5898_v54 = vor.u32 %v6852_v40, %v5897_v39  ;;  %3660 = vmatmul.bf16.vlgmr.msra.gmra.mxu0 %v7243_v1 }
 0x11e   :  { %v6612_v44 = vld [vmem:[#allocation8 + $0x424] sm:$0xf0]  ;;  %3704 = vmatpush.bf16.msrb.mxu0 %v5674_v33  ;;  %3684 = vmatpush.bf16.msra.mxu2 %v4970_v37 }
 0x11f   :  { %v5193_v45 = vld [vmem:[#allocation8 + $0x608] sm:$0xf]  ;;  %v4938_v55 = vor.u32 %v6612_v44, %v4937_v43  ;;  %3673 = vmatmul.bf16.vlgmr.msra.gmra.mxu1 %v7246_v6 }
 0x120   :  { %v6676_v47 = vld [vmem:[#allocation8 + $0x624] sm:$0xf0]  ;;  %3717 = vmatpush.bf16.msrb.mxu1 %v5930_v35  ;;  %3697 = vmatpush.bf16.msra.mxu3 %v5226_v42 }
 0x121   :  { %v6185_v48 = vld [vmem:[#allocation8 + $0xdc8] sm:$0xf]  ;;  %v5194_v57 = vor.u32 %v6676_v47, %v5193_v45 }
 0x122   :  { %v6924_v49 = vld [vmem:[#allocation8 + $0xde4] sm:$0xf0]  ;;  %3705 = vmatpush.bf16.msrb.mxu0 %v5642_v50  ;;  %3685 = vmatpush.bf16.msra.mxu2 %v4938_v55 }
 0x123   :  { %v6441_v52 = vld [vmem:[#allocation8 + $0xfc8] sm:$0xf]  ;;  %v6186_v58 = vor.u32 %v6924_v49, %v6185_v48 }
 0x124   :  { %v6988_v53 = vld [vmem:[#allocation8 + $0xfe4] sm:$0xf0]  ;;  %3718 = vmatpush.bf16.msrb.mxu1 %v5898_v54  ;;  %3698 = vmatpush.bf16.msra.mxu3 %v5194_v57 }
 0x125   :  { %v5609_v26 = vld [vmem:[#allocation8 + $0x948] sm:$0xf]  ;;  %v6442_v61 = vor.u32 %v6988_v53, %v6441_v52  ;;  %3686 = vmatmul.bf16.vlgmr.msra.gmra.mxu2 %v7251_v30 }
 0x126   :  { %v6780_v56 = vld [vmem:[#allocation8 + $0x964] sm:$0xf0]  ;;  %3730 = vmatpush.bf16.msrb.mxu2 %v6186_v58 }
 0x127   :  { %v5865_v59 = vld [vmem:[#allocation8 + $0xb48] sm:$0xf]  ;;  %v5610_v0 = vor.u32 %v6780_v56, %v5609_v26  ;;  %3699 = vmatmul.bf16.vlgmr.msra.gmra.mxu3 %v7253_v36 }
 0x128   :  { %v6844_v60 = vld [vmem:[#allocation8 + $0xb64] sm:$0xf0]  ;;  %3743 = vmatpush.bf16.msrb.mxu3 %v6442_v61 }
 0x129   :  { %v6153_v62 = vld [vmem:[#allocation8 + $0xd88] sm:$0xf]  ;;  %v5866_v4 = vor.u32 %v6844_v60, %v5865_v59  ;;  %3706 = vmatpush.bf16.msrb.mxu0 %v5610_v0 }
 0x12a   :  { %v6916_v63 = vld [vmem:[#allocation8 + $0xda4] sm:$0xf0] }
 0x12b   :  { %v6409_v2 = vld [vmem:[#allocation8 + $0xf88] sm:$0xf]  ;;  %v6154_v9 = vor.u32 %v6916_v63, %v6153_v62  ;;  %3719 = vmatpush.bf16.msrb.mxu1 %v5866_v4  ;;  %v6600_v4 = vld [vmem:[#allocation8 + $0x3cc] sm:$0xf] }
 0x12c   :  { %v6980_v3 = vld [vmem:[#allocation8 + $0xfa4] sm:$0xf0] }
 0x12d   :  { %v5577_v5 = vld [vmem:[#allocation8 + $0x908] sm:$0xf]  ;;  %v6410_v12 = vor.u32 %v6980_v3, %v6409_v2  ;;  %3731 = vmatpush.bf16.msrb.mxu2 %v6154_v9  ;;  %v6536_v2 = vld [vmem:[#allocation8 + $0x1cc] sm:$0xf] }
 0x12e   :  { %v6772_v7 = vld [vmem:[#allocation8 + $0x924] sm:$0xf0]  ;;  %v4651_v3 = vld [vmem:[#allocation8 + $0x1e8] sm:$0xf0] }
 0x12f   :  { %v5833_v10 = vld [vmem:[#allocation8 + $0xb08] sm:$0xf]  ;;  %v5578_v16 = vor.u32 %v6772_v7, %v5577_v5  ;;  %3744 = vmatpush.bf16.msrb.mxu3 %v6410_v12  ;;  %v4907_v7 = vld [vmem:[#allocation8 + $0x3e8] sm:$0xf0] }
 0x130   :  { %v6836_v11 = vld [vmem:[#allocation8 + $0xb24] sm:$0xf0] }
 0x131   :  { %v6121_v13 = vld [vmem:[#allocation8 + $0xd48] sm:$0xf]  ;;  %v5834_v51 = vor.u32 %v6836_v11, %v5833_v10  ;;  %3707 = vmatpush.bf16.msrb.mxu0 %v5578_v16  ;;  %v4654_v16 = vor.u32 %v6536_v2, %v4651_v3  ;;  %v6712_v3 = vld [vmem:[#allocation8 + $0x74c] sm:$0xf] }
 0x132   :  { %v6908_v15 = vld [vmem:[#allocation8 + $0xd64] sm:$0xf0] }
 0x133   :  { %v6377_v17 = vld [vmem:[#allocation8 + $0xf48] sm:$0xf]  ;;  %v6122_v21 = vor.u32 %v6908_v15, %v6121_v13  ;;  %3720 = vmatpush.bf16.msrb.mxu1 %v5834_v51 }
 0x134   :  { %v6972_v18 = vld [vmem:[#allocation8 + $0xf64] sm:$0xf0] }
 0x135   :  { %v5545_v19 = vld [vmem:[#allocation8 + $0x8c8] sm:$0xf]  ;;  %v6378_v24 = vor.u32 %v6972_v18, %v6377_v17  ;;  %3732 = vmatpush.bf16.msrb.mxu2 %v6122_v21  ;;  %v6528_v17 = vld [vmem:[#allocation8 + $0x18c] sm:$0xf]  ;;  %v4910_v18 = vor.u32 %v6600_v4, %v4907_v7 }
 0x136   :  { %v6764_v20 = vld [vmem:[#allocation8 + $0x8e4] sm:$0xf0]  ;;  %v4875_v21 = vld [vmem:[#allocation8 + $0x3a8] sm:$0xf0] }
 0x137   :  { %v5801_v22 = vld [vmem:[#allocation8 + $0xac8] sm:$0xf]  ;;  %v5546_v28 = vor.u32 %v6764_v20, %v5545_v19  ;;  %3745 = vmatpush.bf16.msrb.mxu3 %v6378_v24  ;;  %v4619_v19 = vld [vmem:[#allocation8 + $0x1a8] sm:$0xf0] }
 0x138   :  { %v6828_v23 = vld [vmem:[#allocation8 + $0xae4] sm:$0xf0]  ;;  %v6592_v20 = vld [vmem:[#allocation8 + $0x38c] sm:$0xf] }
 0x139   :  { %v6089_v25 = vld [vmem:[#allocation8 + $0xd08] sm:$0xf]  ;;  %v5802_v32 = vor.u32 %v6828_v23, %v5801_v22  ;;  %3708 = vmatpush.bf16.msrb.mxu0 %v5546_v28  ;;  %v6664_v28 = vld [vmem:[#allocation8 + $0x5cc] sm:$0xf] }
 0x13a   :  { %v6900_v27 = vld [vmem:[#allocation8 + $0xd24] sm:$0xf0]  ;;  %v5355_v4 = vld [vmem:[#allocation8 + $0x768] sm:$0xf0] }
 0x13b   :  { %v6345_v29 = vld [vmem:[#allocation8 + $0xf08] sm:$0xf]  ;;  %v6090_v35 = vor.u32 %v6900_v27, %v6089_v25  ;;  %3721 = vmatpush.bf16.msrb.mxu1 %v5802_v32  ;;  %v6728_v32 = vld [vmem:[#allocation8 + $0x7cc] sm:$0xf] }
 0x13c   :  { %v6964_v31 = vld [vmem:[#allocation8 + $0xf24] sm:$0xf0]  ;;  %v6504_v7 = vld [vmem:[#allocation8 + $0xcc] sm:$0xf] }
 0x13d   :  { %v5513_v33 = vld [vmem:[#allocation8 + $0x888] sm:$0xf]  ;;  %v6346_v39 = vor.u32 %v6964_v31, %v6345_v29  ;;  %3733 = vmatpush.bf16.msrb.mxu2 %v6090_v35  ;;  %v5163_v29 = vld [vmem:[#allocation8 + $0x5e8] sm:$0xf0]  ;;  %v4622_v31 = vor.u32 %v6528_v17, %v4619_v19 }
 0x13e   :  { %v6756_v34 = vld [vmem:[#allocation8 + $0x8a4] sm:$0xf0]  ;;  %v5067_v17 = vld [vmem:[#allocation8 + $0x528] sm:$0xf0] }
 0x13f   :  { %v5769_v37 = vld [vmem:[#allocation8 + $0xa88] sm:$0xf]  ;;  %v5514_v43 = vor.u32 %v6756_v34, %v5513_v33  ;;  %3746 = vmatpush.bf16.msrb.mxu3 %v6346_v39  ;;  %v5419_v33 = vld [vmem:[#allocation8 + $0x7e8] sm:$0xf0]  ;;  %v4878_v34 = vor.u32 %v6592_v20, %v4875_v21  ;;  %v7284_v39 = vld [vmem:[#allocation10] sm:$0xff] }
 0x140   :  { %v6820_v38 = vld [vmem:[#allocation8 + $0xaa4] sm:$0xf0]  ;;  %v5323_v19 = vld [vmem:[#allocation8 + $0x728] sm:$0xf0] }
 0x141   :  { %v6057_v40 = vld [vmem:[#allocation8 + $0xcc8] sm:$0xf]  ;;  %v5770_v47 = vor.u32 %v6820_v38, %v5769_v37  ;;  %3709 = vmatpush.bf16.msrb.mxu0 %v5514_v43  ;;  %v6520_v37 = vld [vmem:[#allocation8 + $0x14c] sm:$0xf] }
 0x142   :  { %v6892_v42 = vld [vmem:[#allocation8 + $0xce4] sm:$0xf0]  ;;  %v4587_v38 = vld [vmem:[#allocation8 + $0x168] sm:$0xf0] }
 0x143   :  { %v6313_v44 = vld [vmem:[#allocation8 + $0xec8] sm:$0xf]  ;;  %v6058_v50 = vor.u32 %v6892_v42, %v6057_v40  ;;  %3722 = vmatpush.bf16.msrb.mxu1 %v5770_v47  ;;  %v5166_v42 = vor.u32 %v6664_v28, %v5163_v29  ;;  %v6584_v43 = vld [vmem:[#allocation8 + $0x34c] sm:$0xf] }
 0x144   :  { %v6956_v45 = vld [vmem:[#allocation8 + $0xee4] sm:$0xf0]  ;;  %v6656_v47 = vld [vmem:[#allocation8 + $0x58c] sm:$0xf] }
 0x145   :  { %v5481_v48 = vld [vmem:[#allocation8 + $0x848] sm:$0xf]  ;;  %v6314_v54 = vor.u32 %v6956_v45, %v6313_v44  ;;  %3734 = vmatpush.bf16.msrb.mxu2 %v6058_v50  ;;  %v4843_v44 = vld [vmem:[#allocation8 + $0x368] sm:$0xf0]  ;;  %v5422_v45 = vor.u32 %v6728_v32, %v5419_v33  ;;  %v868_v50 = vperm.slane %v7284_v39, 0 }
 0x146   :  { %v6748_v49 = vld [vmem:[#allocation8 + $0x864] sm:$0xf0]  ;;  %v6496_v21 = vld [vmem:[#allocation8 + $0x8c] sm:$0xf] }
 0x147   :  { %v5737_v52 = vld [vmem:[#allocation8 + $0xa48] sm:$0xf]  ;;  %v5482_v56 = vor.u32 %v6748_v49, %v5481_v48  ;;  %3747 = vmatpush.bf16.msrb.mxu3 %v6314_v54  ;;  %v5131_v48 = vld [vmem:[#allocation8 + $0x5a8] sm:$0xf0]  ;;  %v4590_v49 = vor.u32 %v6520_v37, %v4587_v38  ;;  %v4846_v54 = vor.u32 %v6584_v43, %v4843_v44 }
 0x148   :  { %v6812_v53 = vld [vmem:[#allocation8 + $0xa64] sm:$0xf0]  ;;  %v6632_v29 = vld [vmem:[#allocation8 + $0x4cc] sm:$0xf] }
 0x149   :  { %v6025_v55 = vld [vmem:[#allocation8 + $0xc88] sm:$0xf]  ;;  %v5738_v60 = vor.u32 %v6812_v53, %v5737_v52  ;;  %3710 = vmatpush.bf16.msrb.mxu0 %v5482_v56  ;;  %v6720_v52 = vld [vmem:[#allocation8 + $0x78c] sm:$0xf]  ;;  %v5134_v56 = vor.u32 %v6656_v47, %v5131_v48 }
 0x14a   :  { %v6884_v26 = vld [vmem:[#allocation8 + $0xca4] sm:$0xf0]  ;;  %v5387_v53 = vld [vmem:[#allocation8 + $0x7a8] sm:$0xf0] }
 0x14b   :  { %v6281_v57 = vld [vmem:[#allocation8 + $0xe88] sm:$0xf]  ;;  %v6026_v0 = vor.u32 %v6884_v26, %v6025_v55  ;;  %3723 = vmatpush.bf16.msrb.mxu1 %v5738_v60  ;;  %v6512_v55 = vld [vmem:[#allocation8 + $0x10c] sm:$0xf]  ;;  %v5390_v60 = vor.u32 %v6720_v52, %v5387_v53 }
 0x14c   :  { %v6948_v58 = vld [vmem:[#allocation8 + $0xea4] sm:$0xf0]  ;;  %v4555_v26 = vld [vmem:[#allocation8 + $0x128] sm:$0xf0] }
 0x14d   :  { %v5449_v59 = vld [vmem:[#allocation8 + $0x808] sm:$0xf]  ;;  %v6282_v5 = vor.u32 %v6948_v58, %v6281_v57  ;;  %3735 = vmatpush.bf16.msrb.mxu2 %v6026_v0  ;;  %v6576_v57 = vld [vmem:[#allocation8 + $0x30c] sm:$0xf]  ;;  %v3466_v0 = vpop.f32.mrf.mxu1  ;;  %v4558_v2 = vor.u32 %v6512_v55, %v4555_v26  ;;  %v3492_v26 = vpop.f32.mrf.mxu3 }
 0x14e   :  { %v6740_v61 = vld [vmem:[#allocation8 + $0x824] sm:$0xf0]  ;;  %v4811_v58 = vld [vmem:[#allocation8 + $0x328] sm:$0xf0] }
 0x14f   :  { %v5705_v62 = vld [vmem:[#allocation8 + $0xa08] sm:$0xf]  ;;  %v5450_v11 = vor.u32 %v6740_v61, %v5449_v59  ;;  %3748 = vmatpush.bf16.msrb.mxu3 %v6282_v5  ;;  %v3453_v59 = vpop.f32.mrf.mxu0  ;;  %v6648_v61 = vld [vmem:[#allocation8 + $0x54c] sm:$0xf]  ;;  %v4814_v5 = vor.u32 %v6576_v57, %v4811_v58 }
 0x150   :  { %v6804_v63 = vld [vmem:[#allocation8 + $0xa24] sm:$0xf0]  ;;  %v6488_v38 = vld [vmem:[#allocation8 + $0x4c] sm:$0xf] }
 0x151   :  { %v5993_v9 = vld [vmem:[#allocation8 + $0xc48] sm:$0xf]  ;;  %v5706_v15 = vor.u32 %v6804_v63, %v5705_v62  ;;  %3711 = vmatpush.bf16.msrb.mxu0 %v5450_v11  ;;  %v5099_v62 = vld [vmem:[#allocation8 + $0x568] sm:$0xf0]  ;;  %v3454_v63 = vadd.f32 %v3453_v59, %v868_v50 }
 0x152   :  { %v6876_v10 = vld [vmem:[#allocation8 + $0xc64] sm:$0xf0]  ;;  %v5102_v11 = vor.u32 %v6648_v61, %v5099_v62  ;;  %v6552_v43 = vld [vmem:[#allocation8 + $0x24c] sm:$0xf] }
 0x153   :  { %v6249_v12 = vld [vmem:[#allocation8 + $0xe48] sm:$0xf]  ;;  %v5994_v51 = vor.u32 %v6876_v10, %v5993_v9  ;;  %3724 = vmatpush.bf16.msrb.mxu1 %v5706_v15  ;;  %v4523_v9 = vld [vmem:[#allocation8 + $0xe8] sm:$0xf0]  ;;  %v3467_v10 = vadd.f32 %v3466_v0, %v3454_v63  ;;  %v5358_v15 = vor.u32 %v6712_v3, %v5355_v4 }
 0x154   :  { %v6940_v13 = vld [vmem:[#allocation8 + $0xe64] sm:$0xf0]  ;;  %3712 = vmatmul.bf16.vlgmr.msrb.gmra.mxu0 %v7260_v8  ;;  %v4715_v44 = vld [vmem:[#allocation8 + $0x268] sm:$0xf0] }
 0x155   :  { %v6250_v22 = vor.u32 %v6940_v13, %v6249_v12  ;;  %v5961_v23 = vld [vmem:[#allocation8 + $0xc08] sm:$0xf]  ;;  %3756 = vmatpush.bf16.msra.mxu0 %v4654_v16  ;;  %3736 = vmatpush.bf16.msrb.mxu2 %v5994_v51  ;;  %v6568_v12 = vld [vmem:[#allocation8 + $0x2cc] sm:$0xf]  ;;  %v3468_v32 = vpop.f32.mrf.mxu1 }
 0x156   :  { %v6868_v24 = vld [vmem:[#allocation8 + $0xc24] sm:$0xf0]  ;;  %3725 = vmatmul.bf16.vlgmr.msrb.gmra.mxu1 %v7262_v14  ;;  %v4779_v13 = vld [vmem:[#allocation8 + $0x2e8] sm:$0xf0] }
 0x157   :  { %v6217_v25 = vld [vmem:[#allocation8 + $0xe08] sm:$0xf]  ;;  %3769 = vmatpush.bf16.msra.mxu1 %v4910_v18  ;;  %v5962_v35 = vor.u32 %v6868_v24, %v5961_v23  ;;  %3749 = vmatpush.bf16.msrb.mxu3 %v6250_v22  ;;  %v6640_v16 = vld [vmem:[#allocation8 + $0x50c] sm:$0xf]  ;;  %v4526_v18 = vor.u32 %v6504_v7, %v4523_v9  ;;  %v4782_v20 = vor.u32 %v6568_v12, %v4779_v13 }
 0x158   :  { %v6932_v27 = vld [vmem:[#allocation8 + $0xe24] sm:$0xf0]  ;;  %v6704_v51 = vld [vmem:[#allocation8 + $0x70c] sm:$0xf]  ;;  %v5070_v23 = vor.u32 %v6640_v16, %v5067_v17 }
 0x159   :  { %v6218_v40 = vor.u32 %v6932_v27, %v6217_v25  ;;  %3757 = vmatpush.bf16.msra.mxu0 %v4622_v31  ;;  %3737 = vmatpush.bf16.msrb.mxu2 %v5962_v35  ;;  %v4491_v22 = vld [vmem:[#allocation8 + $0xa8] sm:$0xf0]  ;;  %v3455_v27 = vpop.f32.mrf.mxu0  ;;  %v5326_v28 = vor.u32 %v6704_v51, %v5323_v19 }
 0x15a   :  { %v6560_v24 = vld [vmem:[#allocation8 + $0x28c] sm:$0xf]  ;;  %v4494_v33 = vor.u32 %v6496_v21, %v4491_v22 }
 0x15b   :  { %3770 = vmatpush.bf16.msra.mxu1 %v4878_v34  ;;  %3750 = vmatpush.bf16.msrb.mxu3 %v6218_v40  ;;  %v4747_v25 = vld [vmem:[#allocation8 + $0x2a8] sm:$0xf0] }
 0x15c   :  { %3738 = vmatmul.bf16.vlgmr.msrb.gmra.mxu2 %v7266_v41  ;;  %v5035_v31 = vld [vmem:[#allocation8 + $0x4e8] sm:$0xf0]  ;;  %v4750_v37 = vor.u32 %v6560_v24, %v4747_v25 }
 0x15d   :  { %3782 = vmatpush.bf16.msra.mxu2 %v5166_v42  ;;  %3758 = vmatpush.bf16.msra.mxu0 %v4590_v49  ;;  %v6696_v34 = vld [vmem:[#allocation8 + $0x6cc] sm:$0xf]  ;;  %v5038_v42 = vor.u32 %v6632_v29, %v5035_v31  ;;  %v3479_v49 = vpop.f32.mrf.mxu2  ;;  %v3518_v9 = vpop.f32.mrf.mxu1 }
 0x15e   :  { %3751 = vmatmul.bf16.vlgmr.msrb.gmra.mxu3 %v7268_v46  ;;  %v5291_v35 = vld [vmem:[#allocation8 + $0x6e8] sm:$0xf0]  ;;  %v3480_v55 = vadd.f32 %v3479_v49, %v3467_v10 }
 0x15f   :  { %3795 = vmatpush.bf16.msra.mxu3 %v5422_v45  ;;  %3771 = vmatpush.bf16.msra.mxu1 %v4846_v54  ;;  %v4459_v40 = vld [vmem:[#allocation8 + $0x68] sm:$0xf0]  ;;  %v5294_v45 = vor.u32 %v6696_v34, %v5291_v35 }
 0x160   :  { %v6624_v47 = vld [vmem:[#allocation8 + $0x48c] sm:$0xf]  ;;  %v4462_v50 = vor.u32 %v6488_v38, %v4459_v40  ;;  %v3493_v0 = vadd.f32 %v3492_v26, %v3480_v55 }
 0x161   :  { %3783 = vmatpush.bf16.msra.mxu2 %v5134_v56  ;;  %3759 = vmatpush.bf16.msra.mxu0 %v4558_v2  ;;  %v5003_v48 = vld [vmem:[#allocation8 + $0x4a8] sm:$0xf0]  ;;  %v4718_v56 = vor.u32 %v6552_v43, %v4715_v44  ;;  %v3505_v2 = vpop.f32.mrf.mxu0 }
 0x162   :  { %v6688_v52 = vld [vmem:[#allocation8 + $0x68c] sm:$0xf]  ;;  %v3506_v13 = vadd.f32 %v3505_v2, %v3493_v0 }
 0x163   :  { %3796 = vmatpush.bf16.msra.mxu3 %v5390_v60  ;;  %3772 = vmatpush.bf16.msra.mxu1 %v4814_v5  ;;  %v5259_v53 = vld [vmem:[#allocation8 + $0x6a8] sm:$0xf0]  ;;  %v5006_v60 = vor.u32 %v6624_v47, %v5003_v48 }
 0x164   :  { %v6480_v54 = vld [vmem:[#allocation8 + $0xc] sm:$0xf]  ;;  %v5262_v3 = vor.u32 %v6688_v52, %v5259_v53  ;;  %v3519_v22 = vadd.f32 %v3518_v9, %v3506_v13 }
 0x165   :  { %3784 = vmatpush.bf16.msra.mxu2 %v5102_v11  ;;  %3760 = vmatpush.bf16.msra.mxu0 %v4526_v18  ;;  %v4427_v57 = vld [vmem:[#allocation8 + $0x28] sm:$0xf0] }
 0x166   :  { %v6544_v58 = vld [vmem:[#allocation8 + $0x20c] sm:$0xf]  ;;  %v4430_v10 = vor.u32 %v6480_v54, %v4427_v57 }
 0x167   :  { %3797 = vmatpush.bf16.msra.mxu3 %v5358_v15  ;;  %3773 = vmatpush.bf16.msra.mxu1 %v4782_v20  ;;  %v4683_v59 = vld [vmem:[#allocation8 + $0x228] sm:$0xf0] }
 0x168   :  { %v6792_v61 = vld [vmem:[#allocation8 + $0x9cc] sm:$0xf]  ;;  %v4686_v15 = vor.u32 %v6544_v58, %v4683_v59 }
 0x169   :  { %3785 = vmatpush.bf16.msra.mxu2 %v5070_v23  ;;  %3761 = vmatpush.bf16.msra.mxu0 %v4494_v33  ;;  %v5675_v62 = vld [vmem:[#allocation8 + $0x9e8] sm:$0xf0]  ;;  %v3494_v33 = vpop.f32.mrf.mxu3  ;;  %v3507_v44 = vpop.f32.mrf.mxu0 }
 0x16a   :  { %v6856_v63 = vld [vmem:[#allocation8 + $0xbcc] sm:$0xf]  ;;  %v5678_v16 = vor.u32 %v6792_v61, %v5675_v62 }
 0x16b   :  { %3798 = vmatpush.bf16.msra.mxu3 %v5326_v28  ;;  %3774 = vmatpush.bf16.msra.mxu1 %v4750_v37  ;;  %v5931_v4 = vld [vmem:[#allocation8 + $0xbe8] sm:$0xf0]  ;;  %v3481_v28 = vpop.f32.mrf.mxu2 }
 0x16c   :  { %v6616_v5 = vld [vmem:[#allocation8 + $0x44c] sm:$0xf]  ;;  %v5934_v18 = vor.u32 %v6856_v63, %v5931_v4 }
 0x16d   :  { %3786 = vmatpush.bf16.msra.mxu2 %v5038_v42  ;;  %v4971_v7 = vld [vmem:[#allocation8 + $0x468] sm:$0xf0]  ;;  %3762 = vmatpush.bf16.msra.mxu0 %v4462_v50  ;;  %v3520_v50 = vpop.f32.mrf.mxu1 }
 0x16e   :  { %v6680_v11 = vld [vmem:[#allocation8 + $0x64c] sm:$0xf]  ;;  %v4974_v51 = vor.u32 %v6616_v5, %v4971_v7  ;;  %v869_v7 = vperm.slane %v7284_v39, 1 }
 0x16f   :  { %3799 = vmatpush.bf16.msra.mxu3 %v5294_v45  ;;  %v5227_v12 = vld [vmem:[#allocation8 + $0x668] sm:$0xf0]  ;;  %3775 = vmatpush.bf16.msra.mxu1 %v4718_v56 }
 0x170   :  { %v6784_v17 = vld [vmem:[#allocation8 + $0x98c] sm:$0xf]  ;;  %v5230_v23 = vor.u32 %v6680_v11, %v5227_v12 }
 0x171   :  { %3787 = vmatpush.bf16.msra.mxu2 %v5006_v60  ;;  %v5643_v19 = vld [vmem:[#allocation8 + $0x9a8] sm:$0xf0]  ;;  %3763 = vmatpush.bf16.msra.mxu0 %v4430_v10  ;;  %v3544_v5 = vpop.f32.mrf.mxu3 }
 0x172   :  { %v6848_v20 = vld [vmem:[#allocation8 + $0xb8c] sm:$0xf]  ;;  %v5646_v34 = vor.u32 %v6784_v17, %v5643_v19  ;;  %v3557_v19 = vpop.f32.mrf.mxu0 }
 0x173   :  { %v5899_v21 = vld [vmem:[#allocation8 + $0xba8] sm:$0xf0]  ;;  %3800 = vmatpush.bf16.msra.mxu3 %v5262_v3  ;;  %3776 = vmatpush.bf16.msra.mxu1 %v4686_v15  ;;  %v3531_v63 = vpop.f32.mrf.mxu2 }
 0x174   :  { %v6608_v24 = vld [vmem:[#allocation8 + $0x40c] sm:$0xf]  ;;  %v5902_v38 = vor.u32 %v6848_v20, %v5899_v21  ;;  %3764 = vmatmul.bf16.vlgmr.msra.gmra.mxu0 %v7243_v1  ;;  %v3532_v4 = vadd.f32 %v3531_v63, %v3519_v22 }
 0x175   :  { %v4939_v25 = vld [vmem:[#allocation8 + $0x428] sm:$0xf0]  ;;  %3808 = vmatpush.bf16.msrb.mxu0 %v5678_v16  ;;  %3788 = vmatpush.bf16.msra.mxu2 %v4974_v51 }
 0x176   :  { %v6672_v27 = vld [vmem:[#allocation8 + $0x60c] sm:$0xf]  ;;  %v4942_v40 = vor.u32 %v6608_v24, %v4939_v25  ;;  %3777 = vmatmul.bf16.vlgmr.msra.gmra.mxu1 %v7246_v6  ;;  %v7296_v16 = vadd.f32 %v3544_v5, %v3532_v4  ;;  %v3570_v24 = vpop.f32.mrf.mxu1 }
 0x177   :  { %v5195_v29 = vld [vmem:[#allocation8 + $0x628] sm:$0xf0]  ;;  %3821 = vmatpush.bf16.msrb.mxu1 %v5934_v18  ;;  %3801 = vmatpush.bf16.msra.mxu3 %v5230_v23  ;;  %v3558_v23 = vadd.f32 %v3557_v19, %v869_v7  ;;  %v4657_v7 = vld [vmem:[#allocation8 + $0x1d0] sm:$0xf] }
 0x178   :  { %v6920_v31 = vld [vmem:[#allocation8 + $0xdcc] sm:$0xf]  ;;  %v5198_v45 = vor.u32 %v6672_v27, %v5195_v29 }
 0x179   :  { %v6187_v32 = vld [vmem:[#allocation8 + $0xde8] sm:$0xf0]  ;;  %3809 = vmatpush.bf16.msrb.mxu0 %v5646_v34  ;;  %3789 = vmatpush.bf16.msra.mxu2 %v4942_v40  ;;  %v3571_v33 = vadd.f32 %v3570_v24, %v3558_v23  ;;  %v3546_v44 = vpop.f32.mrf.mxu3  ;;  %v4625_v24 = vld [vmem:[#allocation8 + $0x190] sm:$0xf] }
 0x17a   :  { %v6984_v35 = vld [vmem:[#allocation8 + $0xfcc] sm:$0xf]  ;;  %v6190_v47 = vor.u32 %v6920_v31, %v6187_v32  ;;  %v5425_v44 = vld [vmem:[#allocation8 + $0x7d0] sm:$0xf] }
 0x17b   :  { %v6443_v37 = vld [vmem:[#allocation8 + $0xfe8] sm:$0xf0]  ;;  %3822 = vmatpush.bf16.msrb.mxu1 %v5902_v38  ;;  %3802 = vmatpush.bf16.msra.mxu3 %v5198_v45  ;;  %v3533_v38 = vpop.f32.mrf.mxu2 }
 0x17c   :  { %v6776_v42 = vld [vmem:[#allocation8 + $0x94c] sm:$0xf]  ;;  %v6446_v52 = vor.u32 %v6984_v35, %v6443_v37  ;;  %3790 = vmatmul.bf16.vlgmr.msra.gmra.mxu2 %v7251_v30 }
 0x17d   :  { %v5611_v43 = vld [vmem:[#allocation8 + $0x968] sm:$0xf0]  ;;  %3834 = vmatpush.bf16.msrb.mxu2 %v6190_v47 }
 0x17e   :  { %v6840_v48 = vld [vmem:[#allocation8 + $0xb4c] sm:$0xf]  ;;  %v5614_v55 = vor.u32 %v6776_v42, %v5611_v43  ;;  %3803 = vmatmul.bf16.vlgmr.msra.gmra.mxu3 %v7253_v36 }
 0x17f   :  { %v5867_v49 = vld [vmem:[#allocation8 + $0xb68] sm:$0xf0]  ;;  %3847 = vmatpush.bf16.msrb.mxu3 %v6446_v52 }
 0x180   :  { %v6912_v53 = vld [vmem:[#allocation8 + $0xd8c] sm:$0xf]  ;;  %v5870_v57 = vor.u32 %v6840_v48, %v5867_v49  ;;  %3810 = vmatpush.bf16.msrb.mxu0 %v5614_v55 }
 0x181   :  { %v6155_v54 = vld [vmem:[#allocation8 + $0xda8] sm:$0xf0] }
 0x182   :  { %v6976_v26 = vld [vmem:[#allocation8 + $0xf8c] sm:$0xf]  ;;  %v6158_v60 = vor.u32 %v6912_v53, %v6155_v54  ;;  %3823 = vmatpush.bf16.msrb.mxu1 %v5870_v57 }
 0x183   :  { %v6411_v56 = vld [vmem:[#allocation8 + $0xfa8] sm:$0xf0] }
 0x184   :  { %v6768_v58 = vld [vmem:[#allocation8 + $0x90c] sm:$0xf]  ;;  %v6414_v0 = vor.u32 %v6976_v26, %v6411_v56  ;;  %3835 = vmatpush.bf16.msrb.mxu2 %v6158_v60  ;;  %v3559_v26 = vpop.f32.mrf.mxu0 }
 0x185   :  { %v5579_v59 = vld [vmem:[#allocation8 + $0x928] sm:$0xf0] }
 0x186   :  { %v6832_v61 = vld [vmem:[#allocation8 + $0xb0c] sm:$0xf]  ;;  %v5582_v9 = vor.u32 %v6768_v58, %v5579_v59  ;;  %3848 = vmatpush.bf16.msrb.mxu3 %v6414_v0  ;;  %v3572_v59 = vpop.f32.mrf.mxu1 }
 0x187   :  { %v5835_v62 = vld [vmem:[#allocation8 + $0xb28] sm:$0xf0]  ;;  %v6661_v59 = vld [vmem:[#allocation8 + $0x5ac] sm:$0xf0] }
 0x188   :  { %v6904_v2 = vld [vmem:[#allocation8 + $0xd4c] sm:$0xf]  ;;  %v5838_v12 = vor.u32 %v6832_v61, %v5835_v62  ;;  %3811 = vmatpush.bf16.msrb.mxu0 %v5582_v9  ;;  %v6541_v9 = vld [vmem:[#allocation8 + $0x1ec] sm:$0xf0] }
 0x189   :  { %v6123_v3 = vld [vmem:[#allocation8 + $0xd68] sm:$0xf0]  ;;  %v4658_v23 = vor.u32 %v6541_v9, %v4657_v7  ;;  %v5105_v9 = vld [vmem:[#allocation8 + $0x550] sm:$0xf] }
 0x18a   :  { %v6968_v10 = vld [vmem:[#allocation8 + $0xf4c] sm:$0xf]  ;;  %v6126_v17 = vor.u32 %v6904_v2, %v6123_v3  ;;  %3824 = vmatpush.bf16.msrb.mxu1 %v5838_v12  ;;  %v6605_v12 = vld [vmem:[#allocation8 + $0x3ec] sm:$0xf0] }
 0x18b   :  { %v6379_v11 = vld [vmem:[#allocation8 + $0xf68] sm:$0xf0] }
 0x18c   :  { %v6760_v13 = vld [vmem:[#allocation8 + $0x8cc] sm:$0xf]  ;;  %v6382_v20 = vor.u32 %v6968_v10, %v6379_v11  ;;  %3836 = vmatpush.bf16.msrb.mxu2 %v6126_v17  ;;  %v4913_v10 = vld [vmem:[#allocation8 + $0x3d0] sm:$0xf]  ;;  %v3583_v17 = vpop.f32.mrf.mxu2 }
 0x18d   :  { %v5547_v15 = vld [vmem:[#allocation8 + $0x8e8] sm:$0xf0] }
 0x18e   :  { %v6824_v18 = vld [vmem:[#allocation8 + $0xacc] sm:$0xf]  ;;  %v5550_v25 = vor.u32 %v6760_v13, %v5547_v15  ;;  %3849 = vmatpush.bf16.msrb.mxu3 %v6382_v20 }
 0x18f   :  { %v5803_v51 = vld [vmem:[#allocation8 + $0xae8] sm:$0xf0] }
 0x190   :  { %v6896_v21 = vld [vmem:[#allocation8 + $0xd0c] sm:$0xf]  ;;  %v5806_v29 = vor.u32 %v6824_v18, %v5803_v51  ;;  %3812 = vmatpush.bf16.msrb.mxu0 %v5550_v25  ;;  %v3596_v18 = vpop.f32.mrf.mxu3  ;;  %v4914_v25 = vor.u32 %v6605_v12, %v4913_v10  ;;  %v6653_v10 = vld [vmem:[#allocation8 + $0x56c] sm:$0xf0] }
 0x191   :  { %v6091_v22 = vld [vmem:[#allocation8 + $0xd28] sm:$0xf0]  ;;  %v5361_v12 = vld [vmem:[#allocation8 + $0x750] sm:$0xf] }
 0x192   :  { %v6960_v27 = vld [vmem:[#allocation8 + $0xf0c] sm:$0xf]  ;;  %v6094_v34 = vor.u32 %v6896_v21, %v6091_v22  ;;  %3825 = vmatpush.bf16.msrb.mxu1 %v5806_v29  ;;  %v3584_v21 = vadd.f32 %v3583_v17, %v3571_v33  ;;  %v4881_v29 = vld [vmem:[#allocation8 + $0x390] sm:$0xf] }
 0x193   :  { %v6347_v28 = vld [vmem:[#allocation8 + $0xf28] sm:$0xf0]  ;;  %v5169_v33 = vld [vmem:[#allocation8 + $0x5d0] sm:$0xf] }
 0x194   :  { %v6752_v31 = vld [vmem:[#allocation8 + $0x88c] sm:$0xf]  ;;  %v6350_v40 = vor.u32 %v6960_v27, %v6347_v28  ;;  %3837 = vmatpush.bf16.msrb.mxu2 %v6094_v34  ;;  %v6533_v28 = vld [vmem:[#allocation8 + $0x1ac] sm:$0xf0]  ;;  %v3585_v26 = vpop.f32.mrf.mxu2 }
 0x195   :  { %v5515_v32 = vld [vmem:[#allocation8 + $0x8a8] sm:$0xf0]  ;;  %v4529_v17 = vld [vmem:[#allocation8 + $0xd0] sm:$0xf] }
 0x196   :  { %v6816_v35 = vld [vmem:[#allocation8 + $0xa8c] sm:$0xf]  ;;  %v5518_v45 = vor.u32 %v6752_v31, %v5515_v32  ;;  %3850 = vmatpush.bf16.msrb.mxu3 %v6350_v40  ;;  %v6597_v31 = vld [vmem:[#allocation8 + $0x3ac] sm:$0xf0]  ;;  %v7298_v32 = vadd.f32 %v3596_v18, %v3584_v21 }
 0x197   :  { %v5771_v37 = vld [vmem:[#allocation8 + $0xaa8] sm:$0xf0]  ;;  %v6509_v18 = vld [vmem:[#allocation8 + $0xec] sm:$0xf0] }
 0x198   :  { %v6888_v42 = vld [vmem:[#allocation8 + $0xccc] sm:$0xf]  ;;  %v5774_v49 = vor.u32 %v6816_v35, %v5771_v37  ;;  %3813 = vmatpush.bf16.msrb.mxu0 %v5518_v45  ;;  %v6733_v45 = vld [vmem:[#allocation8 + $0x7ec] sm:$0xf0] }
 0x199   :  { %v6059_v43 = vld [vmem:[#allocation8 + $0xce8] sm:$0xf0] }
 0x19a   :  { %v6952_v47 = vld [vmem:[#allocation8 + $0xecc] sm:$0xf]  ;;  %v6062_v53 = vor.u32 %v6888_v42, %v6059_v43  ;;  %3826 = vmatpush.bf16.msrb.mxu1 %v5774_v49  ;;  %v6669_v42 = vld [vmem:[#allocation8 + $0x5ec] sm:$0xf0]  ;;  %v4626_v43 = vor.u32 %v6533_v28, %v4625_v24  ;;  %v3622_v28 = vpop.f32.mrf.mxu1 }
 0x19b   :  { %v6315_v48 = vld [vmem:[#allocation8 + $0xee8] sm:$0xf0]  ;;  %v4593_v49 = vld [vmem:[#allocation8 + $0x150] sm:$0xf] }
 0x19c   :  { %v6744_v50 = vld [vmem:[#allocation8 + $0x84c] sm:$0xf]  ;;  %v6318_v56 = vor.u32 %v6952_v47, %v6315_v48  ;;  %3838 = vmatpush.bf16.msrb.mxu2 %v6062_v53  ;;  %v4882_v47 = vor.u32 %v6597_v31, %v4881_v29  ;;  %v5170_v53 = vor.u32 %v6669_v42, %v5169_v33  ;;  %v5073_v24 = vld [vmem:[#allocation8 + $0x510] sm:$0xf]  ;;  %v4530_v29 = vor.u32 %v6509_v18, %v4529_v17  ;;  %v3635_v17 = vpop.f32.mrf.mxu2 }
 0x19d   :  { %v5483_v52 = vld [vmem:[#allocation8 + $0x868] sm:$0xf0]  ;;  %v5329_v31 = vld [vmem:[#allocation8 + $0x710] sm:$0xf] }
 0x19e   :  { %v6808_v54 = vld [vmem:[#allocation8 + $0xa4c] sm:$0xf]  ;;  %v5486_v60 = vor.u32 %v6744_v50, %v5483_v52  ;;  %3851 = vmatpush.bf16.msrb.mxu3 %v6318_v56  ;;  %v6525_v50 = vld [vmem:[#allocation8 + $0x16c] sm:$0xf0]  ;;  %v3598_v56 = vpop.f32.mrf.mxu3 }
 0x19f   :  { %v5739_v55 = vld [vmem:[#allocation8 + $0xa68] sm:$0xf0]  ;;  %v4721_v56 = vld [vmem:[#allocation8 + $0x250] sm:$0xf] }
 0x1a0   :  { %v6880_v57 = vld [vmem:[#allocation8 + $0xc8c] sm:$0xf]  ;;  %v5742_v0 = vor.u32 %v6808_v54, %v5739_v55  ;;  %3814 = vmatpush.bf16.msrb.mxu0 %v5486_v60  ;;  %v4849_v54 = vld [vmem:[#allocation8 + $0x350] sm:$0xf]  ;;  %v4594_v60 = vor.u32 %v6525_v50, %v4593_v49 }
 0x1a1   :  { %v6027_v58 = vld [vmem:[#allocation8 + $0xca8] sm:$0xf0]  ;;  %v6589_v55 = vld [vmem:[#allocation8 + $0x36c] sm:$0xf0] }
 0x1a2   :  { %v6944_v61 = vld [vmem:[#allocation8 + $0xe8c] sm:$0xf]  ;;  %v6030_v5 = vor.u32 %v6880_v57, %v6027_v58  ;;  %3827 = vmatpush.bf16.msrb.mxu1 %v5742_v0  ;;  %v5426_v57 = vor.u32 %v6733_v45, %v5425_v44  ;;  %v5137_v58 = vld [vmem:[#allocation8 + $0x590] sm:$0xf] }
 0x1a3   :  { %v6283_v62 = vld [vmem:[#allocation8 + $0xea8] sm:$0xf0]  ;;  %v4561_v0 = vld [vmem:[#allocation8 + $0x110] sm:$0xf] }
 0x1a4   :  { %v6736_v63 = vld [vmem:[#allocation8 + $0x80c] sm:$0xf]  ;;  %v6286_v11 = vor.u32 %v6944_v61, %v6283_v62  ;;  %3839 = vmatpush.bf16.msrb.mxu2 %v6030_v5  ;;  %v5393_v61 = vld [vmem:[#allocation8 + $0x790] sm:$0xf] }
 0x1a5   :  { %v5451_v2 = vld [vmem:[#allocation8 + $0x828] sm:$0xf0]  ;;  %v6725_v62 = vld [vmem:[#allocation8 + $0x7ac] sm:$0xf0] }
 0x1a6   :  { %v6800_v3 = vld [vmem:[#allocation8 + $0xa0c] sm:$0xf]  ;;  %v5454_v51 = vor.u32 %v6736_v63, %v5451_v2  ;;  %3852 = vmatpush.bf16.msrb.mxu3 %v6286_v11  ;;  %v4850_v63 = vor.u32 %v6589_v55, %v4849_v54  ;;  %v6517_v2 = vld [vmem:[#allocation8 + $0x12c] sm:$0xf0]  ;;  %v5394_v7 = vor.u32 %v6725_v62, %v5393_v61 }
 0x1a7   :  { %v5707_v4 = vld [vmem:[#allocation8 + $0xa28] sm:$0xf0]  ;;  %v6581_v5 = vld [vmem:[#allocation8 + $0x32c] sm:$0xf0]  ;;  %v4562_v11 = vor.u32 %v6517_v2, %v4561_v0 }
 0x1a8   :  { %v6872_v13 = vld [vmem:[#allocation8 + $0xc4c] sm:$0xf]  ;;  %v5710_v22 = vor.u32 %v6800_v3, %v5707_v4  ;;  %3815 = vmatpush.bf16.msrb.mxu0 %v5454_v51  ;;  %v5138_v3 = vor.u32 %v6661_v59, %v5137_v58  ;;  %v4817_v4 = vld [vmem:[#allocation8 + $0x310] sm:$0xf]  ;;  %v5106_v51 = vor.u32 %v6653_v10, %v5105_v9 }
 0x1a9   :  { %v5995_v15 = vld [vmem:[#allocation8 + $0xc68] sm:$0xf0]  ;;  %v6565_v44 = vld [vmem:[#allocation8 + $0x2ac] sm:$0xf0] }
 0x1aa   :  { %v6936_v19 = vld [vmem:[#allocation8 + $0xe4c] sm:$0xf]  ;;  %v5998_v27 = vor.u32 %v6872_v13, %v5995_v15  ;;  %3828 = vmatpush.bf16.msrb.mxu1 %v5710_v22  ;;  %v6717_v13 = vld [vmem:[#allocation8 + $0x76c] sm:$0xf0]  ;;  %v4818_v15 = vor.u32 %v6581_v5, %v4817_v4  ;;  %v3609_v22 = vpop.f32.mrf.mxu0 }
 0x1ab   :  { %v6251_v20 = vld [vmem:[#allocation8 + $0xe68] sm:$0xf0]  ;;  %3816 = vmatmul.bf16.vlgmr.msrb.gmra.mxu0 %v7260_v8  ;;  %v5297_v49 = vld [vmem:[#allocation8 + $0x6d0] sm:$0xf] }
 0x1ac   :  { %v6254_v34 = vor.u32 %v6936_v19, %v6251_v20  ;;  %v6864_v35 = vld [vmem:[#allocation8 + $0xc0c] sm:$0xf]  ;;  %3860 = vmatpush.bf16.msra.mxu0 %v4658_v23  ;;  %3840 = vmatpush.bf16.msrb.mxu2 %v5998_v27  ;;  %v4785_v19 = vld [vmem:[#allocation8 + $0x2d0] sm:$0xf]  ;;  %v5362_v23 = vor.u32 %v6717_v13, %v5361_v12  ;;  %v3610_v27 = vadd.f32 %v3609_v22, %v7298_v32 }
 0x1ad   :  { %v5963_v37 = vld [vmem:[#allocation8 + $0xc28] sm:$0xf0]  ;;  %3829 = vmatmul.bf16.vlgmr.msrb.gmra.mxu1 %v7262_v14  ;;  %v6573_v20 = vld [vmem:[#allocation8 + $0x2ec] sm:$0xf0] }
 0x1ae   :  { %v6928_v38 = vld [vmem:[#allocation8 + $0xe0c] sm:$0xf]  ;;  %3873 = vmatpush.bf16.msra.mxu1 %v4914_v25  ;;  %v5966_v48 = vor.u32 %v6864_v35, %v5963_v37  ;;  %3853 = vmatpush.bf16.msrb.mxu3 %v6254_v34  ;;  %v6645_v25 = vld [vmem:[#allocation8 + $0x52c] sm:$0xf0]  ;;  %v4786_v35 = vor.u32 %v6573_v20, %v4785_v19  ;;  %v3623_v33 = vadd.f32 %v3622_v28, %v3610_v27  ;;  %v4276_v28 = vmax.f32 %v7296_v16, 0.0 }
 0x1af   :  { %v6219_v40 = vld [vmem:[#allocation8 + $0xe28] sm:$0xf0]  ;;  %v6709_v34 = vld [vmem:[#allocation8 + $0x72c] sm:$0xf0]  ;;  %v5074_v42 = vor.u32 %v6645_v25, %v5073_v24 }
 0x1b0   :  { %v6222_v52 = vor.u32 %v6928_v38, %v6219_v40  ;;  %3861 = vmatpush.bf16.msra.mxu0 %v4626_v43  ;;  %3841 = vmatpush.bf16.msrb.mxu2 %v5966_v48  ;;  %v4284_v21 = vld [vmem:[#allocation11] sm:$0xff]  ;;  %v4497_v37 = vld [vmem:[#allocation8 + $0x90] sm:$0xf]  ;;  %v5330_v45 = vor.u32 %v6709_v34, %v5329_v31  ;;  %v3636_v22 = vadd.f32 %v3635_v17, %v3623_v33 }
 0x1b1   :  { %v6501_v38 = vld [vmem:[#allocation8 + $0xac] sm:$0xf0]  ;;  %v7305_v40 = vunpack.c.l.bf16 %v4284_v21 }
 0x1b2   :  { %3874 = vmatpush.bf16.msra.mxu1 %v4882_v47  ;;  %3854 = vmatpush.bf16.msrb.mxu3 %v6222_v52  ;;  %v4753_v43 = vld [vmem:[#allocation8 + $0x290] sm:$0xf]  ;;  %v4498_v48 = vor.u32 %v6501_v38, %v4497_v37  ;;  %v3611_v58 = vpop.f32.mrf.mxu0 }
 0x1b3   :  { %3842 = vmatmul.bf16.vlgmr.msrb.gmra.mxu2 %v7266_v41  ;;  %v5041_v47 = vld [vmem:[#allocation8 + $0x4d0] sm:$0xf]  ;;  %v4754_v52 = vor.u32 %v6565_v44, %v4753_v43  ;;  %v4289_v55 = vperm.slane %v7305_v40, 0  ;;  %v4290_v5 = vperm.slane %v7305_v40, 2 }
 0x1b4   :  { %3886 = vmatpush.bf16.msra.mxu2 %v5170_v53  ;;  %3862 = vmatpush.bf16.msra.mxu0 %v4594_v60  ;;  %v6637_v32 = vld [vmem:[#allocation8 + $0x4ec] sm:$0xf0] }
 0x1b5   :  { %3855 = vmatmul.bf16.vlgmr.msrb.gmra.mxu3 %v7268_v46  ;;  %v6701_v50 = vld [vmem:[#allocation8 + $0x6ec] sm:$0xf0]  ;;  %v5042_v26 = vor.u32 %v6637_v32, %v5041_v47  ;;  %v4305_v21 = vperm.slane %v4289_v55, 0 }
 0x1b6   :  { %3899 = vmatpush.bf16.msra.mxu3 %v5426_v57  ;;  %3875 = vmatpush.bf16.msra.mxu1 %v4850_v63  ;;  %v4465_v53 = vld [vmem:[#allocation8 + $0x50] sm:$0xf]  ;;  %v5298_v59 = vor.u32 %v6701_v50, %v5297_v49  ;;  %v3624_v63 = vpop.f32.mrf.mxu1 }
 0x1b7   :  { %v6493_v54 = vld [vmem:[#allocation8 + $0x6c] sm:$0xf0] }
 0x1b8   :  { %3887 = vmatpush.bf16.msra.mxu2 %v5138_v3  ;;  %3863 = vmatpush.bf16.msra.mxu0 %v4562_v11  ;;  %v6557_v57 = vld [vmem:[#allocation8 + $0x26c] sm:$0xf0]  ;;  %v4466_v0 = vor.u32 %v6493_v54, %v4465_v53  ;;  %v4313_v53 = vmul.f32 %v4305_v21, %v4276_v28 }
 0x1b9   :  { %v5009_v60 = vld [vmem:[#allocation8 + $0x490] sm:$0xf] }
 0x1ba   :  { %3900 = vmatpush.bf16.msra.mxu3 %v5394_v7  ;;  %3876 = vmatpush.bf16.msra.mxu1 %v4818_v15  ;;  %v6629_v61 = vld [vmem:[#allocation8 + $0x4ac] sm:$0xf0]  ;;  %v4722_v7 = vor.u32 %v6557_v57, %v4721_v56 }
 0x1bb   :  { %v5265_v62 = vld [vmem:[#allocation8 + $0x690] sm:$0xf]  ;;  %v5010_v11 = vor.u32 %v6629_v61, %v5009_v60  ;;  %v3637_v61 = vpop.f32.mrf.mxu2 }
 0x1bc   :  { %3888 = vmatpush.bf16.msra.mxu2 %v5106_v51  ;;  %3864 = vmatpush.bf16.msra.mxu0 %v4530_v29  ;;  %v6693_v2 = vld [vmem:[#allocation8 + $0x6ac] sm:$0xf0]  ;;  %v4306_v29 = vperm.slane %v4290_v5, 0 }
 0x1bd   :  { %v4433_v3 = vld [vmem:[#allocation8 + $0x10] sm:$0xf]  ;;  %v5266_v18 = vor.u32 %v6693_v2, %v5265_v62 }
 0x1be   :  { %3901 = vmatpush.bf16.msra.mxu3 %v5362_v23  ;;  %3877 = vmatpush.bf16.msra.mxu1 %v4786_v35  ;;  %v6485_v4 = vld [vmem:[#allocation8 + $0x2c] sm:$0xf0]  ;;  %v3648_v23 = vpop.f32.mrf.mxu3 }
 0x1bf   :  { %v4689_v9 = vld [vmem:[#allocation8 + $0x210] sm:$0xf]  ;;  %v4434_v24 = vor.u32 %v6485_v4, %v4433_v3  ;;  %v3649_v38 = vadd.f32 %v3648_v23, %v3636_v22  ;;  %v870_v23 = vperm.slane %v7284_v39, 2  ;;  %v3674_v39 = vpop.f32.mrf.mxu1 }
 0x1c0   :  { %3889 = vmatpush.bf16.msra.mxu2 %v5074_v42  ;;  %3865 = vmatpush.bf16.msra.mxu0 %v4498_v48  ;;  %v6549_v10 = vld [vmem:[#allocation8 + $0x22c] sm:$0xf0] }
 0x1c1   :  { %v5681_v12 = vld [vmem:[#allocation8 + $0x9d0] sm:$0xf]  ;;  %v4690_v31 = vor.u32 %v6549_v10, %v4689_v9  ;;  %v4277_v50 = vmax.f32 %v3649_v38, 0.0  ;;  %v3661_v38 = vpop.f32.mrf.mxu0 }
 0x1c2   :  { %3902 = vmatpush.bf16.msra.mxu3 %v5330_v45  ;;  %3878 = vmatpush.bf16.msra.mxu1 %v4754_v52  ;;  %v6797_v13 = vld [vmem:[#allocation8 + $0x9ec] sm:$0xf0] }
 0x1c3   :  { %v5937_v15 = vld [vmem:[#allocation8 + $0xbd0] sm:$0xf]  ;;  %v5682_v34 = vor.u32 %v6797_v13, %v5681_v12  ;;  %v4314_v56 = vmul.f32 %v4306_v29, %v4277_v50 }
 0x1c4   :  { %3890 = vmatpush.bf16.msra.mxu2 %v5042_v26  ;;  %v6861_v51 = vld [vmem:[#allocation8 + $0xbec] sm:$0xf0]  ;;  %3866 = vmatpush.bf16.msra.mxu0 %v4466_v0 }
 0x1c5   :  { %v4977_v19 = vld [vmem:[#allocation8 + $0x450] sm:$0xf]  ;;  %v5938_v42 = vor.u32 %v6861_v51, %v5937_v15  ;;  %v7311_v3 = vadd.f32 %v4314_v56, %v4313_v53 }
 0x1c6   :  { %3903 = vmatpush.bf16.msra.mxu3 %v5298_v59  ;;  %v6621_v20 = vld [vmem:[#allocation8 + $0x46c] sm:$0xf0]  ;;  %3879 = vmatpush.bf16.msra.mxu1 %v4722_v7  ;;  %v3650_v4 = vpop.f32.mrf.mxu3 }
 0x1c7   :  { %v5233_v25 = vld [vmem:[#allocation8 + $0x650] sm:$0xf]  ;;  %v4978_v43 = vor.u32 %v6621_v20, %v4977_v19 }
 0x1c8   :  { %v6685_v27 = vld [vmem:[#allocation8 + $0x66c] sm:$0xf0]  ;;  %3891 = vmatpush.bf16.msra.mxu2 %v5010_v11  ;;  %3867 = vmatpush.bf16.msra.mxu0 %v4434_v24 }
 0x1c9   :  { %v5649_v35 = vld [vmem:[#allocation8 + $0x990] sm:$0xf]  ;;  %v5234_v47 = vor.u32 %v6685_v27, %v5233_v25  ;;  %v3663_v4 = vpop.f32.mrf.mxu0 }
 0x1ca   :  { %v6789_v37 = vld [vmem:[#allocation8 + $0x9ac] sm:$0xf0]  ;;  %3904 = vmatpush.bf16.msra.mxu3 %v5266_v18  ;;  %3880 = vmatpush.bf16.msra.mxu1 %v4690_v31  ;;  %v4851_v4 = vld [vmem:[#allocation8 + $0x370] sm:$0xf0] }
 0x1cb   :  { %v5905_v44 = vld [vmem:[#allocation8 + $0xb90] sm:$0xf]  ;;  %v5650_v54 = vor.u32 %v6789_v37, %v5649_v35  ;;  %3868 = vmatmul.bf16.vlgmr.msra.gmra.mxu0 %v7243_v1 }
 0x1cc   :  { %v6853_v45 = vld [vmem:[#allocation8 + $0xbac] sm:$0xf0]  ;;  %3912 = vmatpush.bf16.msrb.mxu0 %v5682_v34  ;;  %3892 = vmatpush.bf16.msra.mxu2 %v4978_v43 }
 0x1cd   :  { %v4945_v33 = vld [vmem:[#allocation8 + $0x410] sm:$0xf]  ;;  %v5906_v57 = vor.u32 %v6853_v45, %v5905_v44  ;;  %3881 = vmatmul.bf16.vlgmr.msra.gmra.mxu1 %v7246_v6  ;;  %v3662_v45 = vadd.f32 %v3661_v38, %v870_v23  ;;  %v6601_v23 = vld [vmem:[#allocation8 + $0x3d4] sm:$0xf] }
 0x1ce   :  { %v6613_v32 = vld [vmem:[#allocation8 + $0x42c] sm:$0xf0]  ;;  %3925 = vmatpush.bf16.msrb.mxu1 %v5938_v42  ;;  %3905 = vmatpush.bf16.msra.mxu3 %v5234_v47 }
 0x1cf   :  { %v5201_v48 = vld [vmem:[#allocation8 + $0x610] sm:$0xf]  ;;  %v4946_v58 = vor.u32 %v6613_v32, %v4945_v33 }
 0x1d0   :  { %v6677_v49 = vld [vmem:[#allocation8 + $0x62c] sm:$0xf0]  ;;  %3913 = vmatpush.bf16.msrb.mxu0 %v5650_v54 }
 0x1d1   :  { %v6193_v16 = vld [vmem:[#allocation8 + $0xdd0] sm:$0xf]  ;;  %v5202_v62 = vor.u32 %v6677_v49, %v5201_v48  ;;  %3893 = vmatpush.bf16.msra.mxu2 %v4946_v58 }
 0x1d2   :  { %v6925_v52 = vld [vmem:[#allocation8 + $0xdec] sm:$0xf0]  ;;  %3926 = vmatpush.bf16.msrb.mxu1 %v5906_v57 }
 0x1d3   :  { %v6449_v55 = vld [vmem:[#allocation8 + $0xfd0] sm:$0xf]  ;;  %v6194_v63 = vor.u32 %v6925_v52, %v6193_v16  ;;  %3906 = vmatpush.bf16.msra.mxu3 %v5202_v62  ;;  %v3675_v16 = vadd.f32 %v3674_v39, %v3662_v45 }
 0x1d4   :  { %v6989_v26 = vld [vmem:[#allocation8 + $0xfec] sm:$0xf0]  ;;  %3894 = vmatmul.bf16.vlgmr.msra.gmra.mxu2 %v7251_v30 }
 0x1d5   :  { %v5617_v59 = vld [vmem:[#allocation8 + $0x950] sm:$0xf]  ;;  %v6450_v5 = vor.u32 %v6989_v26, %v6449_v55  ;;  %3938 = vmatpush.bf16.msrb.mxu2 %v6194_v63 }
 0x1d6   :  { %v6781_v60 = vld [vmem:[#allocation8 + $0x96c] sm:$0xf0]  ;;  %3907 = vmatmul.bf16.vlgmr.msra.gmra.mxu3 %v7253_v36 }
 0x1d7   :  { %v5873_v0 = vld [vmem:[#allocation8 + $0xb50] sm:$0xf]  ;;  %v5618_v10 = vor.u32 %v6781_v60, %v5617_v59  ;;  %3951 = vmatpush.bf16.msrb.mxu3 %v6450_v5 }
 0x1d8   :  { %v6845_v2 = vld [vmem:[#allocation8 + $0xb6c] sm:$0xf0] }
 0x1d9   :  { %v6161_v7 = vld [vmem:[#allocation8 + $0xd90] sm:$0xf]  ;;  %v5874_v13 = vor.u32 %v6845_v2, %v5873_v0  ;;  %3914 = vmatpush.bf16.msrb.mxu0 %v5618_v10  ;;  %v3676_v10 = vpop.f32.mrf.mxu1 }
 0x1da   :  { %v6917_v9 = vld [vmem:[#allocation8 + $0xdac] sm:$0xf0]  ;;  %v5139_v10 = vld [vmem:[#allocation8 + $0x5b0] sm:$0xf0] }
 0x1db   :  { %v6417_v11 = vld [vmem:[#allocation8 + $0xf90] sm:$0xf]  ;;  %v6162_v18 = vor.u32 %v6917_v9, %v6161_v7  ;;  %3927 = vmatpush.bf16.msrb.mxu1 %v5874_v13 }
 0x1dc   :  { %v6981_v12 = vld [vmem:[#allocation8 + $0xfac] sm:$0xf0] }
 0x1dd   :  { %v5585_v15 = vld [vmem:[#allocation8 + $0x910] sm:$0xf]  ;;  %v6418_v20 = vor.u32 %v6981_v12, %v6417_v11  ;;  %3939 = vmatpush.bf16.msrb.mxu2 %v6162_v18 }
 0x1de   :  { %v6773_v17 = vld [vmem:[#allocation8 + $0x92c] sm:$0xf0] }
 0x1df   :  { %v5841_v51 = vld [vmem:[#allocation8 + $0xb10] sm:$0xf]  ;;  %v5586_v24 = vor.u32 %v6773_v17, %v5585_v15  ;;  %3952 = vmatpush.bf16.msrb.mxu3 %v6418_v20 }
 0x1e0   :  { %v6837_v19 = vld [vmem:[#allocation8 + $0xb2c] sm:$0xf0] }
 0x1e1   :  { %v6129_v21 = vld [vmem:[#allocation8 + $0xd50] sm:$0xf]  ;;  %v5842_v28 = vor.u32 %v6837_v19, %v5841_v51  ;;  %3915 = vmatpush.bf16.msrb.mxu0 %v5586_v24  ;;  %v3687_v24 = vpop.f32.mrf.mxu2 }
 0x1e2   :  { %v6909_v22 = vld [vmem:[#allocation8 + $0xd6c] sm:$0xf0] }
 0x1e3   :  { %v6385_v25 = vld [vmem:[#allocation8 + $0xf50] sm:$0xf]  ;;  %v6130_v34 = vor.u32 %v6909_v22, %v6129_v21  ;;  %3928 = vmatpush.bf16.msrb.mxu1 %v5842_v28  ;;  %v6537_v21 = vld [vmem:[#allocation8 + $0x1d4] sm:$0xf] }
 0x1e4   :  { %v6973_v27 = vld [vmem:[#allocation8 + $0xf6c] sm:$0xf0]  ;;  %v4659_v22 = vld [vmem:[#allocation8 + $0x1f0] sm:$0xf0] }
 0x1e5   :  { %v5553_v29 = vld [vmem:[#allocation8 + $0x8d0] sm:$0xf]  ;;  %v6386_v42 = vor.u32 %v6973_v27, %v6385_v25  ;;  %3940 = vmatpush.bf16.msrb.mxu2 %v6130_v34  ;;  %v4915_v27 = vld [vmem:[#allocation8 + $0x3f0] sm:$0xf0]  ;;  %v3700_v34 = vpop.f32.mrf.mxu3 }
 0x1e6   :  { %v6765_v31 = vld [vmem:[#allocation8 + $0x8ec] sm:$0xf0]  ;;  %v4918_v39 = vor.u32 %v6601_v23, %v4915_v27  ;;  %v5107_v23 = vld [vmem:[#allocation8 + $0x570] sm:$0xf0] }
 0x1e7   :  { %v5809_v35 = vld [vmem:[#allocation8 + $0xad0] sm:$0xf]  ;;  %v5554_v33 = vor.u32 %v6765_v31, %v5553_v29  ;;  %3953 = vmatpush.bf16.msrb.mxu3 %v6386_v42  ;;  %v3688_v31 = vadd.f32 %v3687_v24, %v3675_v16  ;;  %v5363_v27 = vld [vmem:[#allocation8 + $0x770] sm:$0xf0] }
 0x1e8   :  { %v6829_v37 = vld [vmem:[#allocation8 + $0xaec] sm:$0xf0] }
 0x1e9   :  { %v6097_v43 = vld [vmem:[#allocation8 + $0xd10] sm:$0xf]  ;;  %v5810_v48 = vor.u32 %v6829_v37, %v5809_v35  ;;  %3916 = vmatpush.bf16.msrb.mxu0 %v5554_v33  ;;  %v7317_v45 = vadd.f32 %v3700_v34, %v3688_v31  ;;  %v4531_v31 = vld [vmem:[#allocation8 + $0xf0] sm:$0xf0] }
 0x1ea   :  { %v6901_v44 = vld [vmem:[#allocation8 + $0xd2c] sm:$0xf0] }
 0x1eb   :  { %v6353_v47 = vld [vmem:[#allocation8 + $0xf10] sm:$0xf]  ;;  %v6098_v52 = vor.u32 %v6901_v44, %v6097_v43  ;;  %3929 = vmatpush.bf16.msrb.mxu1 %v5810_v48  ;;  %v4662_v43 = vor.u32 %v6537_v21, %v4659_v22  ;;  %v6529_v44 = vld [vmem:[#allocation8 + $0x194] sm:$0xf] }
 0x1ec   :  { %v6965_v32 = vld [vmem:[#allocation8 + $0xf2c] sm:$0xf0]  ;;  %v4883_v48 = vld [vmem:[#allocation8 + $0x3b0] sm:$0xf0] }
 0x1ed   :  { %v5521_v49 = vld [vmem:[#allocation8 + $0x890] sm:$0xf]  ;;  %v6354_v55 = vor.u32 %v6965_v32, %v6353_v47  ;;  %3941 = vmatpush.bf16.msrb.mxu2 %v6098_v52  ;;  %v4627_v47 = vld [vmem:[#allocation8 + $0x1b0] sm:$0xf0] }
 0x1ee   :  { %v6757_v50 = vld [vmem:[#allocation8 + $0x8ac] sm:$0xf0]  ;;  %v6593_v32 = vld [vmem:[#allocation8 + $0x394] sm:$0xf] }
 0x1ef   :  { %v5777_v53 = vld [vmem:[#allocation8 + $0xa90] sm:$0xf]  ;;  %v5522_v57 = vor.u32 %v6757_v50, %v5521_v49  ;;  %3954 = vmatpush.bf16.msrb.mxu3 %v6354_v55  ;;  %v5171_v55 = vld [vmem:[#allocation8 + $0x5f0] sm:$0xf0] }
 0x1f0   :  { %v6821_v54 = vld [vmem:[#allocation8 + $0xaac] sm:$0xf0]  ;;  %v6649_v22 = vld [vmem:[#allocation8 + $0x554] sm:$0xf] }
 0x1f1   :  { %v6065_v26 = vld [vmem:[#allocation8 + $0xcd0] sm:$0xf]  ;;  %v5778_v60 = vor.u32 %v6821_v54, %v5777_v53  ;;  %3917 = vmatpush.bf16.msrb.mxu0 %v5522_v57  ;;  %v6665_v54 = vld [vmem:[#allocation8 + $0x5d4] sm:$0xf]  ;;  %v5110_v34 = vor.u32 %v6649_v22, %v5107_v23 }
 0x1f2   :  { %v6893_v56 = vld [vmem:[#allocation8 + $0xcec] sm:$0xf0]  ;;  %v5427_v57 = vld [vmem:[#allocation8 + $0x7f0] sm:$0xf0] }
 0x1f3   :  { %v6321_v58 = vld [vmem:[#allocation8 + $0xed0] sm:$0xf]  ;;  %v6066_v63 = vor.u32 %v6893_v56, %v6065_v26  ;;  %3930 = vmatpush.bf16.msrb.mxu1 %v5778_v60  ;;  %v4630_v26 = vor.u32 %v6529_v44, %v4627_v47  ;;  %v6729_v56 = vld [vmem:[#allocation8 + $0x7d4] sm:$0xf] }
 0x1f4   :  { %v6957_v59 = vld [vmem:[#allocation8 + $0xeec] sm:$0xf0]  ;;  %v6521_v60 = vld [vmem:[#allocation8 + $0x154] sm:$0xf] }
 0x1f5   :  { %v5489_v61 = vld [vmem:[#allocation8 + $0x850] sm:$0xf]  ;;  %v6322_v5 = vor.u32 %v6957_v59, %v6321_v58  ;;  %3942 = vmatpush.bf16.msrb.mxu2 %v6066_v63  ;;  %v4886_v58 = vor.u32 %v6593_v32, %v4883_v48  ;;  %v5075_v44 = vld [vmem:[#allocation8 + $0x530] sm:$0xf0] }
 0x1f6   :  { %v6749_v62 = vld [vmem:[#allocation8 + $0x86c] sm:$0xf0]  ;;  %v6705_v32 = vld [vmem:[#allocation8 + $0x714] sm:$0xf] }
 0x1f7   :  { %v5745_v0 = vld [vmem:[#allocation8 + $0xa50] sm:$0xf]  ;;  %v5490_v11 = vor.u32 %v6749_v62, %v5489_v61  ;;  %3955 = vmatpush.bf16.msrb.mxu3 %v6322_v5  ;;  %v4595_v61 = vld [vmem:[#allocation8 + $0x170] sm:$0xf0]  ;;  %v3689_v62 = vpop.f32.mrf.mxu2  ;;  %v3702_v5 = vpop.f32.mrf.mxu3 }
 0x1f8   :  { %v6813_v2 = vld [vmem:[#allocation8 + $0xa6c] sm:$0xf0]  ;;  %v5331_v48 = vld [vmem:[#allocation8 + $0x730] sm:$0xf0] }
 0x1f9   :  { %v6033_v7 = vld [vmem:[#allocation8 + $0xc90] sm:$0xf]  ;;  %v5746_v17 = vor.u32 %v6813_v2, %v5745_v0  ;;  %3918 = vmatpush.bf16.msrb.mxu0 %v5490_v11  ;;  %v5174_v0 = vor.u32 %v6665_v54, %v5171_v55  ;;  %v6585_v2 = vld [vmem:[#allocation8 + $0x354] sm:$0xf]  ;;  %v4598_v11 = vor.u32 %v6521_v60, %v4595_v61 }
 0x1fa   :  { %v6885_v9 = vld [vmem:[#allocation8 + $0xcac] sm:$0xf0]  ;;  %v6561_v54 = vld [vmem:[#allocation8 + $0x294] sm:$0xf] }
 0x1fb   :  { %v6289_v12 = vld [vmem:[#allocation8 + $0xe90] sm:$0xf]  ;;  %v6034_v20 = vor.u32 %v6885_v9, %v6033_v7  ;;  %3931 = vmatpush.bf16.msrb.mxu1 %v5746_v17  ;;  %v5430_v7 = vor.u32 %v6729_v56, %v5427_v57  ;;  %v6657_v9 = vld [vmem:[#allocation8 + $0x594] sm:$0xf] }
 0x1fc   :  { %v6949_v13 = vld [vmem:[#allocation8 + $0xeac] sm:$0xf0]  ;;  %v6513_v17 = vld [vmem:[#allocation8 + $0x114] sm:$0xf] }
 0x1fd   :  { %v5457_v15 = vld [vmem:[#allocation8 + $0x810] sm:$0xf]  ;;  %v6290_v25 = vor.u32 %v6949_v13, %v6289_v12  ;;  %3943 = vmatpush.bf16.msrb.mxu2 %v6034_v20  ;;  %v6721_v12 = vld [vmem:[#allocation8 + $0x794] sm:$0xf] }
 0x1fe   :  { %v6741_v18 = vld [vmem:[#allocation8 + $0x82c] sm:$0xf0]  ;;  %v5395_v13 = vld [vmem:[#allocation8 + $0x7b0] sm:$0xf0] }
 0x1ff   :  { %v5713_v51 = vld [vmem:[#allocation8 + $0xa10] sm:$0xf]  ;;  %v5458_v35 = vor.u32 %v6741_v18, %v5457_v15  ;;  %3956 = vmatpush.bf16.msrb.mxu3 %v6290_v25  ;;  %v4854_v15 = vor.u32 %v6585_v2, %v4851_v4  ;;  %v4563_v18 = vld [vmem:[#allocation8 + $0x130] sm:$0xf0]  ;;  %v5398_v21 = vor.u32 %v6721_v12, %v5395_v13 }
 0x200   :  { %v6805_v19 = vld [vmem:[#allocation8 + $0xa2c] sm:$0xf0]  ;;  %v4819_v20 = vld [vmem:[#allocation8 + $0x330] sm:$0xf0]  ;;  %v4566_v24 = vor.u32 %v6513_v17, %v4563_v18  ;;  %v4291_v18 = vperm.slane %v7305_v40, 4 }
 0x201   :  { %v6001_v28 = vld [vmem:[#allocation8 + $0xc50] sm:$0xf]  ;;  %v5714_v42 = vor.u32 %v6805_v19, %v5713_v51  ;;  %3919 = vmatpush.bf16.msrb.mxu0 %v5458_v35  ;;  %v5142_v51 = vor.u32 %v6657_v9, %v5139_v10  ;;  %v6577_v19 = vld [vmem:[#allocation8 + $0x314] sm:$0xf] }
 0x202   :  { %v6877_v29 = vld [vmem:[#allocation8 + $0xc6c] sm:$0xf0]  ;;  %v6713_v25 = vld [vmem:[#allocation8 + $0x754] sm:$0xf] }
 0x203   :  { %v6257_v37 = vld [vmem:[#allocation8 + $0xe50] sm:$0xf]  ;;  %v6002_v33 = vor.u32 %v6877_v29, %v6001_v28  ;;  %3932 = vmatpush.bf16.msrb.mxu1 %v5714_v42  ;;  %v4822_v28 = vor.u32 %v6577_v19, %v4819_v20  ;;  %v6505_v29 = vld [vmem:[#allocation8 + $0xd4] sm:$0xf]  ;;  %v5366_v42 = vor.u32 %v6713_v25, %v5363_v27  ;;  %v3739_v25 = vpop.f32.mrf.mxu2 }
 0x204   :  { %v6941_v38 = vld [vmem:[#allocation8 + $0xe6c] sm:$0xf0]  ;;  %3920 = vmatmul.bf16.vlgmr.msrb.gmra.mxu0 %v7260_v8  ;;  %v6569_v35 = vld [vmem:[#allocation8 + $0x2d4] sm:$0xf]  ;;  %v4534_v47 = vor.u32 %v6505_v29, %v4531_v31 }
 0x205   :  { %v6258_v49 = vor.u32 %v6941_v38, %v6257_v37  ;;  %v5969_v50 = vld [vmem:[#allocation8 + $0xc10] sm:$0xf]  ;;  %3964 = vmatpush.bf16.msra.mxu0 %v4662_v43  ;;  %3944 = vmatpush.bf16.msrb.mxu2 %v6002_v33  ;;  %v4787_v37 = vld [vmem:[#allocation8 + $0x2f0] sm:$0xf0]  ;;  %v3713_v38 = vpop.f32.mrf.mxu0  ;;  %v3726_v33 = vpop.f32.mrf.mxu1 }
 0x206   :  { %v6869_v16 = vld [vmem:[#allocation8 + $0xc2c] sm:$0xf0]  ;;  %3933 = vmatmul.bf16.vlgmr.msrb.gmra.mxu1 %v7262_v14  ;;  %v6641_v43 = vld [vmem:[#allocation8 + $0x514] sm:$0xf] }
 0x207   :  { %v6225_v52 = vld [vmem:[#allocation8 + $0xe10] sm:$0xf]  ;;  %3977 = vmatpush.bf16.msra.mxu1 %v4918_v39  ;;  %v5970_v59 = vor.u32 %v6869_v16, %v5969_v50  ;;  %3957 = vmatpush.bf16.msrb.mxu3 %v6258_v49  ;;  %v3714_v39 = vadd.f32 %v3713_v38, %v7317_v45  ;;  %v4790_v49 = vor.u32 %v6569_v35, %v4787_v37  ;;  %v6497_v50 = vld [vmem:[#allocation8 + $0x94] sm:$0xf]  ;;  %v3752_v35 = vpop.f32.mrf.mxu3 }
 0x208   :  { %v6933_v53 = vld [vmem:[#allocation8 + $0xe2c] sm:$0xf0]  ;;  %v4499_v16 = vld [vmem:[#allocation8 + $0xb0] sm:$0xf0] }
 0x209   :  { %v6226_v63 = vor.u32 %v6933_v53, %v6225_v52  ;;  %3965 = vmatpush.bf16.msra.mxu0 %v4630_v26  ;;  %3945 = vmatpush.bf16.msrb.mxu2 %v5970_v59  ;;  %v3727_v52 = vadd.f32 %v3726_v33, %v3714_v39  ;;  %v5078_v53 = vor.u32 %v6641_v43, %v5075_v44  ;;  %v4755_v55 = vld [vmem:[#allocation8 + $0x2b0] sm:$0xf0]  ;;  %v4307_v43 = vperm.slane %v4291_v18, 0 }
 0x20a   :  { %v5334_v26 = vor.u32 %v6705_v32, %v5331_v48  ;;  %v6633_v56 = vld [vmem:[#allocation8 + $0x4d4] sm:$0xf]  ;;  %v4502_v45 = vor.u32 %v6497_v50, %v4499_v16  ;;  %v4758_v60 = vor.u32 %v6561_v54, %v4755_v55 }
 0x20b   :  { %3978 = vmatpush.bf16.msra.mxu1 %v4886_v58  ;;  %3958 = vmatpush.bf16.msrb.mxu3 %v6226_v63  ;;  %v5043_v57 = vld [vmem:[#allocation8 + $0x4f0] sm:$0xf0] }
 0x20c   :  { %3946 = vmatmul.bf16.vlgmr.msrb.gmra.mxu2 %v7266_v41  ;;  %v6697_v58 = vld [vmem:[#allocation8 + $0x6d4] sm:$0xf]  ;;  %v5046_v63 = vor.u32 %v6633_v56, %v5043_v57 }
 0x20d   :  { %3990 = vmatpush.bf16.msra.mxu2 %v5174_v0  ;;  %3966 = vmatpush.bf16.msra.mxu0 %v4598_v11  ;;  %v5299_v59 = vld [vmem:[#allocation8 + $0x6f0] sm:$0xf0]  ;;  %v3715_v4 = vpop.f32.mrf.mxu0  ;;  %v3728_v11 = vpop.f32.mrf.mxu1 }
 0x20e   :  { %3959 = vmatmul.bf16.vlgmr.msrb.gmra.mxu3 %v7268_v46  ;;  %v6489_v61 = vld [vmem:[#allocation8 + $0x54] sm:$0xf]  ;;  %v5302_v5 = vor.u32 %v6697_v58, %v5299_v59  ;;  %v3741_v4 = vpop.f32.mrf.mxu2 }
 0x20f   :  { %4003 = vmatpush.bf16.msra.mxu3 %v5430_v7  ;;  %3979 = vmatpush.bf16.msra.mxu1 %v4854_v15  ;;  %v4467_v62 = vld [vmem:[#allocation8 + $0x70] sm:$0xf0] }
 0x210   :  { %v6553_v0 = vld [vmem:[#allocation8 + $0x254] sm:$0xf]  ;;  %v4470_v12 = vor.u32 %v6489_v61, %v4467_v62 }
 0x211   :  { %3991 = vmatpush.bf16.msra.mxu2 %v5142_v51  ;;  %3967 = vmatpush.bf16.msra.mxu0 %v4566_v24  ;;  %v4723_v2 = vld [vmem:[#allocation8 + $0x270] sm:$0xf0] }
 0x212   :  { %v6625_v7 = vld [vmem:[#allocation8 + $0x494] sm:$0xf]  ;;  %v4726_v51 = vor.u32 %v6553_v0, %v4723_v2 }
 0x213   :  { %4004 = vmatpush.bf16.msra.mxu3 %v5398_v21  ;;  %3980 = vmatpush.bf16.msra.mxu1 %v4822_v28  ;;  %v5011_v9 = vld [vmem:[#allocation8 + $0x4b0] sm:$0xf0] }
 0x214   :  { %v6689_v10 = vld [vmem:[#allocation8 + $0x694] sm:$0xf]  ;;  %v5014_v21 = vor.u32 %v6625_v7, %v5011_v9 }
 0x215   :  { %3992 = vmatpush.bf16.msra.mxu2 %v5110_v34  ;;  %3968 = vmatpush.bf16.msra.mxu0 %v4534_v47  ;;  %v5267_v13 = vld [vmem:[#allocation8 + $0x6b0] sm:$0xf0]  ;;  %v3740_v34 = vadd.f32 %v3739_v25, %v3727_v52 }
 0x216   :  { %v6481_v15 = vld [vmem:[#allocation8 + $0x14] sm:$0xf]  ;;  %v5270_v27 = vor.u32 %v6689_v10, %v5267_v13 }
 0x217   :  { %4005 = vmatpush.bf16.msra.mxu3 %v5366_v42  ;;  %3981 = vmatpush.bf16.msra.mxu1 %v4790_v49  ;;  %v4435_v17 = vld [vmem:[#allocation8 + $0x30] sm:$0xf0]  ;;  %v3753_v32 = vadd.f32 %v3752_v35, %v3740_v34 }
 0x218   :  { %v6545_v19 = vld [vmem:[#allocation8 + $0x214] sm:$0xf]  ;;  %v4438_v37 = vor.u32 %v6481_v15, %v4435_v17 }
 0x219   :  { %3993 = vmatpush.bf16.msra.mxu2 %v5078_v53  ;;  %3969 = vmatpush.bf16.msra.mxu0 %v4502_v45  ;;  %v4691_v20 = vld [vmem:[#allocation8 + $0x230] sm:$0xf0]  ;;  %v4278_v56 = vmax.f32 %v3753_v32, 0.0 }
 0x21a   :  { %v6793_v22 = vld [vmem:[#allocation8 + $0x9d4] sm:$0xf]  ;;  %v4694_v44 = vor.u32 %v6545_v19, %v4691_v20 }
 0x21b   :  { %4006 = vmatpush.bf16.msra.mxu3 %v5334_v26  ;;  %3982 = vmatpush.bf16.msra.mxu1 %v4758_v60  ;;  %v5683_v23 = vld [vmem:[#allocation8 + $0x9f0] sm:$0xf0]  ;;  %v4315_v61 = vmul.f32 %v4307_v43, %v4278_v56 }
 0x21c   :  { %v6857_v24 = vld [vmem:[#allocation8 + $0xbd4] sm:$0xf]  ;;  %v5686_v39 = vor.u32 %v6793_v22, %v5683_v23 }
 0x21d   :  { %3994 = vmatpush.bf16.msra.mxu2 %v5046_v63  ;;  %v5939_v28 = vld [vmem:[#allocation8 + $0xbf0] sm:$0xf0]  ;;  %3970 = vmatpush.bf16.msra.mxu0 %v4470_v12  ;;  %v7327_v11 = vadd.f32 %v7311_v3, %v4315_v61  ;;  %v3754_v12 = vpop.f32.mrf.mxu3 }
 0x21e   :  { %v6617_v29 = vld [vmem:[#allocation8 + $0x454] sm:$0xf]  ;;  %v5942_v48 = vor.u32 %v6857_v24, %v5939_v28 }
 0x21f   :  { %4007 = vmatpush.bf16.msra.mxu3 %v5302_v5  ;;  %v4979_v31 = vld [vmem:[#allocation8 + $0x470] sm:$0xf0]  ;;  %3983 = vmatpush.bf16.msra.mxu1 %v4726_v51 }
 0x220   :  { %v6681_v38 = vld [vmem:[#allocation8 + $0x654] sm:$0xf]  ;;  %v4982_v49 = vor.u32 %v6617_v29, %v4979_v31  ;;  %v7331_v29 = vld [vmem:[#allocation10] sm:$0xff] }
 0x221   :  { %v5235_v42 = vld [vmem:[#allocation8 + $0x670] sm:$0xf0]  ;;  %3995 = vmatpush.bf16.msra.mxu2 %v5014_v21  ;;  %3971 = vmatpush.bf16.msra.mxu0 %v4438_v37  ;;  %v871_v31 = vperm.slane %v7331_v29, 3 }
 0x222   :  { %v6785_v33 = vld [vmem:[#allocation8 + $0x994] sm:$0xf]  ;;  %v5238_v52 = vor.u32 %v6681_v38, %v5235_v42 }
 0x223   :  { %v5651_v47 = vld [vmem:[#allocation8 + $0x9b0] sm:$0xf0]  ;;  %4008 = vmatpush.bf16.msra.mxu3 %v5270_v27  ;;  %3984 = vmatpush.bf16.msra.mxu1 %v4694_v44 }
 0x224   :  { %v6849_v50 = vld [vmem:[#allocation8 + $0xb94] sm:$0xf]  ;;  %v5654_v58 = vor.u32 %v6785_v33, %v5651_v47  ;;  %3972 = vmatmul.bf16.vlgmr.msra.gmra.mxu0 %v7243_v1  ;;  %v3765_v47 = vpop.f32.mrf.mxu0 }
 0x225   :  { %v5907_v16 = vld [vmem:[#allocation8 + $0xbb0] sm:$0xf0]  ;;  %4016 = vmatpush.bf16.msrb.mxu0 %v5686_v39  ;;  %3996 = vmatpush.bf16.msra.mxu2 %v4982_v49 }
 0x226   :  { %v6609_v53 = vld [vmem:[#allocation8 + $0x414] sm:$0xf]  ;;  %v5910_v62 = vor.u32 %v6849_v50, %v5907_v16  ;;  %3985 = vmatmul.bf16.vlgmr.msra.gmra.mxu1 %v7246_v6  ;;  %v3766_v50 = vadd.f32 %v3765_v47, %v871_v31  ;;  %v3778_v16 = vpop.f32.mrf.mxu1  ;;  %v6542_v31 = vld [vmem:[#allocation8 + $0x1f4] sm:$0xf0] }
 0x227   :  { %v4947_v54 = vld [vmem:[#allocation8 + $0x430] sm:$0xf0]  ;;  %4029 = vmatpush.bf16.msrb.mxu1 %v5942_v48  ;;  %4009 = vmatpush.bf16.msra.mxu3 %v5238_v52 }
 0x228   :  { %v6673_v55 = vld [vmem:[#allocation8 + $0x614] sm:$0xf]  ;;  %v4950_v63 = vor.u32 %v6609_v53, %v4947_v54 }
 0x229   :  { %v5203_v26 = vld [vmem:[#allocation8 + $0x630] sm:$0xf0]  ;;  %4017 = vmatpush.bf16.msrb.mxu0 %v5654_v58 }
 0x22a   :  { %v6921_v57 = vld [vmem:[#allocation8 + $0xdd4] sm:$0xf]  ;;  %v5206_v5 = vor.u32 %v6673_v55, %v5203_v26  ;;  %3997 = vmatpush.bf16.msra.mxu2 %v4950_v63 }
 0x22b   :  { %v6195_v45 = vld [vmem:[#allocation8 + $0xdf0] sm:$0xf0]  ;;  %4030 = vmatpush.bf16.msrb.mxu1 %v5910_v62 }
 0x22c   :  { %v6985_v59 = vld [vmem:[#allocation8 + $0xfd4] sm:$0xf]  ;;  %v6198_v7 = vor.u32 %v6921_v57, %v6195_v45  ;;  %4010 = vmatpush.bf16.msra.mxu3 %v5206_v5  ;;  %v3779_v57 = vadd.f32 %v3778_v16, %v3766_v50  ;;  %v4633_v50 = vld [vmem:[#allocation8 + $0x198] sm:$0xf] }
 0x22d   :  { %v6451_v60 = vld [vmem:[#allocation8 + $0xff0] sm:$0xf0]  ;;  %3998 = vmatmul.bf16.vlgmr.msra.gmra.mxu2 %v7251_v30 }
 0x22e   :  { %v6777_v0 = vld [vmem:[#allocation8 + $0x954] sm:$0xf]  ;;  %v6454_v13 = vor.u32 %v6985_v59, %v6451_v60  ;;  %4042 = vmatpush.bf16.msrb.mxu2 %v6198_v7 }
 0x22f   :  { %v5619_v2 = vld [vmem:[#allocation8 + $0x970] sm:$0xf0]  ;;  %4011 = vmatmul.bf16.vlgmr.msra.gmra.mxu3 %v7253_v36 }
 0x230   :  { %v6841_v9 = vld [vmem:[#allocation8 + $0xb54] sm:$0xf]  ;;  %v5622_v18 = vor.u32 %v6777_v0, %v5619_v2  ;;  %4055 = vmatpush.bf16.msrb.mxu3 %v6454_v13  ;;  %v3767_v13 = vpop.f32.mrf.mxu0 }
 0x231   :  { %v5875_v10 = vld [vmem:[#allocation8 + $0xb70] sm:$0xf0]  ;;  %v4857_v13 = vld [vmem:[#allocation8 + $0x358] sm:$0xf] }
 0x232   :  { %v6913_v15 = vld [vmem:[#allocation8 + $0xd94] sm:$0xf]  ;;  %v5878_v20 = vor.u32 %v6841_v9, %v5875_v10  ;;  %4018 = vmatpush.bf16.msrb.mxu0 %v5622_v18 }
 0x233   :  { %v6163_v17 = vld [vmem:[#allocation8 + $0xdb0] sm:$0xf0] }
 0x234   :  { %v6977_v51 = vld [vmem:[#allocation8 + $0xf94] sm:$0xf]  ;;  %v6166_v23 = vor.u32 %v6913_v15, %v6163_v17  ;;  %4031 = vmatpush.bf16.msrb.mxu1 %v5878_v20 }
 0x235   :  { %v6419_v19 = vld [vmem:[#allocation8 + $0xfb0] sm:$0xf0] }
 0x236   :  { %v6769_v21 = vld [vmem:[#allocation8 + $0x914] sm:$0xf]  ;;  %v6422_v25 = vor.u32 %v6977_v51, %v6419_v19  ;;  %4043 = vmatpush.bf16.msrb.mxu2 %v6166_v23  ;;  %v3780_v51 = vpop.f32.mrf.mxu1 }
 0x237   :  { %v5587_v22 = vld [vmem:[#allocation8 + $0x930] sm:$0xf0]  ;;  %v5145_v51 = vld [vmem:[#allocation8 + $0x598] sm:$0xf] }
 0x238   :  { %v6833_v3 = vld [vmem:[#allocation8 + $0xb14] sm:$0xf]  ;;  %v5590_v34 = vor.u32 %v6769_v21, %v5587_v22  ;;  %4056 = vmatpush.bf16.msrb.mxu3 %v6422_v25 }
 0x239   :  { %v5843_v24 = vld [vmem:[#allocation8 + $0xb30] sm:$0xf0] }
 0x23a   :  { %v6905_v27 = vld [vmem:[#allocation8 + $0xd54] sm:$0xf]  ;;  %v5846_v38 = vor.u32 %v6833_v3, %v5843_v24  ;;  %4019 = vmatpush.bf16.msrb.mxu0 %v5590_v34  ;;  %v4921_v34 = vld [vmem:[#allocation8 + $0x3d8] sm:$0xf] }
 0x23b   :  { %v6131_v28 = vld [vmem:[#allocation8 + $0xd70] sm:$0xf0] }
 0x23c   :  { %v6969_v35 = vld [vmem:[#allocation8 + $0xf54] sm:$0xf]  ;;  %v6134_v44 = vor.u32 %v6905_v27, %v6131_v28  ;;  %4032 = vmatpush.bf16.msrb.mxu1 %v5846_v38  ;;  %v4665_v28 = vld [vmem:[#allocation8 + $0x1d8] sm:$0xf] }
 0x23d   :  { %v6387_v37 = vld [vmem:[#allocation8 + $0xf70] sm:$0xf0]  ;;  %v6606_v38 = vld [vmem:[#allocation8 + $0x3f4] sm:$0xf0] }
 0x23e   :  { %v6761_v42 = vld [vmem:[#allocation8 + $0x8d4] sm:$0xf]  ;;  %v6390_v32 = vor.u32 %v6969_v35, %v6387_v37  ;;  %4044 = vmatpush.bf16.msrb.mxu2 %v6134_v44  ;;  %v3791_v35 = vpop.f32.mrf.mxu2 }
 0x23f   :  { %v5555_v43 = vld [vmem:[#allocation8 + $0x8f0] sm:$0xf0]  ;;  %v3792_v44 = vadd.f32 %v3791_v35, %v3779_v57  ;;  %v6654_v35 = vld [vmem:[#allocation8 + $0x574] sm:$0xf0] }
 0x240   :  { %v6825_v39 = vld [vmem:[#allocation8 + $0xad4] sm:$0xf]  ;;  %v5558_v53 = vor.u32 %v6761_v42, %v5555_v43  ;;  %4057 = vmatpush.bf16.msrb.mxu3 %v6390_v32 }
 0x241   :  { %v5811_v33 = vld [vmem:[#allocation8 + $0xaf0] sm:$0xf0] }
 0x242   :  { %v6897_v48 = vld [vmem:[#allocation8 + $0xd14] sm:$0xf]  ;;  %v5814_v55 = vor.u32 %v6825_v39, %v5811_v33  ;;  %4020 = vmatpush.bf16.msrb.mxu0 %v5558_v53  ;;  %v3804_v39 = vpop.f32.mrf.mxu3  ;;  %v4922_v53 = vor.u32 %v6606_v38, %v4921_v34  ;;  %v5113_v34 = vld [vmem:[#allocation8 + $0x558] sm:$0xf] }
 0x243   :  { %v6099_v49 = vld [vmem:[#allocation8 + $0xd30] sm:$0xf0]  ;;  %v7335_v16 = vadd.f32 %v3804_v39, %v3792_v44  ;;  %v5369_v38 = vld [vmem:[#allocation8 + $0x758] sm:$0xf] }
 0x244   :  { %v6961_v52 = vld [vmem:[#allocation8 + $0xf14] sm:$0xf]  ;;  %v6102_v45 = vor.u32 %v6897_v48, %v6099_v49  ;;  %4033 = vmatpush.bf16.msrb.mxu1 %v5814_v55  ;;  %v4666_v49 = vor.u32 %v6542_v31, %v4665_v28  ;;  %v4889_v55 = vld [vmem:[#allocation8 + $0x398] sm:$0xf] }
 0x245   :  { %v6355_v54 = vld [vmem:[#allocation8 + $0xf30] sm:$0xf0]  ;;  %v6582_v28 = vld [vmem:[#allocation8 + $0x334] sm:$0xf0] }
 0x246   :  { %v6753_v26 = vld [vmem:[#allocation8 + $0x894] sm:$0xf]  ;;  %v6358_v60 = vor.u32 %v6961_v52, %v6355_v54  ;;  %4045 = vmatpush.bf16.msrb.mxu2 %v6102_v45  ;;  %v6534_v54 = vld [vmem:[#allocation8 + $0x1b4] sm:$0xf0] }
 0x247   :  { %v5523_v56 = vld [vmem:[#allocation8 + $0x8b0] sm:$0xf0]  ;;  %v4537_v44 = vld [vmem:[#allocation8 + $0xd8] sm:$0xf] }
 0x248   :  { %v6817_v58 = vld [vmem:[#allocation8 + $0xa94] sm:$0xf]  ;;  %v5526_v63 = vor.u32 %v6753_v26, %v5523_v56  ;;  %4058 = vmatpush.bf16.msrb.mxu3 %v6358_v60  ;;  %v6598_v26 = vld [vmem:[#allocation8 + $0x3b4] sm:$0xf0] }
 0x249   :  { %v5779_v59 = vld [vmem:[#allocation8 + $0xab0] sm:$0xf0]  ;;  %v5177_v60 = vld [vmem:[#allocation8 + $0x5d8] sm:$0xf] }
 0x24a   :  { %v6889_v61 = vld [vmem:[#allocation8 + $0xcd4] sm:$0xf]  ;;  %v5782_v4 = vor.u32 %v6817_v58, %v5779_v59  ;;  %4021 = vmatpush.bf16.msrb.mxu0 %v5526_v63  ;;  %v5433_v63 = vld [vmem:[#allocation8 + $0x7d8] sm:$0xf] }
 0x24b   :  { %v6067_v62 = vld [vmem:[#allocation8 + $0xcf0] sm:$0xf0]  ;;  %v6510_v39 = vld [vmem:[#allocation8 + $0xf4] sm:$0xf0] }
 0x24c   :  { %v6953_v0 = vld [vmem:[#allocation8 + $0xed4] sm:$0xf]  ;;  %v6070_v9 = vor.u32 %v6889_v61, %v6067_v62  ;;  %4034 = vmatpush.bf16.msrb.mxu1 %v5782_v4  ;;  %v6670_v61 = vld [vmem:[#allocation8 + $0x5f4] sm:$0xf0]  ;;  %v4634_v62 = vor.u32 %v6534_v54, %v4633_v50  ;;  %v3830_v54 = vpop.f32.mrf.mxu1 }
 0x24d   :  { %v6323_v2 = vld [vmem:[#allocation8 + $0xef0] sm:$0xf0]  ;;  %v5081_v50 = vld [vmem:[#allocation8 + $0x518] sm:$0xf] }
 0x24e   :  { %v6745_v5 = vld [vmem:[#allocation8 + $0x854] sm:$0xf]  ;;  %v6326_v15 = vor.u32 %v6953_v0, %v6323_v2  ;;  %4046 = vmatpush.bf16.msrb.mxu2 %v6070_v9  ;;  %v6734_v0 = vld [vmem:[#allocation8 + $0x7f4] sm:$0xf0]  ;;  %v4890_v2 = vor.u32 %v6598_v26, %v4889_v55  ;;  %v3793_v9 = vpop.f32.mrf.mxu2  ;;  %v4538_v55 = vor.u32 %v6510_v39, %v4537_v44 }
 0x24f   :  { %v5491_v7 = vld [vmem:[#allocation8 + $0x870] sm:$0xf0]  ;;  %v5337_v26 = vld [vmem:[#allocation8 + $0x718] sm:$0xf] }
 0x250   :  { %v6809_v10 = vld [vmem:[#allocation8 + $0xa54] sm:$0xf]  ;;  %v5494_v19 = vor.u32 %v6745_v5, %v5491_v7  ;;  %4059 = vmatpush.bf16.msrb.mxu3 %v6326_v15  ;;  %v4601_v5 = vld [vmem:[#allocation8 + $0x158] sm:$0xf] }
 0x251   :  { %v5747_v12 = vld [vmem:[#allocation8 + $0xa70] sm:$0xf0]  ;;  %v6526_v7 = vld [vmem:[#allocation8 + $0x174] sm:$0xf0] }
 0x252   :  { %v6881_v17 = vld [vmem:[#allocation8 + $0xc94] sm:$0xf]  ;;  %v5750_v23 = vor.u32 %v6809_v10, %v5747_v12  ;;  %4022 = vmatpush.bf16.msrb.mxu0 %v5494_v19  ;;  %v5178_v12 = vor.u32 %v6670_v61, %v5177_v60  ;;  %v6590_v15 = vld [vmem:[#allocation8 + $0x374] sm:$0xf0] }
 0x253   :  { %v6035_v18 = vld [vmem:[#allocation8 + $0xcb0] sm:$0xf0]  ;;  %v6662_v19 = vld [vmem:[#allocation8 + $0x5b4] sm:$0xf0] }
 0x254   :  { %v6945_v20 = vld [vmem:[#allocation8 + $0xe94] sm:$0xf]  ;;  %v6038_v27 = vor.u32 %v6881_v17, %v6035_v18  ;;  %4035 = vmatpush.bf16.msrb.mxu1 %v5750_v23  ;;  %v3806_v17 = vpop.f32.mrf.mxu3  ;;  %v5434_v18 = vor.u32 %v6734_v0, %v5433_v63  ;;  %v4858_v23 = vor.u32 %v6590_v15, %v4857_v13  ;;  %v4761_v61 = vld [vmem:[#allocation8 + $0x298] sm:$0xf] }
 0x255   :  { %v6291_v21 = vld [vmem:[#allocation8 + $0xeb0] sm:$0xf0]  ;;  %v5049_v0 = vld [vmem:[#allocation8 + $0x4d8] sm:$0xf] }
 0x256   :  { %v6737_v22 = vld [vmem:[#allocation8 + $0x814] sm:$0xf]  ;;  %v6294_v37 = vor.u32 %v6945_v20, %v6291_v21  ;;  %4047 = vmatpush.bf16.msrb.mxu2 %v6038_v27  ;;  %v4602_v20 = vor.u32 %v6526_v7, %v4601_v5  ;;  %v5401_v21 = vld [vmem:[#allocation8 + $0x798] sm:$0xf] }
 0x257   :  { %v5459_v3 = vld [vmem:[#allocation8 + $0x830] sm:$0xf0]  ;;  %v4825_v27 = vld [vmem:[#allocation8 + $0x318] sm:$0xf] }
 0x258   :  { %v6801_v24 = vld [vmem:[#allocation8 + $0xa14] sm:$0xf]  ;;  %v5462_v33 = vor.u32 %v6737_v22, %v5459_v3  ;;  %4060 = vmatpush.bf16.msrb.mxu3 %v6294_v37  ;;  %v6726_v22 = vld [vmem:[#allocation8 + $0x7b4] sm:$0xf0] }
 0x259   :  { %v5715_v25 = vld [vmem:[#allocation8 + $0xa30] sm:$0xf0]  ;;  %v4569_v3 = vld [vmem:[#allocation8 + $0x118] sm:$0xf]  ;;  %v5402_v31 = vor.u32 %v6726_v22, %v5401_v21  ;;  %v3832_v21 = vpop.f32.mrf.mxu1 }
 0x25a   :  { %v6873_v42 = vld [vmem:[#allocation8 + $0xc54] sm:$0xf]  ;;  %v5718_v48 = vor.u32 %v6801_v24, %v5715_v25  ;;  %4023 = vmatpush.bf16.msrb.mxu0 %v5462_v33  ;;  %v6518_v24 = vld [vmem:[#allocation8 + $0x134] sm:$0xf0]  ;;  %v5146_v25 = vor.u32 %v6662_v19, %v5145_v51  ;;  %v5114_v33 = vor.u32 %v6654_v35, %v5113_v34 }
 0x25b   :  { %v6003_v43 = vld [vmem:[#allocation8 + $0xc70] sm:$0xf0]  ;;  %v4570_v37 = vor.u32 %v6518_v24, %v4569_v3  ;;  %v6702_v5 = vld [vmem:[#allocation8 + $0x6f4] sm:$0xf0] }
 0x25c   :  { %v6937_v47 = vld [vmem:[#allocation8 + $0xe54] sm:$0xf]  ;;  %v6006_v52 = vor.u32 %v6873_v42, %v6003_v43  ;;  %4036 = vmatpush.bf16.msrb.mxu1 %v5718_v48  ;;  %v6718_v42 = vld [vmem:[#allocation8 + $0x774] sm:$0xf0]  ;;  %v4826_v43 = vor.u32 %v6582_v28, %v4825_v27  ;;  %v3817_v48 = vpop.f32.mrf.mxu0 }
 0x25d   :  { %v6259_v32 = vld [vmem:[#allocation8 + $0xe70] sm:$0xf0]  ;;  %4024 = vmatmul.bf16.vlgmr.msrb.gmra.mxu0 %v7260_v8  ;;  %v4473_v9 = vld [vmem:[#allocation8 + $0x58] sm:$0xf] }
 0x25e   :  { %v6262_v56 = vor.u32 %v6937_v47, %v6259_v32  ;;  %v6865_v57 = vld [vmem:[#allocation8 + $0xc14] sm:$0xf]  ;;  %4068 = vmatpush.bf16.msra.mxu0 %v4666_v49  ;;  %4048 = vmatpush.bf16.msrb.mxu2 %v6006_v52  ;;  %v4793_v47 = vld [vmem:[#allocation8 + $0x2d8] sm:$0xf]  ;;  %v5370_v49 = vor.u32 %v6718_v42, %v5369_v38  ;;  %v3818_v52 = vadd.f32 %v3817_v48, %v7335_v16  ;;  %v3843_v42 = vpop.f32.mrf.mxu2 }
 0x25f   :  { %v5971_v45 = vld [vmem:[#allocation8 + $0xc30] sm:$0xf0]  ;;  %4037 = vmatmul.bf16.vlgmr.msrb.gmra.mxu1 %v7262_v14  ;;  %v6574_v32 = vld [vmem:[#allocation8 + $0x2f4] sm:$0xf0] }
 0x260   :  { %v6929_v58 = vld [vmem:[#allocation8 + $0xe14] sm:$0xf]  ;;  %4081 = vmatpush.bf16.msra.mxu1 %v4922_v53  ;;  %v5974_v4 = vor.u32 %v6865_v57, %v5971_v45  ;;  %4061 = vmatpush.bf16.msrb.mxu3 %v6262_v56  ;;  %v6646_v53 = vld [vmem:[#allocation8 + $0x534] sm:$0xf0]  ;;  %v4794_v57 = vor.u32 %v6574_v32, %v4793_v47  ;;  %v3856_v32 = vpop.f32.mrf.mxu3 }
 0x261   :  { %v6227_v59 = vld [vmem:[#allocation8 + $0xe30] sm:$0xf0]  ;;  %v6710_v56 = vld [vmem:[#allocation8 + $0x734] sm:$0xf0]  ;;  %v5082_v60 = vor.u32 %v6646_v53, %v5081_v50 }
 0x262   :  { %v6230_v10 = vor.u32 %v6929_v58, %v6227_v59  ;;  %4069 = vmatpush.bf16.msra.mxu0 %v4634_v62  ;;  %4049 = vmatpush.bf16.msrb.mxu2 %v5974_v4  ;;  %v4505_v45 = vld [vmem:[#allocation8 + $0x98] sm:$0xf]  ;;  %v3831_v59 = vadd.f32 %v3830_v54, %v3818_v52  ;;  %v5338_v63 = vor.u32 %v6710_v56, %v5337_v26 }
 0x263   :  { %v6502_v58 = vld [vmem:[#allocation8 + $0xb4] sm:$0xf0] }
 0x264   :  { %4082 = vmatpush.bf16.msra.mxu1 %v4890_v2  ;;  %4062 = vmatpush.bf16.msrb.mxu3 %v6230_v10  ;;  %v6566_v62 = vld [vmem:[#allocation8 + $0x2b4] sm:$0xf0]  ;;  %v4506_v16 = vor.u32 %v6502_v58, %v4505_v45  ;;  %v3819_v17 = vpop.f32.mrf.mxu0  ;;  %v3844_v47 = vadd.f32 %v3843_v42, %v3831_v59 }
 0x265   :  { %4050 = vmatmul.bf16.vlgmr.msrb.gmra.mxu2 %v7266_v41  ;;  %v6638_v2 = vld [vmem:[#allocation8 + $0x4f4] sm:$0xf0]  ;;  %v4762_v7 = vor.u32 %v6566_v62, %v4761_v61 }
 0x266   :  { %4094 = vmatpush.bf16.msra.mxu2 %v5178_v12  ;;  %4070 = vmatpush.bf16.msra.mxu0 %v4602_v20  ;;  %v5305_v4 = vld [vmem:[#allocation8 + $0x6d8] sm:$0xf]  ;;  %v5050_v12 = vor.u32 %v6638_v2, %v5049_v0  ;;  %v3857_v26 = vadd.f32 %v3856_v32, %v3844_v47  ;;  %v3845_v17 = vpop.f32.mrf.mxu2 }
 0x267   :  { %4063 = vmatmul.bf16.vlgmr.msrb.gmra.mxu3 %v7268_v46  ;;  %v6494_v10 = vld [vmem:[#allocation8 + $0x74] sm:$0xf0] }
 0x268   :  { %4107 = vmatpush.bf16.msra.mxu3 %v5434_v18  ;;  %4083 = vmatpush.bf16.msra.mxu1 %v4858_v23  ;;  %v4729_v13 = vld [vmem:[#allocation8 + $0x258] sm:$0xf]  ;;  %v5306_v18 = vor.u32 %v6702_v5, %v5305_v4  ;;  %v4474_v22 = vor.u32 %v6494_v10, %v4473_v9  ;;  %v4279_v0 = vmax.f32 %v3857_v26, 0.0 }
 0x269   :  { %v6558_v15 = vld [vmem:[#allocation8 + $0x274] sm:$0xf0] }
 0x26a   :  { %4095 = vmatpush.bf16.msra.mxu2 %v5146_v25  ;;  %4071 = vmatpush.bf16.msra.mxu0 %v4570_v37  ;;  %v5017_v51 = vld [vmem:[#allocation8 + $0x498] sm:$0xf]  ;;  %v4292_v25 = vperm.slane %v7305_v40, 6  ;;  %v4730_v27 = vor.u32 %v6558_v15, %v4729_v13 }
 0x26b   :  { %v6630_v19 = vld [vmem:[#allocation8 + $0x4b4] sm:$0xf0] }
 0x26c   :  { %4108 = vmatpush.bf16.msra.mxu3 %v5402_v31  ;;  %4084 = vmatpush.bf16.msra.mxu1 %v4826_v43  ;;  %v5273_v20 = vld [vmem:[#allocation8 + $0x698] sm:$0xf]  ;;  %v5018_v34 = vor.u32 %v6630_v19, %v5017_v51  ;;  %v4308_v50 = vperm.slane %v4292_v25, 0 }
 0x26d   :  { %v6694_v23 = vld [vmem:[#allocation8 + $0x6b4] sm:$0xf0] }
 0x26e   :  { %4096 = vmatpush.bf16.msra.mxu2 %v5114_v33  ;;  %4072 = vmatpush.bf16.msra.mxu0 %v4538_v55  ;;  %v4441_v3 = vld [vmem:[#allocation8 + $0x18] sm:$0xf]  ;;  %v5274_v43 = vor.u32 %v6694_v23, %v5273_v20  ;;  %v4316_v9 = vmul.f32 %v4308_v50, %v4279_v0 }
 0x26f   :  { %v6486_v24 = vld [vmem:[#allocation8 + $0x34] sm:$0xf0] }
 0x270   :  { %4109 = vmatpush.bf16.msra.mxu3 %v5370_v49  ;;  %4085 = vmatpush.bf16.msra.mxu1 %v4794_v57  ;;  %v4697_v28 = vld [vmem:[#allocation8 + $0x218] sm:$0xf]  ;;  %v4442_v48 = vor.u32 %v6486_v24, %v4441_v3  ;;  %v7345_v21 = vadd.f32 %v7327_v11, %v4316_v9 }
 0x271   :  { %v6550_v31 = vld [vmem:[#allocation8 + $0x234] sm:$0xf0] }
 0x272   :  { %4097 = vmatpush.bf16.msra.mxu2 %v5082_v60  ;;  %4073 = vmatpush.bf16.msra.mxu0 %v4506_v16  ;;  %v5689_v35 = vld [vmem:[#allocation8 + $0x9d8] sm:$0xf]  ;;  %v4698_v53 = vor.u32 %v6550_v31, %v4697_v28 }
 0x273   :  { %v6798_v37 = vld [vmem:[#allocation8 + $0x9f4] sm:$0xf0] }
 0x274   :  { %4110 = vmatpush.bf16.msra.mxu3 %v5338_v63  ;;  %4086 = vmatpush.bf16.msra.mxu1 %v4762_v7  ;;  %v5945_v38 = vld [vmem:[#allocation8 + $0xbd8] sm:$0xf]  ;;  %v5690_v52 = vor.u32 %v6798_v37, %v5689_v35 }
 0x275   :  { %v6862_v44 = vld [vmem:[#allocation8 + $0xbf4] sm:$0xf0] }
 0x276   :  { %4098 = vmatpush.bf16.msra.mxu2 %v5050_v12  ;;  %v4985_v39 = vld [vmem:[#allocation8 + $0x458] sm:$0xf]  ;;  %4074 = vmatpush.bf16.msra.mxu0 %v4474_v22  ;;  %v5946_v56 = vor.u32 %v6862_v44, %v5945_v38  ;;  %v3858_v22 = vpop.f32.mrf.mxu3 }
 0x277   :  { %v6622_v33 = vld [vmem:[#allocation8 + $0x474] sm:$0xf0] }
 0x278   :  { %4111 = vmatpush.bf16.msra.mxu3 %v5306_v18  ;;  %v5241_v49 = vld [vmem:[#allocation8 + $0x658] sm:$0xf]  ;;  %4087 = vmatpush.bf16.msra.mxu1 %v4730_v27  ;;  %v4986_v57 = vor.u32 %v6622_v33, %v4985_v39  ;;  %v872_v39 = vperm.slane %v7331_v29, 4  ;;  %v3882_v29 = vpop.f32.mrf.mxu1 }
 0x279   :  { %v6686_v40 = vld [vmem:[#allocation8 + $0x674] sm:$0xf0] }
 0x27a   :  { %v5657_v54 = vld [vmem:[#allocation8 + $0x998] sm:$0xf]  ;;  %4099 = vmatpush.bf16.msra.mxu2 %v5018_v34  ;;  %v5242_v59 = vor.u32 %v6686_v40, %v5241_v49  ;;  %4075 = vmatpush.bf16.msra.mxu0 %v4442_v48 }
 0x27b   :  { %v6790_v55 = vld [vmem:[#allocation8 + $0x9b4] sm:$0xf0] }
 0x27c   :  { %v5913_v45 = vld [vmem:[#allocation8 + $0xb98] sm:$0xf]  ;;  %4112 = vmatpush.bf16.msra.mxu3 %v5274_v43  ;;  %4088 = vmatpush.bf16.msra.mxu1 %v4698_v53  ;;  %v5658_v4 = vor.u32 %v6790_v55, %v5657_v54  ;;  %v3869_v54 = vpop.f32.mrf.mxu0 }
 0x27d   :  { %v6854_v58 = vld [vmem:[#allocation8 + $0xbb4] sm:$0xf0]  ;;  %4076 = vmatmul.bf16.vlgmr.msra.gmra.mxu0 %v7243_v1 }
 0x27e   :  { %v4953_v60 = vld [vmem:[#allocation8 + $0x418] sm:$0xf]  ;;  %4120 = vmatpush.bf16.msrb.mxu0 %v5690_v52  ;;  %4100 = vmatpush.bf16.msra.mxu2 %v4986_v57  ;;  %v5914_v10 = vor.u32 %v6854_v58, %v5913_v45  ;;  %v3870_v57 = vadd.f32 %v3869_v54, %v872_v39  ;;  %v3895_v39 = vpop.f32.mrf.mxu2 }
 0x27f   :  { %v6614_v61 = vld [vmem:[#allocation8 + $0x434] sm:$0xf0]  ;;  %4089 = vmatmul.bf16.vlgmr.msra.gmra.mxu1 %v7246_v6 }
 0x280   :  { %v5209_v62 = vld [vmem:[#allocation8 + $0x618] sm:$0xf]  ;;  %4133 = vmatpush.bf16.msrb.mxu1 %v5946_v56  ;;  %v4954_v12 = vor.u32 %v6614_v61, %v4953_v60  ;;  %4113 = vmatpush.bf16.msra.mxu3 %v5242_v59 }
 0x281   :  { %v6678_v63 = vld [vmem:[#allocation8 + $0x634] sm:$0xf0] }
 0x282   :  { %v6201_v2 = vld [vmem:[#allocation8 + $0xdd8] sm:$0xf]  ;;  %v5210_v18 = vor.u32 %v6678_v63, %v5209_v62  ;;  %4121 = vmatpush.bf16.msrb.mxu0 %v5658_v4  ;;  %4101 = vmatpush.bf16.msra.mxu2 %v4954_v12  ;;  %v3883_v63 = vadd.f32 %v3882_v29, %v3870_v57 }
 0x283   :  { %v6926_v16 = vld [vmem:[#allocation8 + $0xdf4] sm:$0xf0] }
 0x284   :  { %v6457_v5 = vld [vmem:[#allocation8 + $0xfd8] sm:$0xf]  ;;  %v6202_v51 = vor.u32 %v6926_v16, %v6201_v2  ;;  %4134 = vmatpush.bf16.msrb.mxu1 %v5914_v10  ;;  %4114 = vmatpush.bf16.msra.mxu3 %v5210_v18 }
 0x285   :  { %v6990_v7 = vld [vmem:[#allocation8 + $0xff4] sm:$0xf0]  ;;  %4102 = vmatmul.bf16.vlgmr.msra.gmra.mxu2 %v7251_v30 }
 0x286   :  { %v5625_v13 = vld [vmem:[#allocation8 + $0x958] sm:$0xf]  ;;  %v6458_v23 = vor.u32 %v6990_v7, %v6457_v5  ;;  %4146 = vmatpush.bf16.msrb.mxu2 %v6202_v51 }
 0x287   :  { %v6782_v15 = vld [vmem:[#allocation8 + $0x974] sm:$0xf0]  ;;  %4115 = vmatmul.bf16.vlgmr.msra.gmra.mxu3 %v7253_v36 }
 0x288   :  { %v5881_v19 = vld [vmem:[#allocation8 + $0xb58] sm:$0xf]  ;;  %v5626_v25 = vor.u32 %v6782_v15, %v5625_v13  ;;  %4159 = vmatpush.bf16.msrb.mxu3 %v6458_v23 }
 0x289   :  { %v6846_v20 = vld [vmem:[#allocation8 + $0xb74] sm:$0xf0] }
 0x28a   :  { %v6169_v3 = vld [vmem:[#allocation8 + $0xd98] sm:$0xf]  ;;  %v5882_v31 = vor.u32 %v6846_v20, %v5881_v19  ;;  %4122 = vmatpush.bf16.msrb.mxu0 %v5626_v25  ;;  %v3871_v20 = vpop.f32.mrf.mxu0 }
 0x28b   :  { %v6918_v24 = vld [vmem:[#allocation8 + $0xdb4] sm:$0xf0] }
 0x28c   :  { %v6425_v27 = vld [vmem:[#allocation8 + $0xf98] sm:$0xf]  ;;  %v6170_v37 = vor.u32 %v6918_v24, %v6169_v3  ;;  %4135 = vmatpush.bf16.msrb.mxu1 %v5882_v31  ;;  %v3884_v24 = vpop.f32.mrf.mxu1 }
 0x28d   :  { %v6982_v28 = vld [vmem:[#allocation8 + $0xfb4] sm:$0xf0] }
 0x28e   :  { %v5593_v34 = vld [vmem:[#allocation8 + $0x918] sm:$0xf]  ;;  %v6426_v42 = vor.u32 %v6982_v28, %v6425_v27  ;;  %4147 = vmatpush.bf16.msrb.mxu2 %v6170_v37 }
 0x28f   :  { %v6774_v35 = vld [vmem:[#allocation8 + $0x934] sm:$0xf0] }
 0x290   :  { %v5849_v11 = vld [vmem:[#allocation8 + $0xb18] sm:$0xf]  ;;  %v5594_v33 = vor.u32 %v6774_v35, %v5593_v34  ;;  %4160 = vmatpush.bf16.msrb.mxu3 %v6426_v42  ;;  %v6538_v42 = vld [vmem:[#allocation8 + $0x1dc] sm:$0xf] }
 0x291   :  { %v6838_v38 = vld [vmem:[#allocation8 + $0xb34] sm:$0xf0] }
 0x292   :  { %v6137_v43 = vld [vmem:[#allocation8 + $0xd58] sm:$0xf]  ;;  %v5850_v48 = vor.u32 %v6838_v38, %v5849_v11  ;;  %4123 = vmatpush.bf16.msrb.mxu0 %v5594_v33 }
 0x293   :  { %v6910_v44 = vld [vmem:[#allocation8 + $0xd74] sm:$0xf0] }
 0x294   :  { %v6393_v47 = vld [vmem:[#allocation8 + $0xf58] sm:$0xf]  ;;  %v6138_v50 = vor.u32 %v6910_v44, %v6137_v43  ;;  %4136 = vmatpush.bf16.msrb.mxu1 %v5850_v48  ;;  %v4667_v43 = vld [vmem:[#allocation8 + $0x1f8] sm:$0xf0] }
 0x295   :  { %v6974_v32 = vld [vmem:[#allocation8 + $0xf74] sm:$0xf0]  ;;  %v6602_v44 = vld [vmem:[#allocation8 + $0x3dc] sm:$0xf] }
 0x296   :  { %v5561_v49 = vld [vmem:[#allocation8 + $0x8d8] sm:$0xf]  ;;  %v6394_v55 = vor.u32 %v6974_v32, %v6393_v47  ;;  %4148 = vmatpush.bf16.msrb.mxu2 %v6138_v50  ;;  %v4923_v47 = vld [vmem:[#allocation8 + $0x3f8] sm:$0xf0] }
 0x297   :  { %v6766_v40 = vld [vmem:[#allocation8 + $0x8f4] sm:$0xf0]  ;;  %v4926_v57 = vor.u32 %v6602_v44, %v4923_v47 }
 0x298   :  { %v5817_v53 = vld [vmem:[#allocation8 + $0xad8] sm:$0xf]  ;;  %v5562_v45 = vor.u32 %v6766_v40, %v5561_v49  ;;  %4161 = vmatpush.bf16.msrb.mxu3 %v6394_v55  ;;  %v3896_v49 = vadd.f32 %v3895_v39, %v3883_v63  ;;  %v3908_v40 = vpop.f32.mrf.mxu3  ;;  %v4670_v55 = vor.u32 %v6538_v42, %v4667_v43  ;;  %v6650_v42 = vld [vmem:[#allocation8 + $0x55c] sm:$0xf] }
 0x299   :  { %v6830_v52 = vld [vmem:[#allocation8 + $0xaf4] sm:$0xf0]  ;;  %v5115_v43 = vld [vmem:[#allocation8 + $0x578] sm:$0xf0] }
 0x29a   :  { %v6105_v26 = vld [vmem:[#allocation8 + $0xd18] sm:$0xf]  ;;  %v5818_v59 = vor.u32 %v6830_v52, %v5817_v53  ;;  %4124 = vmatpush.bf16.msrb.mxu0 %v5562_v45  ;;  %v4635_v45 = vld [vmem:[#allocation8 + $0x1b8] sm:$0xf0] }
 0x29b   :  { %v6902_v56 = vld [vmem:[#allocation8 + $0xd34] sm:$0xf0]  ;;  %v6714_v39 = vld [vmem:[#allocation8 + $0x75c] sm:$0xf] }
 0x29c   :  { %v6361_v58 = vld [vmem:[#allocation8 + $0xf18] sm:$0xf]  ;;  %v6106_v0 = vor.u32 %v6902_v56, %v6105_v26  ;;  %4137 = vmatpush.bf16.msrb.mxu1 %v5818_v59  ;;  %v6530_v26 = vld [vmem:[#allocation8 + $0x19c] sm:$0xf]  ;;  %v7351_v56 = vadd.f32 %v3908_v40, %v3896_v49  ;;  %v5118_v49 = vor.u32 %v6650_v42, %v5115_v43 }
 0x29d   :  { %v6966_v60 = vld [vmem:[#allocation8 + $0xf34] sm:$0xf0]  ;;  %v6570_v40 = vld [vmem:[#allocation8 + $0x2dc] sm:$0xf] }
 0x29e   :  { %v5529_v61 = vld [vmem:[#allocation8 + $0x898] sm:$0xf]  ;;  %v6362_v4 = vor.u32 %v6966_v60, %v6361_v58  ;;  %4149 = vmatpush.bf16.msrb.mxu2 %v6106_v0  ;;  %v6594_v58 = vld [vmem:[#allocation8 + $0x39c] sm:$0xf] }
 0x29f   :  { %v6758_v62 = vld [vmem:[#allocation8 + $0x8b4] sm:$0xf0]  ;;  %v4891_v60 = vld [vmem:[#allocation8 + $0x3b8] sm:$0xf0] }
 0x2a0   :  { %v5785_v2 = vld [vmem:[#allocation8 + $0xa98] sm:$0xf]  ;;  %v5530_v9 = vor.u32 %v6758_v62, %v5529_v61  ;;  %4162 = vmatpush.bf16.msrb.mxu3 %v6362_v4  ;;  %v4638_v4 = vor.u32 %v6530_v26, %v4635_v45  ;;  %v3910_v20 = vpop.f32.mrf.mxu3  ;;  %v6706_v45 = vld [vmem:[#allocation8 + $0x71c] sm:$0xf] }
 0x2a1   :  { %v6822_v16 = vld [vmem:[#allocation8 + $0xab4] sm:$0xf0]  ;;  %v6794_v43 = vld [vmem:[#allocation8 + $0x9dc] sm:$0xf] }
 0x2a2   :  { %v6073_v5 = vld [vmem:[#allocation8 + $0xcd8] sm:$0xf]  ;;  %v5786_v13 = vor.u32 %v6822_v16, %v5785_v2  ;;  %4125 = vmatpush.bf16.msrb.mxu0 %v5530_v9  ;;  %v6666_v2 = vld [vmem:[#allocation8 + $0x5dc] sm:$0xf]  ;;  %v4894_v9 = vor.u32 %v6594_v58, %v4891_v60 }
 0x2a3   :  { %v6894_v7 = vld [vmem:[#allocation8 + $0xcf4] sm:$0xf0]  ;;  %v5179_v16 = vld [vmem:[#allocation8 + $0x5f8] sm:$0xf0] }
 0x2a4   :  { %v6329_v10 = vld [vmem:[#allocation8 + $0xed8] sm:$0xf]  ;;  %v6074_v18 = vor.u32 %v6894_v7, %v6073_v5  ;;  %4138 = vmatpush.bf16.msrb.mxu1 %v5786_v13  ;;  %v6730_v5 = vld [vmem:[#allocation8 + $0x7dc] sm:$0xf] }
 0x2a5   :  { %v6958_v12 = vld [vmem:[#allocation8 + $0xef4] sm:$0xf0]  ;;  %v5435_v7 = vld [vmem:[#allocation8 + $0x7f8] sm:$0xf0] }
 0x2a6   :  { %v5497_v15 = vld [vmem:[#allocation8 + $0x858] sm:$0xf]  ;;  %v6330_v22 = vor.u32 %v6958_v12, %v6329_v10  ;;  %4150 = vmatpush.bf16.msrb.mxu2 %v6074_v18  ;;  %v6522_v12 = vld [vmem:[#allocation8 + $0x15c] sm:$0xf]  ;;  %v5182_v18 = vor.u32 %v6666_v2, %v5179_v16 }
 0x2a7   :  { %v6750_v17 = vld [vmem:[#allocation8 + $0x874] sm:$0xf0]  ;;  %v4603_v13 = vld [vmem:[#allocation8 + $0x178] sm:$0xf0] }
 0x2a8   :  { %v5753_v51 = vld [vmem:[#allocation8 + $0xa58] sm:$0xf]  ;;  %v5498_v25 = vor.u32 %v6750_v17, %v5497_v15  ;;  %4163 = vmatpush.bf16.msrb.mxu3 %v6330_v22  ;;  %v3897_v15 = vpop.f32.mrf.mxu2  ;;  %v5438_v22 = vor.u32 %v6730_v5, %v5435_v7  ;;  %v4606_v24 = vor.u32 %v6522_v12, %v4603_v13  ;;  %v5339_v58 = vld [vmem:[#allocation8 + $0x738] sm:$0xf0]  ;;  %v7000_v12 = vld [vmem:[#allocation11] sm:$0xff] }
 0x2a9   :  { %v6814_v19 = vld [vmem:[#allocation8 + $0xa74] sm:$0xf0]  ;;  %v4763_v2 = vld [vmem:[#allocation8 + $0x2b8] sm:$0xf0]  ;;  %v5342_v16 = vor.u32 %v6706_v45, %v5339_v58  ;;  %v7358_v13 = vunpack.c.h.bf16 %v7000_v12 }
 0x2aa   :  { %v6041_v23 = vld [vmem:[#allocation8 + $0xc98] sm:$0xf]  ;;  %v5754_v34 = vor.u32 %v6814_v19, %v5753_v51  ;;  %4126 = vmatpush.bf16.msrb.mxu0 %v5498_v25  ;;  %v6586_v51 = vld [vmem:[#allocation8 + $0x35c] sm:$0xf] }
 0x2ab   :  { %v6886_v3 = vld [vmem:[#allocation8 + $0xcb4] sm:$0xf0]  ;;  %v4859_v19 = vld [vmem:[#allocation8 + $0x378] sm:$0xf0] }
 0x2ac   :  { %v6297_v27 = vld [vmem:[#allocation8 + $0xe98] sm:$0xf]  ;;  %v6042_v38 = vor.u32 %v6886_v3, %v6041_v23  ;;  %4139 = vmatpush.bf16.msrb.mxu1 %v5754_v34  ;;  %v6658_v23 = vld [vmem:[#allocation8 + $0x59c] sm:$0xf] }
 0x2ad   :  { %v6950_v28 = vld [vmem:[#allocation8 + $0xeb4] sm:$0xf0]  ;;  %v5147_v3 = vld [vmem:[#allocation8 + $0x5b8] sm:$0xf0] }
 0x2ae   :  { %v5465_v31 = vld [vmem:[#allocation8 + $0x818] sm:$0xf]  ;;  %v6298_v33 = vor.u32 %v6950_v28, %v6297_v27  ;;  %4151 = vmatpush.bf16.msrb.mxu2 %v6042_v38  ;;  %v6722_v25 = vld [vmem:[#allocation8 + $0x79c] sm:$0xf]  ;;  %v4862_v28 = vor.u32 %v6586_v51, %v4859_v19 }
 0x2af   :  { %v6742_v35 = vld [vmem:[#allocation8 + $0x834] sm:$0xf0]  ;;  %v5403_v27 = vld [vmem:[#allocation8 + $0x7b8] sm:$0xf0] }
 0x2b0   :  { %v5721_v37 = vld [vmem:[#allocation8 + $0xa18] sm:$0xf]  ;;  %v5466_v50 = vor.u32 %v6742_v35, %v5465_v31  ;;  %4164 = vmatpush.bf16.msrb.mxu3 %v6298_v33  ;;  %v6514_v31 = vld [vmem:[#allocation8 + $0x11c] sm:$0xf]  ;;  %v5150_v35 = vor.u32 %v6658_v23, %v5147_v3  ;;  %v5406_v38 = vor.u32 %v6722_v25, %v5403_v27 }
 0x2b1   :  { %v6806_v11 = vld [vmem:[#allocation8 + $0xa34] sm:$0xf0]  ;;  %v4571_v34 = vld [vmem:[#allocation8 + $0x138] sm:$0xf0] }
 0x2b2   :  { %v6009_v32 = vld [vmem:[#allocation8 + $0xc58] sm:$0xf]  ;;  %v5722_v54 = vor.u32 %v6806_v11, %v5721_v37  ;;  %4127 = vmatpush.bf16.msrb.mxu0 %v5466_v50  ;;  %v6578_v37 = vld [vmem:[#allocation8 + $0x31c] sm:$0xf]  ;;  %v4574_v44 = vor.u32 %v6514_v31, %v4571_v34 }
 0x2b3   :  { %v6878_v48 = vld [vmem:[#allocation8 + $0xc74] sm:$0xf0]  ;;  %v4827_v11 = vld [vmem:[#allocation8 + $0x338] sm:$0xf0] }
 0x2b4   :  { %v6265_v53 = vld [vmem:[#allocation8 + $0xe58] sm:$0xf]  ;;  %v6010_v29 = vor.u32 %v6878_v48, %v6009_v32  ;;  %4140 = vmatpush.bf16.msrb.mxu1 %v5722_v54  ;;  %v5371_v33 = vld [vmem:[#allocation8 + $0x778] sm:$0xf0]  ;;  %v4830_v47 = vor.u32 %v6578_v37, %v4827_v11 }
 0x2b5   :  { %v6942_v52 = vld [vmem:[#allocation8 + $0xe74] sm:$0xf0]  ;;  %4128 = vmatmul.bf16.vlgmr.msrb.gmra.mxu0 %v7260_v8  ;;  %v6506_v32 = vld [vmem:[#allocation8 + $0xdc] sm:$0xf] }
 0x2b6   :  { %v6266_v59 = vor.u32 %v6942_v52, %v6265_v53  ;;  %v5977_v61 = vld [vmem:[#allocation8 + $0xc18] sm:$0xf]  ;;  %4172 = vmatpush.bf16.msra.mxu0 %v4670_v55  ;;  %4152 = vmatpush.bf16.msrb.mxu2 %v6010_v29  ;;  %v4539_v48 = vld [vmem:[#allocation8 + $0xf8] sm:$0xf0]  ;;  %v3921_v53 = vpop.f32.mrf.mxu0  ;;  %v5374_v52 = vor.u32 %v6714_v39, %v5371_v33  ;;  %v3947_v33 = vpop.f32.mrf.mxu2 }
 0x2b7   :  { %v6870_v62 = vld [vmem:[#allocation8 + $0xc34] sm:$0xf0]  ;;  %4141 = vmatmul.bf16.vlgmr.msrb.gmra.mxu1 %v7262_v14  ;;  %v4795_v50 = vld [vmem:[#allocation8 + $0x2f8] sm:$0xf0]  ;;  %v3922_v26 = vadd.f32 %v3921_v53, %v7351_v56  ;;  %v4542_v29 = vor.u32 %v6506_v32, %v4539_v48 }
 0x2b8   :  { %v6233_v63 = vld [vmem:[#allocation8 + $0xe18] sm:$0xf]  ;;  %4185 = vmatpush.bf16.msra.mxu1 %v4926_v57  ;;  %v5978_v10 = vor.u32 %v6870_v62, %v5977_v61  ;;  %4165 = vmatpush.bf16.msrb.mxu3 %v6266_v59  ;;  %v6642_v54 = vld [vmem:[#allocation8 + $0x51c] sm:$0xf]  ;;  %v3934_v57 = vpop.f32.mrf.mxu1  ;;  %v4798_v60 = vor.u32 %v6570_v40, %v4795_v50  ;;  %v3960_v50 = vpop.f32.mrf.mxu3 }
 0x2b9   :  { %v6934_v0 = vld [vmem:[#allocation8 + $0xe34] sm:$0xf0]  ;;  %v5083_v55 = vld [vmem:[#allocation8 + $0x538] sm:$0xf0]  ;;  %v3935_v62 = vadd.f32 %v3934_v57, %v3922_v26 }
 0x2ba   :  { %v6234_v17 = vor.u32 %v6934_v0, %v6233_v63  ;;  %4173 = vmatpush.bf16.msra.mxu0 %v4638_v4  ;;  %4153 = vmatpush.bf16.msrb.mxu2 %v5978_v10  ;;  %v6498_v59 = vld [vmem:[#allocation8 + $0x9c] sm:$0xf]  ;;  %v5086_v63 = vor.u32 %v6642_v54, %v5083_v55 }
 0x2bb   :  { %v4507_v61 = vld [vmem:[#allocation8 + $0xb8] sm:$0xf0]  ;;  %v3948_v40 = vadd.f32 %v3947_v33, %v3935_v62 }
 0x2bc   :  { %4186 = vmatpush.bf16.msra.mxu1 %v4894_v9  ;;  %4166 = vmatpush.bf16.msrb.mxu3 %v6234_v17  ;;  %v6562_v0 = vld [vmem:[#allocation8 + $0x29c] sm:$0xf]  ;;  %v4510_v56 = vor.u32 %v6498_v59, %v4507_v61 }
 0x2bd   :  { %4154 = vmatmul.bf16.vlgmr.msrb.gmra.mxu2 %v7266_v41  ;;  %v6634_v4 = vld [vmem:[#allocation8 + $0x4dc] sm:$0xf]  ;;  %v4766_v10 = vor.u32 %v6562_v0, %v4763_v2  ;;  %v3961_v58 = vadd.f32 %v3960_v50, %v3948_v40 }
 0x2be   :  { %4198 = vmatpush.bf16.msra.mxu2 %v5182_v18  ;;  %4174 = vmatpush.bf16.msra.mxu0 %v4606_v24  ;;  %v5051_v5 = vld [vmem:[#allocation8 + $0x4f8] sm:$0xf0]  ;;  %v3923_v20 = vpop.f32.mrf.mxu0 }
 0x2bf   :  { %4167 = vmatmul.bf16.vlgmr.msrb.gmra.mxu3 %v7268_v46  ;;  %v6698_v7 = vld [vmem:[#allocation8 + $0x6dc] sm:$0xf]  ;;  %v5054_v18 = vor.u32 %v6634_v4, %v5051_v5  ;;  %v4280_v5 = vmax.f32 %v3961_v58, 0.0  ;;  %v3949_v20 = vpop.f32.mrf.mxu2 }
 0x2c0   :  { %4211 = vmatpush.bf16.msra.mxu3 %v5438_v22  ;;  %4187 = vmatpush.bf16.msra.mxu1 %v4862_v28  ;;  %v5307_v9 = vld [vmem:[#allocation8 + $0x6f8] sm:$0xf0]  ;;  %v3936_v25 = vpop.f32.mrf.mxu1 }
 0x2c1   :  { %v6490_v15 = vld [vmem:[#allocation8 + $0x5c] sm:$0xf]  ;;  %v5310_v22 = vor.u32 %v6698_v7, %v5307_v9 }
 0x2c2   :  { %4199 = vmatpush.bf16.msra.mxu2 %v5150_v35  ;;  %4175 = vmatpush.bf16.msra.mxu0 %v4574_v44  ;;  %v4475_v17 = vld [vmem:[#allocation8 + $0x78] sm:$0xf0]  ;;  %v4293_v35 = vperm.slane %v7358_v13, 0 }
 0x2c3   :  { %v6554_v51 = vld [vmem:[#allocation8 + $0x25c] sm:$0xf]  ;;  %v4478_v27 = vor.u32 %v6490_v15, %v4475_v17 }
 0x2c4   :  { %4212 = vmatpush.bf16.msra.mxu3 %v5406_v38  ;;  %4188 = vmatpush.bf16.msra.mxu1 %v4830_v47  ;;  %v4731_v19 = vld [vmem:[#allocation8 + $0x278] sm:$0xf0]  ;;  %v4309_v55 = vperm.slane %v4293_v35, 0 }
 0x2c5   :  { %v6626_v23 = vld [vmem:[#allocation8 + $0x49c] sm:$0xf]  ;;  %v4734_v37 = vor.u32 %v6554_v51, %v4731_v19 }
 0x2c6   :  { %4200 = vmatpush.bf16.msra.mxu2 %v5118_v49  ;;  %4176 = vmatpush.bf16.msra.mxu0 %v4542_v29  ;;  %v5019_v3 = vld [vmem:[#allocation8 + $0x4b8] sm:$0xf0]  ;;  %v4317_v15 = vmul.f32 %v4309_v55, %v4280_v5 }
 0x2c7   :  { %v6690_v24 = vld [vmem:[#allocation8 + $0x69c] sm:$0xf]  ;;  %v5022_v42 = vor.u32 %v6626_v23, %v5019_v3 }
 0x2c8   :  { %4213 = vmatpush.bf16.msra.mxu3 %v5374_v52  ;;  %4189 = vmatpush.bf16.msra.mxu1 %v4798_v60  ;;  %v5275_v28 = vld [vmem:[#allocation8 + $0x6b8] sm:$0xf0]  ;;  %v7363_v25 = vadd.f32 %v7345_v21, %v4317_v15 }
 0x2c9   :  { %v6482_v31 = vld [vmem:[#allocation8 + $0x1c] sm:$0xf]  ;;  %v5278_v47 = vor.u32 %v6690_v24, %v5275_v28 }
 0x2ca   :  { %4201 = vmatpush.bf16.msra.mxu2 %v5086_v63  ;;  %4177 = vmatpush.bf16.msra.mxu0 %v4510_v56  ;;  %v4443_v34 = vld [vmem:[#allocation8 + $0x38] sm:$0xf0] }
 0x2cb   :  { %v6546_v11 = vld [vmem:[#allocation8 + $0x21c] sm:$0xf]  ;;  %v4446_v53 = vor.u32 %v6482_v31, %v4443_v34 }
 0x2cc   :  { %4214 = vmatpush.bf16.msra.mxu3 %v5342_v16  ;;  %4190 = vmatpush.bf16.msra.mxu1 %v4766_v10  ;;  %v4699_v38 = vld [vmem:[#allocation8 + $0x238] sm:$0xf0] }
 0x2cd   :  { %v5691_v44 = vld [vmem:[#allocation8 + $0x9f8] sm:$0xf0]  ;;  %v4702_v26 = vor.u32 %v6546_v11, %v4699_v38 }
 0x2ce   :  { %4202 = vmatpush.bf16.msra.mxu2 %v5054_v18  ;;  %v6858_v39 = vld [vmem:[#allocation8 + $0xbdc] sm:$0xf]  ;;  %4178 = vmatpush.bf16.msra.mxu0 %v4478_v27  ;;  %v5694_v57 = vor.u32 %v6794_v43, %v5691_v44  ;;  %v3962_v27 = vpop.f32.mrf.mxu3 }
 0x2cf   :  { %v5947_v32 = vld [vmem:[#allocation8 + $0xbf8] sm:$0xf0] }
 0x2d0   :  { %4215 = vmatpush.bf16.msra.mxu3 %v5310_v22  ;;  %v6618_v48 = vld [vmem:[#allocation8 + $0x45c] sm:$0xf]  ;;  %4191 = vmatpush.bf16.msra.mxu1 %v4734_v37  ;;  %v5950_v60 = vor.u32 %v6858_v39, %v5947_v32 }
 0x2d1   :  { %v4987_v49 = vld [vmem:[#allocation8 + $0x478] sm:$0xf0] }
 0x2d2   :  { %v6682_v52 = vld [vmem:[#allocation8 + $0x65c] sm:$0xf]  ;;  %4203 = vmatpush.bf16.msra.mxu2 %v5022_v42  ;;  %v4990_v59 = vor.u32 %v6618_v48, %v4987_v49  ;;  %4179 = vmatpush.bf16.msra.mxu0 %v4446_v53 }
 0x2d3   :  { %v5243_v54 = vld [vmem:[#allocation8 + $0x678] sm:$0xf0] }
 0x2d4   :  { %v6786_v29 = vld [vmem:[#allocation8 + $0x99c] sm:$0xf]  ;;  %4216 = vmatpush.bf16.msra.mxu3 %v5278_v47  ;;  %v5246_v62 = vor.u32 %v6682_v52, %v5243_v54  ;;  %4192 = vmatpush.bf16.msra.mxu1 %v4702_v26  ;;  %v7367_v47 = vld [vmem:[#allocation10] sm:$0xff] }
 0x2d5   :  { %v5659_v45 = vld [vmem:[#allocation8 + $0x9b8] sm:$0xf0]  ;;  %4180 = vmatmul.bf16.vlgmr.msra.gmra.mxu0 %v7243_v1  ;;  %v873_v32 = vperm.slane %v7367_v47, 5 }
 0x2d6   :  { %v6850_v61 = vld [vmem:[#allocation8 + $0xb9c] sm:$0xf]  ;;  %4224 = vmatpush.bf16.msrb.mxu0 %v5694_v57  ;;  %v5662_v9 = vor.u32 %v6786_v29, %v5659_v45  ;;  %4204 = vmatpush.bf16.msra.mxu2 %v4990_v59 }
 0x2d7   :  { %v5915_v63 = vld [vmem:[#allocation8 + $0xbb8] sm:$0xf0]  ;;  %4193 = vmatmul.bf16.vlgmr.msra.gmra.mxu1 %v7246_v6 }
 0x2d8   :  { %v6610_v0 = vld [vmem:[#allocation8 + $0x41c] sm:$0xf]  ;;  %4237 = vmatpush.bf16.msrb.mxu1 %v5950_v60  ;;  %v5918_v17 = vor.u32 %v6850_v61, %v5915_v63  ;;  %4217 = vmatpush.bf16.msra.mxu3 %v5246_v62  ;;  %v3986_v60 = vpop.f32.mrf.mxu1 }
 0x2d9   :  { %v4955_v2 = vld [vmem:[#allocation8 + $0x438] sm:$0xf0] }
 0x2da   :  { %v6674_v16 = vld [vmem:[#allocation8 + $0x61c] sm:$0xf]  ;;  %v4958_v18 = vor.u32 %v6610_v0, %v4955_v2  ;;  %4225 = vmatpush.bf16.msrb.mxu0 %v5662_v9 }
 0x2db   :  { %v5211_v4 = vld [vmem:[#allocation8 + $0x638] sm:$0xf0] }
 0x2dc   :  { %v6922_v56 = vld [vmem:[#allocation8 + $0xddc] sm:$0xf]  ;;  %v5214_v22 = vor.u32 %v6674_v16, %v5211_v4  ;;  %4238 = vmatpush.bf16.msrb.mxu1 %v5918_v17  ;;  %4205 = vmatpush.bf16.msra.mxu2 %v4958_v18 }
 0x2dd   :  { %v6203_v7 = vld [vmem:[#allocation8 + $0xdf8] sm:$0xf0] }
 0x2de   :  { %v6986_v10 = vld [vmem:[#allocation8 + $0xfdc] sm:$0xf]  ;;  %v6206_v23 = vor.u32 %v6922_v56, %v6203_v7  ;;  %4218 = vmatpush.bf16.msra.mxu3 %v5214_v22 }
 0x2df   :  { %v6459_v12 = vld [vmem:[#allocation8 + $0xff8] sm:$0xf0]  ;;  %4206 = vmatmul.bf16.vlgmr.msra.gmra.mxu2 %v7251_v30  ;;  %v3973_v30 = vpop.f32.mrf.mxu0 }
 0x2e0   :  { %v6778_v51 = vld [vmem:[#allocation8 + $0x95c] sm:$0xf]  ;;  %v6462_v28 = vor.u32 %v6986_v10, %v6459_v12  ;;  %4250 = vmatpush.bf16.msrb.mxu2 %v6206_v23  ;;  %v3974_v58 = vadd.f32 %v3973_v30, %v873_v32  ;;  %v4012_v32 = vpop.f32.mrf.mxu3 }
 0x2e1   :  { %v5627_v19 = vld [vmem:[#allocation8 + $0x978] sm:$0xf0]  ;;  %4219 = vmatmul.bf16.vlgmr.msra.gmra.mxu3 %v7253_v36 }
 0x2e2   :  { %v6842_v3 = vld [vmem:[#allocation8 + $0xb5c] sm:$0xf]  ;;  %v5630_v35 = vor.u32 %v6778_v51, %v5627_v19  ;;  %4263 = vmatpush.bf16.msrb.mxu3 %v6462_v28  ;;  %v3987_v2 = vadd.f32 %v3986_v60, %v3974_v58  ;;  %v3988_v28 = vpop.f32.mrf.mxu1 }
 0x2e3   :  { %v5883_v24 = vld [vmem:[#allocation8 + $0xb78] sm:$0xf0] }
 0x2e4   :  { %v6914_v31 = vld [vmem:[#allocation8 + $0xd9c] sm:$0xf]  ;;  %v5886_v1 = vor.u32 %v6842_v3, %v5883_v24  ;;  %4226 = vmatpush.bf16.msrb.mxu0 %v5630_v35 }
 0x2e5   :  { %v6171_v34 = vld [vmem:[#allocation8 + $0xdb8] sm:$0xf0] }
 0x2e6   :  { %v6978_v37 = vld [vmem:[#allocation8 + $0xf9c] sm:$0xf]  ;;  %v6174_v43 = vor.u32 %v6914_v31, %v6171_v34  ;;  %4239 = vmatpush.bf16.msrb.mxu1 %v5886_v1 }
 0x2e7   :  { %v6427_v11 = vld [vmem:[#allocation8 + $0xfb8] sm:$0xf0]  ;;  %v3975_v23 = vpop.f32.mrf.mxu0 }
 0x2e8   :  { %v6770_v38 = vld [vmem:[#allocation8 + $0x91c] sm:$0xf]  ;;  %v6430_v39 = vor.u32 %v6978_v37, %v6427_v11  ;;  %4251 = vmatpush.bf16.msrb.mxu2 %v6174_v43  ;;  %v4014_v60 = vpop.f32.mrf.mxu3 }
 0x2e9   :  { %v5595_v42 = vld [vmem:[#allocation8 + $0x938] sm:$0xf0] }
 0x2ea   :  { %v6834_v21 = vld [vmem:[#allocation8 + $0xb1c] sm:$0xf]  ;;  %v5598_v48 = vor.u32 %v6770_v38, %v5595_v42  ;;  %4264 = vmatpush.bf16.msrb.mxu3 %v6430_v39 }
 0x2eb   :  { %v5851_v44 = vld [vmem:[#allocation8 + $0xb38] sm:$0xf0] }
 0x2ec   :  { %v6906_v6 = vld [vmem:[#allocation8 + $0xd5c] sm:$0xf]  ;;  %v5854_v50 = vor.u32 %v6834_v21, %v5851_v44  ;;  %4227 = vmatpush.bf16.msrb.mxu0 %v5598_v48  ;;  %v3999_v21 = vpop.f32.mrf.mxu2 }
 0x2ed   :  { %v6139_v33 = vld [vmem:[#allocation8 + $0xd78] sm:$0xf0] }
 0x2ee   :  { %v6970_v49 = vld [vmem:[#allocation8 + $0xf5c] sm:$0xf]  ;;  %v6142_v54 = vor.u32 %v6906_v6, %v6139_v33  ;;  %4240 = vmatpush.bf16.msrb.mxu1 %v5854_v50  ;;  %v4000_v33 = vadd.f32 %v3999_v21, %v3987_v2  ;;  %v4294_v2 = vperm.slane %v7358_v13, 2 }
 0x2ef   :  { %v6395_v40 = vld [vmem:[#allocation8 + $0xf78] sm:$0xf0] }
 0x2f0   :  { %v6762_v53 = vld [vmem:[#allocation8 + $0x8dc] sm:$0xf]  ;;  %v6398_v57 = vor.u32 %v6970_v49, %v6395_v40  ;;  %4252 = vmatpush.bf16.msrb.mxu2 %v6142_v54 }
 0x2f1   :  { %v5563_v52 = vld [vmem:[#allocation8 + $0x8f8] sm:$0xf0] }
 0x2f2   :  { %v6826_v55 = vld [vmem:[#allocation8 + $0xadc] sm:$0xf]  ;;  %v5566_v59 = vor.u32 %v6762_v53, %v5563_v52  ;;  %4265 = vmatpush.bf16.msrb.mxu3 %v6398_v57  ;;  %v4013_v53 = vadd.f32 %v4012_v32, %v4000_v33 }
 0x2f3   :  { %v5819_v26 = vld [vmem:[#allocation8 + $0xaf8] sm:$0xf0] }
 0x2f4   :  { %v6898_v29 = vld [vmem:[#allocation8 + $0xd1c] sm:$0xf]  ;;  %v5822_v36 = vor.u32 %v6826_v55, %v5819_v26  ;;  %4228 = vmatpush.bf16.msrb.mxu0 %v5566_v59  ;;  %v4025_v59 = vpop.f32.mrf.mxu0 }
 0x2f5   :  { %v6107_v45 = vld [vmem:[#allocation8 + $0xd38] sm:$0xf0] }
 0x2f6   :  { %v6962_v61 = vld [vmem:[#allocation8 + $0xf1c] sm:$0xf]  ;;  %v6110_v16 = vor.u32 %v6898_v29, %v6107_v45  ;;  %4241 = vmatpush.bf16.msrb.mxu1 %v5822_v36  ;;  %v4001_v45 = vpop.f32.mrf.mxu2 }
 0x2f7   :  { %v6363_v63 = vld [vmem:[#allocation8 + $0xf38] sm:$0xf0] }
 0x2f8   :  { %v6754_v0 = vld [vmem:[#allocation8 + $0x89c] sm:$0xf]  ;;  %v6366_v56 = vor.u32 %v6962_v61, %v6363_v63  ;;  %4253 = vmatpush.bf16.msrb.mxu2 %v6110_v16  ;;  %v4026_v61 = vadd.f32 %v4025_v59, %v4013_v53  ;;  %v4038_v63 = vpop.f32.mrf.mxu1 }
 0x2f9   :  { %v5531_v62 = vld [vmem:[#allocation8 + $0x8b8] sm:$0xf0] }
 0x2fa   :  { %v6818_v4 = vld [vmem:[#allocation8 + $0xa9c] sm:$0xf]  ;;  %v5534_v10 = vor.u32 %v6754_v0, %v5531_v62  ;;  %4266 = vmatpush.bf16.msrb.mxu3 %v6366_v56  ;;  %v4039_v36 = vadd.f32 %v4038_v63, %v4026_v61  ;;  %v4310_v56 = vperm.slane %v4294_v2, 0 }
 0x2fb   :  { %v5787_v5 = vld [vmem:[#allocation8 + $0xab8] sm:$0xf0] }
 0x2fc   :  { %v6890_v7 = vld [vmem:[#allocation8 + $0xcdc] sm:$0xf]  ;;  %v5790_v17 = vor.u32 %v6818_v4, %v5787_v5  ;;  %4229 = vmatpush.bf16.msrb.mxu0 %v5534_v10  ;;  %v4027_v0 = vpop.f32.mrf.mxu0  ;;  %v4064_v4 = vpop.f32.mrf.mxu3 }
 0x2fd   :  { %v6075_v9 = vld [vmem:[#allocation8 + $0xcf8] sm:$0xf0]  ;;  %v4296_v0 = vperm.slane %v7358_v13, 6 }
 0x2fe   :  { %v6954_v12 = vld [vmem:[#allocation8 + $0xedc] sm:$0xf]  ;;  %v6078_v19 = vor.u32 %v6890_v7, %v6075_v9  ;;  %4242 = vmatpush.bf16.msrb.mxu1 %v5790_v17  ;;  %v4051_v16 = vpop.f32.mrf.mxu2 }
 0x2ff   :  { %v6331_v15 = vld [vmem:[#allocation8 + $0xef8] sm:$0xf0] }
 0x300   :  { %v6746_v18 = vld [vmem:[#allocation8 + $0x85c] sm:$0xf]  ;;  %v6334_v3 = vor.u32 %v6954_v12, %v6331_v15  ;;  %4254 = vmatpush.bf16.msrb.mxu2 %v6078_v19  ;;  %v4040_v62 = vpop.f32.mrf.mxu1 }
 0x301   :  { %v5499_v51 = vld [vmem:[#allocation8 + $0x878] sm:$0xf0] }
 0x302   :  { %v6810_v20 = vld [vmem:[#allocation8 + $0xa5c] sm:$0xf]  ;;  %v5502_v31 = vor.u32 %v6746_v18, %v5499_v51  ;;  %4267 = vmatpush.bf16.msrb.mxu3 %v6334_v3 }
 0x303   :  { %v5755_v22 = vld [vmem:[#allocation8 + $0xa78] sm:$0xf0] }
 0x304   :  { %v6882_v24 = vld [vmem:[#allocation8 + $0xc9c] sm:$0xf]  ;;  %v5758_v37 = vor.u32 %v6810_v20, %v5755_v22  ;;  %4230 = vmatpush.bf16.msrb.mxu0 %v5502_v31  ;;  %v4066_v10 = vpop.f32.mrf.mxu3  ;;  %v4077_v12 = vpop.f32.mrf.mxu0 }
 0x305   :  { %v6043_v27 = vld [vmem:[#allocation8 + $0xcb8] sm:$0xf0] }
 0x306   :  { %v6946_v34 = vld [vmem:[#allocation8 + $0xe9c] sm:$0xf]  ;;  %v6046_v38 = vor.u32 %v6882_v24, %v6043_v27  ;;  %4243 = vmatpush.bf16.msrb.mxu1 %v5758_v37  ;;  %v4053_v9 = vpop.f32.mrf.mxu2 }
 0x307   :  { %v6299_v35 = vld [vmem:[#allocation8 + $0xeb8] sm:$0xf0]  ;;  %v4331_v9 = vstv %s7393_s6 }
 0x308   :  { %v6738_v11 = vld [vmem:[#allocation8 + $0x81c] sm:$0xf]  ;;  %v6302_v44 = vor.u32 %v6946_v34, %v6299_v35  ;;  %4255 = vmatpush.bf16.msrb.mxu2 %v6046_v38  ;;  %v4090_v17 = vpop.f32.mrf.mxu1 }
 0x309   :  { %v5467_v1 = vld [vmem:[#allocation8 + $0x838] sm:$0xf0] }
 0x30a   :  { %v6802_v42 = vld [vmem:[#allocation8 + $0xa1c] sm:$0xf]  ;;  %v5470_v48 = vor.u32 %v6738_v11, %v5467_v1  ;;  %4268 = vmatpush.bf16.msrb.mxu3 %v6302_v44  ;;  %v4295_v11 = vperm.slane %v7358_v13, 4 }
 0x30b   :  { %v5723_v43 = vld [vmem:[#allocation8 + $0xa38] sm:$0xf0] }
 0x30c   :  { %v6874_v39 = vld [vmem:[#allocation8 + $0xc5c] sm:$0xf]  ;;  %v5726_v50 = vor.u32 %v6802_v42, %v5723_v43  ;;  %4231 = vmatpush.bf16.msrb.mxu0 %v5470_v48  ;;  %v4079_v51 = vpop.f32.mrf.mxu0  ;;  %v4116_v23 = vpop.f32.mrf.mxu3  ;;  %v4311_v21 = vperm.slane %v4295_v11, 0 }
 0x30d   :  { %v6011_v6 = vld [vmem:[#allocation8 + $0xc78] sm:$0xf0] }
 0x30e   :  { %v6938_v49 = vld [vmem:[#allocation8 + $0xe5c] sm:$0xf]  ;;  %v6014_v52 = vor.u32 %v6874_v39, %v6011_v6  ;;  %4244 = vmatpush.bf16.msrb.mxu1 %v5726_v50  ;;  %v4103_v20 = vpop.f32.mrf.mxu2 }
 0x30f   :  { %v6267_v40 = vld [vmem:[#allocation8 + $0xe78] sm:$0xf0]  ;;  %4232 = vmatmul.bf16.vlgmr.msrb.gmra.mxu0 %v7260_v8  ;;  %v4052_v8 = vadd.f32 %v4051_v16, %v4039_v36 }
 0x310   :  { %v6270_v54 = vor.u32 %v6938_v49, %v6267_v40  ;;  %v6866_v55 = vld [vmem:[#allocation8 + $0xc1c] sm:$0xf]  ;;  %4256 = vmatpush.bf16.msrb.mxu2 %v6014_v52  ;;  %v4092_v19 = vpop.f32.mrf.mxu1 }
 0x311   :  { %v5979_v26 = vld [vmem:[#allocation8 + $0xc38] sm:$0xf0]  ;;  %4245 = vmatmul.bf16.vlgmr.msrb.gmra.mxu1 %v7262_v14  ;;  %v4065_v5 = vadd.f32 %v4064_v4, %v4052_v8  ;;  %v4312_v4 = vperm.slane %v4296_v0, 0 }
 0x312   :  { %v6930_v30 = vld [vmem:[#allocation8 + $0xe1c] sm:$0xf]  ;;  %v5982_v29 = vor.u32 %v6866_v55, %v5979_v26  ;;  %4269 = vmatpush.bf16.msrb.mxu3 %v6270_v54  ;;  %v875_v54 = vperm.slane %v7367_v47, 7 }
 0x313   :  { %v6235_v57 = vld [vmem:[#allocation8 + $0xe38] sm:$0xf0]  ;;  %v4281_v14 = vmax.f32 %v4065_v5, 0.0 }
 0x314   :  { %v6238_v58 = vor.u32 %v6930_v30, %v6235_v57  ;;  %4257 = vmatpush.bf16.msrb.mxu2 %v5982_v29  ;;  %v4118_v27 = vpop.f32.mrf.mxu3 }
 0x315   :  { %v4318_v7 = vmul.f32 %v4310_v56, %v4281_v14 }
 0x316   :  { %4270 = vmatpush.bf16.msrb.mxu3 %v6238_v58  ;;  %v4105_v24 = vpop.f32.mrf.mxu2 }
 0x317   :  { %4258 = vmatmul.bf16.vlgmr.msrb.gmra.mxu2 %v7266_v41  ;;  %v4325_v41 = vadd.f32 %v7363_v25, %v4318_v7 }
 0x319   :  { %4271 = vmatmul.bf16.vlgmr.msrb.gmra.mxu3 %v7268_v46  ;;  %v874_v46 = vperm.slane %v7367_v47, 6 }
 0x31b   :  { %v4078_v15 = vadd.f32 %v4077_v12, %v874_v46 }
 0x31d   :  { %v4091_v18 = vadd.f32 %v4090_v17, %v4078_v15 }
 0x31f   :  { %v4104_v22 = vadd.f32 %v4103_v20, %v4091_v18 }
 0x321   :  { %v4117_v3 = vadd.f32 %v4116_v23, %v4104_v22 }
 0x332   :  { %v4129_v28 = vpop.f32.mrf.mxu0 }
 0x333   :  { %v4130_v31 = vadd.f32 %v4129_v28, %v4117_v3 }
 0x334   :  { %v4142_v34 = vpop.f32.mrf.mxu1 }
 0x335   :  { %v4143_v35 = vadd.f32 %v4142_v34, %v4130_v31 }
 0x33a   :  { %v4131_v37 = vpop.f32.mrf.mxu0 }
 0x33c   :  { %v4144_v25 = vpop.f32.mrf.mxu1 }
 0x340   :  { %v4155_v1 = vpop.f32.mrf.mxu2 }
 0x341   :  { %v4156_v38 = vadd.f32 %v4155_v1, %v4143_v35 }
 0x342   :  { %v4168_v42 = vpop.f32.mrf.mxu3 }
 0x343   :  { %v4169_v43 = vadd.f32 %v4168_v42, %v4156_v38 }
 0x345   :  { %v4282_v44 = vmax.f32 %v4169_v43, 0.0 }
 0x347   :  { %v4319_v39 = vmul.f32 %v4311_v21, %v4282_v44 }
 0x348   :  { %v4157_v6 = vpop.f32.mrf.mxu2 }
 0x349   :  { %v4326_v32 = vadd.f32 %v4325_v41, %v4319_v39 }
 0x34a   :  { %v4170_v33 = vpop.f32.mrf.mxu3 }
 0x352   :  { %v4181_v48 = vpop.f32.mrf.mxu0 }
 0x353   :  { %v4182_v30 = vadd.f32 %v4181_v48, %v875_v54 }
 0x354   :  { %v4194_v49 = vpop.f32.mrf.mxu1 }
 0x355   :  { %v4195_v57 = vadd.f32 %v4194_v49, %v4182_v30 }
 0x35a   :  { %v4183_v40 = vpop.f32.mrf.mxu0 }
 0x35c   :  { %v4196_v50 = vpop.f32.mrf.mxu1 }
 0x362   :  { %v4207_v53 = vpop.f32.mrf.mxu2 }
 0x363   :  { %v4208_v45 = vadd.f32 %v4207_v53, %v4195_v57 }
 0x364   :  { %v4220_v52 = vpop.f32.mrf.mxu3 }
 0x365   :  { %v4221_v60 = vadd.f32 %v4220_v52, %v4208_v45 }
 0x36a   :  { %v4209_v55 = vpop.f32.mrf.mxu2 }
 0x36c   :  { %v4222_v26 = vpop.f32.mrf.mxu3 }
 0x38c   :  { %v4233_v29 = vpop.f32.mrf.mxu0 }
 0x38d   :  { %v4234_v59 = vadd.f32 %v4233_v29, %v4221_v60 }
 0x38e   :  { %v4246_v58 = vpop.f32.mrf.mxu1 }
 0x38f   :  { %v4247_v36 = vadd.f32 %v4246_v58, %v4234_v59 }
 0x394   :  { %v4235_v61 = vpop.f32.mrf.mxu0 }
 0x396   :  { %v4248_v63 = vpop.f32.mrf.mxu1 }
 0x39a   :  { %v4259_v62 = vpop.f32.mrf.mxu2 }
 0x39b   :  { %v4260_v2 = vadd.f32 %v4259_v62, %v4247_v36 }
 0x39c   :  { %v4272_v16 = vpop.f32.mrf.mxu3 }
 0x39d   :  { %v4273_v8 = vadd.f32 %v4272_v16, %v4260_v2 }
 0x39f   :  { %v4283_v47 = vmax.f32 %v4273_v8, 0.0 }
 0x3a1   :  { %v4320_v5 = vmul.f32 %v4312_v4, %v4283_v47 }
 0x3a2   :  { %v4261_v56 = vpop.f32.mrf.mxu2 }
 0x3a3   :  { %v4327_v7 = vadd.f32 %v4326_v32, %v4320_v5 }
 0x3a4   :  { %v4274_v14 = vpop.f32.mrf.mxu3 }
 0x3a5   :  { %4328 = vadd.xlane.f32.xlu0 %v4327_v7 }
 0x418   :  { %v4329_v10 = vpop.xlane.xlu0 %4328 }
 0x419   :  { %v4332_v41 = vadd.f32 %v4331_v9, %v4329_v10 }
 0x41b   :  { %4334 = vst.msk [vmem:[%s7394_s7] sm:$0xff] %vm4333_vm1, %v4332_v41 }
 0x41c   :  { %4339 = vsyncpa [#allocation4], 1 }
 0x41d   :  { %4340 = vsyncpa [#allocation6], 1 }
 0x41e   :  { %4341 = vsyncpa [#allocation9], 1 }
 0x41f   :  { %4342 = vsyncpa [#allocation12], 1 }

</bundles_post_ra>
